<compile_context>
chip_gen: v5e
topology: v5e:2x2
jax: 0.10.0
libtpu: 0.0.40
codegen_flags: <defaults>
</compile_context>

<pallas_src>
import jax
import jax.numpy as jnp
from jax.experimental import pallas as pl
from jax.experimental.pallas import tpu as pltpu

# Module globals (synthetic, small shapes consistent with the module).
RPIX = 16          # image rows
CPIX = 16          # image cols
NCHANNELS = 4      # input channels
HIDDEN = 32        # encoder hidden channels


def _fused_autoencoder_kernel(x_ref, w1_ref, b1_ref, w2t_ref, b2_ref, o_ref,
                              xpad_ref, hpad_ref):
    """Fused conv3x3+ReLU -> conv3x3+Sigmoid for one batch element.

    x_ref:   (1, H, W, Cin)     NHWC input tile (VMEM)
    w1_ref:  (9*Cin, HID)       encoder weights, im2col row order (kh, kw, c)
    b1_ref:  (1, HID)           encoder bias
    w2t_ref: (Cout, 9*HID)      decoder weights, transposed im2col layout
    b2_ref:  (Cout, 1)          decoder bias
    o_ref:   (1, Cout, H*W)     flattened-NCHW output tile (lane-dense store)
    xpad_ref:(H+2, W+2, Cin)    VMEM scratch, zero-padded input
    hpad_ref:(H+2, W+2, HID)    VMEM scratch, zero-padded hidden activation
    """
    H = x_ref.shape[1]
    W = x_ref.shape[2]
    Cin = x_ref.shape[3]
    HID = w1_ref.shape[1]

    # In-kernel 'same' padding: zero the scratch (tiny) and copy the interior.
    # Zeroing every step keeps correctness under megacore-parallel grids.
    xpad_ref[...] = jnp.zeros_like(xpad_ref)
    hpad_ref[...] = jnp.zeros_like(hpad_ref)
    xpad_ref[1:H + 1, 1:W + 1, :] = x_ref[0]

    # ---- Encoder: im2col (K = 9*Cin) + single GEMM + bias + ReLU ----------
    taps1 = [xpad_ref[kh:kh + H, kw:kw + W, :].reshape(H * W, Cin)
             for kh in range(3) for kw in range(3)]
    patches1 = jnp.concatenate(taps1, axis=-1)              # (H*W, 9*Cin)
    h = jax.lax.dot_general(patches1, w1_ref[...],
                            (((1,), (0,)), ((), ())),
                            preferred_element_type=jnp.float32)   # (H*W, HID)
    h = jnp.maximum(h + b1_ref[0][None, :], 0.0)
    hpad_ref[1:H + 1, 1:W + 1, :] = h.reshape(H, W, HID)

    # ---- Decoder: im2col (K = 9*HID) + single GEMM + bias + Sigmoid -------
    taps2 = [hpad_ref[kh:kh + H, kw:kw + W, :].reshape(H * W, HID)
             for kh in range(3) for kw in range(3)]
    patches2 = jnp.concatenate(taps2, axis=-1)              # (H*W, 9*HID)
    # Contract the last dims of both operands (q@k^T pattern) so the result is
    # directly (Cout, H*W): lane-dense (256 lanes) and already in NCHW order.
    y_t = jax.lax.dot_general(w2t_ref[...], patches2,
                              (((1,), (1,)), ((), ())),
                              preferred_element_type=jnp.float32)  # (Cout, H*W)
    y_t = jax.nn.sigmoid(y_t + b2_ref[...])
    o_ref[0] = y_t.astype(o_ref.dtype)


def _fused_forward_nhwc(x_nhwc, w1r, b1r, w2t, b2r):
    """One pallas_call over the batch; returns flattened-NCHW (N, Cout, H*W)."""
    N, H, W, Cin = x_nhwc.shape
    Cout = w2t.shape[0]
    HID = w1r.shape[1]
    HW = H * W

    return pl.pallas_call(
        _fused_autoencoder_kernel,
        out_shape=jax.ShapeDtypeStruct((N, Cout, HW), x_nhwc.dtype),
        grid_spec=pltpu.PrefetchScalarGridSpec(
            num_scalar_prefetch=0,
            grid=(N,),
            in_specs=[
                pl.BlockSpec((1, H, W, Cin), lambda n: (n, 0, 0, 0)),
                pl.BlockSpec(w1r.shape, lambda n: (0, 0)),
                pl.BlockSpec(b1r.shape, lambda n: (0, 0)),
                pl.BlockSpec(w2t.shape, lambda n: (0, 0)),
                pl.BlockSpec(b2r.shape, lambda n: (0, 0)),
            ],
            out_specs=pl.BlockSpec((1, Cout, HW), lambda n: (n, 0, 0)),
            scratch_shapes=[
                pltpu.VMEM((H + 2, W + 2, Cin), jnp.float32),   # padded input
                pltpu.VMEM((H + 2, W + 2, HID), jnp.float32),   # padded hidden
            ],
        ),
        compiler_params=pltpu.CompilerParams(
            dimension_semantics=("parallel",)),
    )(x_nhwc, w1r, b1r, w2t, b2r)


def init_params(key):
    """Deterministic parameter init (kaiming-like scaling)."""
    k1, k2, k3, k4 = jax.random.split(key, 4)
    fan1 = 3 * 3 * NCHANNELS
    fan2 = 3 * 3 * HIDDEN
    w1 = jax.random.normal(k1, (3, 3, NCHANNELS, HIDDEN), jnp.float32) * (2.0 / fan1) ** 0.5
    b1 = jax.random.normal(k2, (HIDDEN,), jnp.float32) * 0.01
    w2 = jax.random.normal(k3, (3, 3, HIDDEN, NCHANNELS), jnp.float32) * (2.0 / fan2) ** 0.5
    b2 = jax.random.normal(k4, (NCHANNELS,), jnp.float32) * 0.01
    return {"w1": w1, "b1": b1, "w2": w2, "b2": b2}


@jax.jit
def optical_damage_forward(x_nchw, params):
    """OpticalDamageBase.forward: NCHW in, NCHW out (matches PyTorch layout)."""
    N, C, H, W = x_nchw.shape
    x_nhwc = jnp.transpose(x_nchw, (0, 2, 3, 1))                 # tiny XLA op
    # Weight prep (free / negligible XLA ops): im2col layouts.
    w1r = params["w1"].reshape(9 * C, HIDDEN)                    # (36, 32)
    b1r = params["b1"].reshape(1, HIDDEN)                        # (1, 32)
    w2t = jnp.transpose(params["w2"].reshape(9 * HIDDEN, C))     # (C, 288)
    b2r = params["b2"].reshape(C, 1)                             # (C, 1)
    y_flat = _fused_forward_nhwc(x_nhwc, w1r, b1r, w2t, b2r)     # (N, C, H*W)
    return y_flat.reshape(N, C, H, W)                            # already NCHW


def _reference_forward(x_nchw, params):
    """Pure-JAX reference (same math) for a correctness check."""
    x = jnp.transpose(x_nchw, (0, 2, 3, 1))

    def conv(x, w, b):
        N, H, W, Cin = x.shape
        xp = jnp.pad(x, ((0, 0), (1, 1), (1, 1), (0, 0)))
        cols = jnp.stack([xp[:, kh:kh + H, kw:kw + W, :]
                          for kh in range(3) for kw in range(3)], axis=3)
        wr = w.reshape(9, Cin, -1)
        return jnp.einsum("nhwkc,kco->nhwo", cols, wr,
                          precision=jax.lax.Precision.HIGHEST) + b

    h = jnp.maximum(conv(x, params["w1"], params["b1"]), 0.0)
    y = jax.nn.sigmoid(conv(h, params["w2"], params["b2"]))
    return jnp.transpose(y, (0, 3, 1, 2))


if __name__ == "__main__":
    key = jax.random.PRNGKey(0)
    kx, kp = jax.random.split(key)
    params = init_params(kp)
    # Small shapes consistent with the module: batch=2, C=4, 16x16 image.
    x = jax.random.normal(kx, (2, NCHANNELS, RPIX, CPIX), jnp.float32)

    out = optical_damage_forward(x, params)
    jax.block_until_ready(out)
    assert out.shape == (2, NCHANNELS, RPIX, CPIX)

    ref = _reference_forward(x, params)
    max_err = float(jnp.max(jnp.abs(out - ref)))
    assert max_err < 1e-3, f"max abs error vs reference: {max_err}"

    print("KERNEL_OK")
</pallas_src>

<mosaic_0001>
module attributes {stable_mosaic.version = 11 : i64} {
  func.func @_fused_autoencoder_kernel(%arg0: i32, %arg1: memref<1x16x16x4xf32, #tpu.memory_space<vmem>>, %arg2: memref<36x32xf32, #tpu.memory_space<vmem>>, %arg3: memref<1x32xf32, #tpu.memory_space<vmem>>, %arg4: memref<4x288xf32, #tpu.memory_space<vmem>>, %arg5: memref<4x1xf32, #tpu.memory_space<vmem>>, %arg6: memref<1x4x256xf32, #tpu.memory_space<vmem>>, %arg7: memref<18x18x4xf32, #tpu.memory_space<vmem>>, %arg8: memref<18x18x32xf32, #tpu.memory_space<vmem>>) attributes {dimension_semantics = [#tpu.dimension_semantics<parallel>], iteration_bounds = array<i64: 2>, scalar_prefetch = 0 : i64, scratch_operands = 2 : i64, tpu.core_type = #tpu.core_type<tc>, window_params = [{transform_indices = @transform_0, window_bounds = array<i64: 1, 16, 16, 4>}, {pipeline_mode = #tpu.pipeline_mode<synchronous>, transform_indices = @transform_1, window_bounds = array<i64: 36, 32>}, {pipeline_mode = #tpu.pipeline_mode<synchronous>, transform_indices = @transform_2, window_bounds = array<i64: 1, 32>}, {pipeline_mode = #tpu.pipeline_mode<synchronous>, transform_indices = @transform_3, window_bounds = array<i64: 4, 288>}, {pipeline_mode = #tpu.pipeline_mode<synchronous>, transform_indices = @transform_4, window_bounds = array<i64: 4, 1>}, {transform_indices = @transform_5, window_bounds = array<i64: 1, 4, 256>}]} {
    %cst = arith.constant 0.000000e+00 : f32
    %0 = vector.broadcast %cst : f32 to vector<18x18x4xf32>
    %c0 = arith.constant 0 : index
    %c0_0 = arith.constant 0 : index
    %c0_1 = arith.constant 0 : index
    %1 = vector.load %arg7[%c0, %c0_0, %c0_1] : memref<18x18x4xf32, #tpu.memory_space<vmem>>, vector<18x18x4xf32>
    tpu.vector_store %arg7[%c0, %c0_0, %c0_1], %0 {strides = array<i32>} : memref<18x18x4xf32, #tpu.memory_space<vmem>>, vector<18x18x4xf32>,
    %cst_2 = arith.constant 0.000000e+00 : f32
    %2 = vector.broadcast %cst_2 : f32 to vector<18x18x32xf32>
    %c0_3 = arith.constant 0 : index
    %c0_4 = arith.constant 0 : index
    %c0_5 = arith.constant 0 : index
    %3 = vector.load %arg8[%c0_3, %c0_4, %c0_5] : memref<18x18x32xf32, #tpu.memory_space<vmem>>, vector<18x18x32xf32>
    tpu.vector_store %arg8[%c0_3, %c0_4, %c0_5], %2 {strides = array<i32>} : memref<18x18x32xf32, #tpu.memory_space<vmem>>, vector<18x18x32xf32>,
    %c0_6 = arith.constant 0 : index
    %c0_7 = arith.constant 0 : index
    %c0_8 = arith.constant 0 : index
    %c0_9 = arith.constant 0 : index
    %4 = vector.load %arg1[%c0_6, %c0_7, %c0_8, %c0_9] : memref<1x16x16x4xf32, #tpu.memory_space<vmem>>, vector<1x16x16x4xf32>
    %5 = vector.shape_cast %4 : vector<1x16x16x4xf32> to vector<16x16x4xf32>
    %c1 = arith.constant 1 : index
    %c1_10 = arith.constant 1 : index
    %c0_11 = arith.constant 0 : index
    %6 = vector.load %arg7[%c1, %c1_10, %c0_11] : memref<18x18x4xf32, #tpu.memory_space<vmem>>, vector<16x16x4xf32>
    tpu.vector_store %arg7[%c1, %c1_10, %c0_11], %5 {strides = array<i32>} : memref<18x18x4xf32, #tpu.memory_space<vmem>>, vector<16x16x4xf32>,
    %c0_12 = arith.constant 0 : index
    %c0_13 = arith.constant 0 : index
    %c0_14 = arith.constant 0 : index
    %7 = vector.load %arg7[%c0_12, %c0_13, %c0_14] : memref<18x18x4xf32, #tpu.memory_space<vmem>>, vector<16x16x4xf32>
    %8 = vector.shape_cast %7 : vector<16x16x4xf32> to vector<256x4xf32>
    %c0_15 = arith.constant 0 : index
    %c1_16 = arith.constant 1 : index
    %c0_17 = arith.constant 0 : index
    %9 = vector.load %arg7[%c0_15, %c1_16, %c0_17] : memref<18x18x4xf32, #tpu.memory_space<vmem>>, vector<16x16x4xf32>
    %10 = vector.shape_cast %9 : vector<16x16x4xf32> to vector<256x4xf32>
    %c0_18 = arith.constant 0 : index
    %c2 = arith.constant 2 : index
    %c0_19 = arith.constant 0 : index
    %11 = vector.load %arg7[%c0_18, %c2, %c0_19] : memref<18x18x4xf32, #tpu.memory_space<vmem>>, vector<16x16x4xf32>
    %12 = vector.shape_cast %11 : vector<16x16x4xf32> to vector<256x4xf32>
    %c1_20 = arith.constant 1 : index
    %c0_21 = arith.constant 0 : index
    %c0_22 = arith.constant 0 : index
    %13 = vector.load %arg7[%c1_20, %c0_21, %c0_22] : memref<18x18x4xf32, #tpu.memory_space<vmem>>, vector<16x16x4xf32>
    %14 = vector.shape_cast %13 : vector<16x16x4xf32> to vector<256x4xf32>
    %c1_23 = arith.constant 1 : index
    %c1_24 = arith.constant 1 : index
    %c0_25 = arith.constant 0 : index
    %15 = vector.load %arg7[%c1_23, %c1_24, %c0_25] : memref<18x18x4xf32, #tpu.memory_space<vmem>>, vector<16x16x4xf32>
    %16 = vector.shape_cast %15 : vector<16x16x4xf32> to vector<256x4xf32>
    %c1_26 = arith.constant 1 : index
    %c2_27 = arith.constant 2 : index
    %c0_28 = arith.constant 0 : index
    %17 = vector.load %arg7[%c1_26, %c2_27, %c0_28] : memref<18x18x4xf32, #tpu.memory_space<vmem>>, vector<16x16x4xf32>
    %18 = vector.shape_cast %17 : vector<16x16x4xf32> to vector<256x4xf32>
    %c2_29 = arith.constant 2 : index
    %c0_30 = arith.constant 0 : index
    %c0_31 = arith.constant 0 : index
    %19 = vector.load %arg7[%c2_29, %c0_30, %c0_31] : memref<18x18x4xf32, #tpu.memory_space<vmem>>, vector<16x16x4xf32>
    %20 = vector.shape_cast %19 : vector<16x16x4xf32> to vector<256x4xf32>
    %c2_32 = arith.constant 2 : index
    %c1_33 = arith.constant 1 : index
    %c0_34 = arith.constant 0 : index
    %21 = vector.load %arg7[%c2_32, %c1_33, %c0_34] : memref<18x18x4xf32, #tpu.memory_space<vmem>>, vector<16x16x4xf32>
    %22 = vector.shape_cast %21 : vector<16x16x4xf32> to vector<256x4xf32>
    %c2_35 = arith.constant 2 : index
    %c2_36 = arith.constant 2 : index
    %c0_37 = arith.constant 0 : index
    %23 = vector.load %arg7[%c2_35, %c2_36, %c0_37] : memref<18x18x4xf32, #tpu.memory_space<vmem>>, vector<16x16x4xf32>
    %24 = vector.shape_cast %23 : vector<16x16x4xf32> to vector<256x4xf32>
    %25 = tpu.concatenate %8, %10, %12, %14, %16, %18, %20, %22, %24 in 1 : vector<256x4xf32>, vector<256x4xf32>, vector<256x4xf32>, vector<256x4xf32>, vector<256x4xf32>, vector<256x4xf32>, vector<256x4xf32>, vector<256x4xf32>, vector<256x4xf32> -> vector<256x36xf32>
    %c0_38 = arith.constant 0 : index
    %c0_39 = arith.constant 0 : index
    %26 = vector.load %arg2[%c0_38, %c0_39] : memref<36x32xf32, #tpu.memory_space<vmem>>, vector<36x32xf32>
    %cst_40 = arith.constant dense<0.000000e+00> : vector<256x32xf32>
    %27 = tpu.matmul %25, %26, %cst_40 {dimension_numbers = #tpu.dot_dimension_numbers<[1], [0], [0], [1], [0, 0, 1, 1], [], []>} : vector<256x36xf32>, vector<36x32xf32>, vector<256x32xf32> -> vector<256x32xf32>
    %c0_41 = arith.constant 0 : index
    %c0_42 = arith.constant 0 : index
    %28 = vector.load %arg3[%c0_41, %c0_42] : memref<1x32xf32, #tpu.memory_space<vmem>>, vector<1x32xf32>
    %29 = vector.shape_cast %28 : vector<1x32xf32> to vector<32xf32>
    %30 = vector.shape_cast %29 : vector<32xf32> to vector<1x32xf32>
    %31 = vector.broadcast %30 : vector<1x32xf32> to vector<256x32xf32>
    %32 = arith.addf %27, %31 : vector<256x32xf32>
    %cst_43 = arith.constant 0.000000e+00 : f32
    %33 = vector.broadcast %cst_43 : f32 to vector<256x32xf32>
    %34 = arith.maximumf %32, %33 : vector<256x32xf32>
    %35 = vector.shape_cast %34 : vector<256x32xf32> to vector<16x16x32xf32>
    %c1_44 = arith.constant 1 : index
    %c1_45 = arith.constant 1 : index
    %c0_46 = arith.constant 0 : index
    %36 = vector.load %arg8[%c1_44, %c1_45, %c0_46] : memref<18x18x32xf32, #tpu.memory_space<vmem>>, vector<16x16x32xf32>
    tpu.vector_store %arg8[%c1_44, %c1_45, %c0_46], %35 {strides = array<i32>} : memref<18x18x32xf32, #tpu.memory_space<vmem>>, vector<16x16x32xf32>,
    %c0_47 = arith.constant 0 : index
    %c0_48 = arith.constant 0 : index
    %c0_49 = arith.constant 0 : index
    %37 = vector.load %arg8[%c0_47, %c0_48, %c0_49] : memref<18x18x32xf32, #tpu.memory_space<vmem>>, vector<16x16x32xf32>
    %38 = vector.shape_cast %37 : vector<16x16x32xf32> to vector<256x32xf32>
    %c0_50 = arith.constant 0 : index
    %c1_51 = arith.constant 1 : index
    %c0_52 = arith.constant 0 : index
    %39 = vector.load %arg8[%c0_50, %c1_51, %c0_52] : memref<18x18x32xf32, #tpu.memory_space<vmem>>, vector<16x16x32xf32>
    %40 = vector.shape_cast %39 : vector<16x16x32xf32> to vector<256x32xf32>
    %c0_53 = arith.constant 0 : index
    %c2_54 = arith.constant 2 : index
    %c0_55 = arith.constant 0 : index
    %41 = vector.load %arg8[%c0_53, %c2_54, %c0_55] : memref<18x18x32xf32, #tpu.memory_space<vmem>>, vector<16x16x32xf32>
    %42 = vector.shape_cast %41 : vector<16x16x32xf32> to vector<256x32xf32>
    %c1_56 = arith.constant 1 : index
    %c0_57 = arith.constant 0 : index
    %c0_58 = arith.constant 0 : index
    %43 = vector.load %arg8[%c1_56, %c0_57, %c0_58] : memref<18x18x32xf32, #tpu.memory_space<vmem>>, vector<16x16x32xf32>
    %44 = vector.shape_cast %43 : vector<16x16x32xf32> to vector<256x32xf32>
    %c1_59 = arith.constant 1 : index
    %c1_60 = arith.constant 1 : index
    %c0_61 = arith.constant 0 : index
    %45 = vector.load %arg8[%c1_59, %c1_60, %c0_61] : memref<18x18x32xf32, #tpu.memory_space<vmem>>, vector<16x16x32xf32>
    %46 = vector.shape_cast %45 : vector<16x16x32xf32> to vector<256x32xf32>
    %c1_62 = arith.constant 1 : index
    %c2_63 = arith.constant 2 : index
    %c0_64 = arith.constant 0 : index
    %47 = vector.load %arg8[%c1_62, %c2_63, %c0_64] : memref<18x18x32xf32, #tpu.memory_space<vmem>>, vector<16x16x32xf32>
    %48 = vector.shape_cast %47 : vector<16x16x32xf32> to vector<256x32xf32>
    %c2_65 = arith.constant 2 : index
    %c0_66 = arith.constant 0 : index
    %c0_67 = arith.constant 0 : index
    %49 = vector.load %arg8[%c2_65, %c0_66, %c0_67] : memref<18x18x32xf32, #tpu.memory_space<vmem>>, vector<16x16x32xf32>
    %50 = vector.shape_cast %49 : vector<16x16x32xf32> to vector<256x32xf32>
    %c2_68 = arith.constant 2 : index
    %c1_69 = arith.constant 1 : index
    %c0_70 = arith.constant 0 : index
    %51 = vector.load %arg8[%c2_68, %c1_69, %c0_70] : memref<18x18x32xf32, #tpu.memory_space<vmem>>, vector<16x16x32xf32>
    %52 = vector.shape_cast %51 : vector<16x16x32xf32> to vector<256x32xf32>
    %c2_71 = arith.constant 2 : index
    %c2_72 = arith.constant 2 : index
    %c0_73 = arith.constant 0 : index
    %53 = vector.load %arg8[%c2_71, %c2_72, %c0_73] : memref<18x18x32xf32, #tpu.memory_space<vmem>>, vector<16x16x32xf32>
    %54 = vector.shape_cast %53 : vector<16x16x32xf32> to vector<256x32xf32>
    %55 = tpu.concatenate %38, %40, %42, %44, %46, %48, %50, %52, %54 in 1 : vector<256x32xf32>, vector<256x32xf32>, vector<256x32xf32>, vector<256x32xf32>, vector<256x32xf32>, vector<256x32xf32>, vector<256x32xf32>, vector<256x32xf32>, vector<256x32xf32> -> vector<256x288xf32>
    %c0_74 = arith.constant 0 : index
    %c0_75 = arith.constant 0 : index
    %56 = vector.load %arg4[%c0_74, %c0_75] : memref<4x288xf32, #tpu.memory_space<vmem>>, vector<4x288xf32>
    %cst_76 = arith.constant dense<0.000000e+00> : vector<4x256xf32>
    %57 = tpu.matmul %56, %55, %cst_76 {dimension_numbers = #tpu.dot_dimension_numbers<[1], [1], [0], [0], [0, 0, 1, 0], [], []>} : vector<4x288xf32>, vector<256x288xf32>, vector<4x256xf32> -> vector<4x256xf32>
    %c0_77 = arith.constant 0 : index
    %c0_78 = arith.constant 0 : index
    %58 = vector.load %arg5[%c0_77, %c0_78] : memref<4x1xf32, #tpu.memory_space<vmem>>, vector<4x1xf32>
    %59 = vector.broadcast %58 : vector<4x1xf32> to vector<4x256xf32>
    %60 = arith.addf %57, %59 : vector<4x256xf32>
    %61 = arith.negf %60 : vector<4x256xf32>
    %62 = math.exp %61 : vector<4x256xf32>
    %cst_79 = arith.constant 1.000000e+00 : f32
    %63 = vector.broadcast %cst_79 : f32 to vector<4x256xf32>
    %64 = arith.addf %63, %62 : vector<4x256xf32>
    %65 = arith.divf %63, %64 : vector<4x256xf32>
    %c0_80 = arith.constant 0 : index
    %c0_81 = arith.constant 0 : index
    %c0_82 = arith.constant 0 : index
    %66 = vector.load %arg6[%c0_80, %c0_81, %c0_82] : memref<1x4x256xf32, #tpu.memory_space<vmem>>, vector<1x4x256xf32>
    %67 = vector.shape_cast %66 : vector<1x4x256xf32> to vector<4x256xf32>
    %68 = vector.shape_cast %65 : vector<4x256xf32> to vector<1x4x256xf32>
    tpu.vector_store %arg6[%c0_80, %c0_81, %c0_82], %68 {strides = array<i32>} : memref<1x4x256xf32, #tpu.memory_space<vmem>>, vector<1x4x256xf32>,
    return
  }
  func.func @transform_0(%arg0: i32) -> (i32, i32, i32, i32) {
    %c0_i32 = arith.constant 0 : i32
    %c0_i32_0 = arith.constant 0 : i32
    %c0_i32_1 = arith.constant 0 : i32
    %c0_i32_2 = arith.constant 0 : i32
    return %arg0, %c0_i32, %c0_i32_0, %c0_i32_1 : i32, i32, i32, i32
  }
  func.func @transform_1(%arg0: i32) -> (i32, i32) {
    %c0_i32 = arith.constant 0 : i32
    %c0_i32_0 = arith.constant 0 : i32
    %c0_i32_1 = arith.constant 0 : i32
    return %c0_i32, %c0_i32_0 : i32, i32
  }
  func.func @transform_2(%arg0: i32) -> (i32, i32) {
    %c0_i32 = arith.constant 0 : i32
    %c0_i32_0 = arith.constant 0 : i32
    %c0_i32_1 = arith.constant 0 : i32
    return %c0_i32, %c0_i32_0 : i32, i32
  }
  func.func @transform_3(%arg0: i32) -> (i32, i32) {
    %c0_i32 = arith.constant 0 : i32
    %c0_i32_0 = arith.constant 0 : i32
    %c0_i32_1 = arith.constant 0 : i32
    return %c0_i32, %c0_i32_0 : i32, i32
  }
  func.func @transform_4(%arg0: i32) -> (i32, i32) {
    %c0_i32 = arith.constant 0 : i32
    %c0_i32_0 = arith.constant 0 : i32
    %c0_i32_1 = arith.constant 0 : i32
    return %c0_i32, %c0_i32_0 : i32, i32
  }
  func.func @transform_5(%arg0: i32) -> (i32, i32, i32) {
    %c0_i32 = arith.constant 0 : i32
    %c0_i32_0 = arith.constant 0 : i32
    %c0_i32_1 = arith.constant 0 : i32
    return %arg0, %c0_i32, %c0_i32_0 : i32, i32, i32
  }
}

</mosaic_0001>

<bundles_post_ra>
// kernel: optical_damage_forward.1
= control target key start
LH: loop header
LB: loop body
LE: loop exit
PB: predicated region body
PF: predicated region fallthrough
CT: control target
= control target key end

     0   :  { %s4529_s18 = smov 0   ;;  %s7619_s0 = inlined_call_operand.vmem [shape: f32[2,16,16,4], index: 0, kind: input, shape index: {}]   ;;  %s7620_s1 = inlined_call_operand.vmem [shape: f32[36,32], index: 1, kind: input, shape index: {}]   ;;  %s7621_s2 = inlined_call_operand.vmem [shape: f32[1,32], index: 2, kind: input, shape index: {}]   ;;  %s7622_s3 = inlined_call_operand.vmem [shape: f32[4,288], index: 3, kind: input, shape index: {}]   ;;  %s7623_s4 = inlined_call_operand.vmem [shape: f32[4,1], index: 4, kind: input, shape index: {}]   ;;  %s7624_s5 = inlined_call_operand.vmem [shape: f32[2,4,256], index: 5, kind: output, shape index: {}]  }
   0x1 LB: > { %s3851_s19 = sadd.s32 4294967295, %s4485_s18   ;;  %p3855_p0 = scmp.ge.s32.totalorder %s4485_s18, 1  ;;  %s4485_s18 = sphi %s4529_s18, %s15_s18  }
   0x2   : > { %p187_p1 = scmp.lt.s32.totalorder %s4485_s18, 3 }
   0x4   : > { %p188_p2 = pnand %p3855_p0, %p187_p1 }
   0x6   : > { %191 = sbr.rel (%p188_p2) target bundleno = 1620 (0x654), region = 40 }
   0xb   : > { %vm225_vm0 = vcmask 31744   ;;  %v7625_v0 = vmov 0.0   ;;  %s4488_s20 = smov 4   ;;  %p215_p3 = scmp.lt.s32.totalorder %s3851_s19, 1  ;;  %vm228_vm1 = vcmask 25600   ;;  %vm2083_vm2 = vcmask 1043456  }
   0xc   : > { %226 = vst.msk [vmem:[#allocation2] sm:$0xff] %vm225_vm0, %v7625_v0  ;;  %s4489_s25 = smov 8   ;;  %s4490_s26 = smov 12   ;;  %vm281_vm3 = vcmask 261120   ;;  %vm1747_vm4 = vcmask 64512   ;;  %vm1780_vm5 = vcmask 97280  }
   0xd   : > { %227 = vst.msk [vmem:[#allocation2 + $0x8] sm:$0xff] %vm225_vm0, %v7625_v0  ;;  %s8138_s19 = smov (!%p215_p3, %s3851_s19), 1  ;;  %s4491_s27 = smov 16   ;;  %vm1846_vm6 = vcmask 162816   ;;  %vm1813_vm7 = vcmask 130048   ;;  %vm1879_vm8 = vcmask 195584  }
   0xe   : > { %230 = vst.msk [vmem:[#allocation2 + $0x18] sm:$0xff] %vm225_vm0, %v7625_v0  ;;  %s3931_s21 = sshll.u32 %s8138_s19, 8  ;;  %s4492_s28 = smov 20   ;;  %vm1912_vm9 = vcmask 228352   ;;  %vm1986_vm10 = vcmask 293888   ;;  %vm284_vm11 = vcmask 254976  }
   0xf   : > { %231 = vst.msk [vmem:[#allocation2 + $0x20] sm:$0xff] %vm225_vm0, %v7625_v0  ;;  %s4610_s24 = scalar_lea.vmem %s7619_s0, %s3931_s21  ;;  %s4493_s29 = smov 24   ;;  %vm3354_vm12 = vcmask 523264   ;;  %vm3387_vm13 = vcmask 785408  }
  0x10   : > { %233 = vst.msk [vmem:[#allocation2 + $0x30] sm:$0xff] %vm225_vm0, %v7625_v0  ;;  %v339_v2 = vld [vmem:[%s4610_s24 + $0x10] sm:$0xff]  ;;  %v337_v3 = vld [vmem:[%s4610_s24] sm:$0xff]  ;;  %v340_v7 = vld [vmem:[%s4610_s24 + $0x18] sm:$0xff]  ;;  %s4494_s30 = smov 28   ;;  %s4495_s6 = smov 32  }
  0x11   : > { %234 = vst.msk [vmem:[#allocation2 + $0x38] sm:$0xff] %vm225_vm0, %v7625_v0  ;;  %v338_v8 = vld [vmem:[%s4610_s24 + $0x8] sm:$0xff]  ;;  %v341_v9 = vld [vmem:[%s4610_s24 + $0x20] sm:$0xff]  ;;  %v343_v10 = vld [vmem:[%s4610_s24 + $0x30] sm:$0xff]  ;;  %s4496_s21 = smov 64   ;;  %s4497_s22 = smov 96  }
  0x12   : > { %236 = vst.msk [vmem:[#allocation2 + $0x48] sm:$0xff] %vm225_vm0, %v7625_v0  ;;  %v342_v11 = vld [vmem:[%s4610_s24 + $0x28] sm:$0xff]  ;;  %v344_v12 = vld [vmem:[%s4610_s24 + $0x38] sm:$0xff]  ;;  %v345_v14 = vld [vmem:[%s4610_s24 + $0x40] sm:$0xff] }
  0x13   : > { %237 = vst.msk [vmem:[#allocation2 + $0x50] sm:$0xff] %vm225_vm0, %v7625_v0  ;;  %v346_v13 = vld [vmem:[%s4610_s24 + $0x48] sm:$0xff]  ;;  %v347_v15 = vld [vmem:[%s4610_s24 + $0x50] sm:$0xff]  ;;  %v349_v16 = vld [vmem:[%s4610_s24 + $0x60] sm:$0xff] }
  0x14   : > { %v434_v1 = vld [vmem:[#allocation2 + $0x1] sm:$0xff]  ;;  %239 = vst.msk [vmem:[#allocation2 + $0x60] sm:$0xff] %vm225_vm0, %v7625_v0  ;;  %v348_v18 = vld [vmem:[%s4610_s24 + $0x58] sm:$0xff]  ;;  %v353_v24 = vld [vmem:[%s4610_s24 + $0x80] sm:$0xff] }
  0x15   : > { %723 = vrot.lane.b32.xlu0 %v434_v1, %s4488_s20  ;;  %240 = vst.msk [vmem:[#allocation2 + $0x68] sm:$0xff] %vm225_vm0, %v7625_v0  ;;  %v350_v20 = vld [vmem:[%s4610_s24 + $0x68] sm:$0xff]  ;;  %v352_v22 = vld [vmem:[%s4610_s24 + $0x78] sm:$0xff]  ;;  %v351_v23 = vld [vmem:[%s4610_s24 + $0x70] sm:$0xff] }
  0x16   : > { %242 = vst.msk [vmem:[#allocation2 + $0x78] sm:$0xff] %vm225_vm0, %v7625_v0  ;;  %v355_v25 = vld [vmem:[%s4610_s24 + $0x90] sm:$0xff]  ;;  %v354_v27 = vld [vmem:[%s4610_s24 + $0x88] sm:$0xff]  ;;  %v356_v29 = vld [vmem:[%s4610_s24 + $0x98] sm:$0xff] }
  0x17   : > { %243 = vst.msk [vmem:[#allocation2 + $0x80] sm:$0xff] %vm225_vm0, %v7625_v0  ;;  %v358_v31 = vld [vmem:[%s4610_s24 + $0xa8] sm:$0xff]  ;;  %v357_v32 = vld [vmem:[%s4610_s24 + $0xa0] sm:$0xff]  ;;  %v359_v33 = vld [vmem:[%s4610_s24 + $0xb0] sm:$0xff] }
  0x18   : > { %245 = vst.msk [vmem:[#allocation2 + $0x90] sm:$0xff] %vm225_vm0, %v7625_v0  ;;  %v361_v37 = vld [vmem:[%s4610_s24 + $0xc0] sm:$0xff]  ;;  %v360_v38 = vld [vmem:[%s4610_s24 + $0xb8] sm:$0xff]  ;;  %v362_v39 = vld [vmem:[%s4610_s24 + $0xc8] sm:$0xff] }
  0x19   : > { %246 = vst.msk [vmem:[#allocation2 + $0x98] sm:$0xff] %vm225_vm0, %v7625_v0  ;;  %v364_v43 = vld [vmem:[%s4610_s24 + $0xd8] sm:$0xff]  ;;  %v363_v44 = vld [vmem:[%s4610_s24 + $0xd0] sm:$0xff]  ;;  %v365_v45 = vld [vmem:[%s4610_s24 + $0xe0] sm:$0xff] }
  0x1a   : > { %248 = vst.msk [vmem:[#allocation2 + $0xa8] sm:$0xff] %vm225_vm0, %v7625_v0  ;;  %v366_v49 = vld [vmem:[%s4610_s24 + $0xe8] sm:$0xff] }
  0x1b   : > { %249 = vst.msk [vmem:[#allocation2 + $0xb0] sm:$0xff] %vm225_vm0, %v7625_v0  ;;  %v466_v62 = vld [vmem:[#allocation2 + $0x2] sm:$0xff] }
  0x1c   : > { %251 = vst.msk [vmem:[#allocation2 + $0xc0] sm:$0xff] %vm225_vm0, %v7625_v0 }
  0x1d   : > { %252 = vst.msk [vmem:[#allocation2 + $0xc8] sm:$0xff] %vm225_vm0, %v7625_v0 }
  0x1e   : > { %254 = vst.msk [vmem:[#allocation2 + $0xd8] sm:$0xff] %vm225_vm0, %v7625_v0 }
  0x1f   : > { %255 = vst.msk [vmem:[#allocation2 + $0xe0] sm:$0xff] %vm225_vm0, %v7625_v0 }
  0x20   : > { %257 = vst.msk [vmem:[#allocation2 + $0xf0] sm:$0xff] %vm225_vm0, %v7625_v0 }
  0x21   : > { %258 = vst.msk [vmem:[#allocation2 + $0xf8] sm:$0xff] %vm225_vm0, %v7625_v0 }
  0x22   : > { %260 = vst.msk [vmem:[#allocation2 + $0x108] sm:$0xff] %vm225_vm0, %v7625_v0 }
  0x23   : > { %261 = vst.msk [vmem:[#allocation2 + $0x110] sm:$0xff] %vm225_vm0, %v7625_v0 }
  0x24   : > { %263 = vst.msk [vmem:[#allocation2 + $0x120] sm:$0xff] %vm225_vm0, %v7625_v0 }
  0x25   : > { %264 = vst.msk [vmem:[#allocation2 + $0x128] sm:$0xff] %vm225_vm0, %v7625_v0 }
  0x26   : > { %266 = vst.msk [vmem:[#allocation2 + $0x138] sm:$0xff] %vm225_vm0, %v7625_v0 }
  0x27   : > { %267 = vst.msk [vmem:[#allocation2 + $0x140] sm:$0xff] %vm225_vm0, %v7625_v0 }
  0x28   : > { %269 = vst.msk [vmem:[#allocation2 + $0x150] sm:$0xff] %vm225_vm0, %v7625_v0 }
  0x29   : > { %270 = vst.msk [vmem:[#allocation2 + $0x158] sm:$0xff] %vm225_vm0, %v7625_v0 }
  0x2a   : > { %272 = vst.msk [vmem:[#allocation2 + $0x168] sm:$0xff] %vm225_vm0, %v7625_v0 }
  0x2b   : > { %273 = vst.msk [vmem:[#allocation2 + $0x170] sm:$0xff] %vm225_vm0, %v7625_v0 }
  0x2c   : > { %275 = vst.msk [vmem:[#allocation2 + $0x180] sm:$0xff] %vm225_vm0, %v7625_v0 }
  0x2d   : > { %276 = vst.msk [vmem:[#allocation2 + $0x188] sm:$0xff] %vm225_vm0, %v7625_v0 }
  0x2e   : > { %278 = vst.msk [vmem:[#allocation2 + $0x198] sm:$0xff] %vm225_vm0, %v7625_v0 }
  0x2f   : > { %279 = vst.msk [vmem:[#allocation2 + $0x1a0] sm:$0xff] %vm225_vm0, %v7625_v0 }
  0x30   : > { %372 = vst.msk [vmem:[#allocation2 + $0x31] sm:$0xff] %vm225_vm0, %v339_v2 }
  0x31   : > { %370 = vst.msk [vmem:[#allocation2 + $0x19] sm:$0xff] %vm225_vm0, %v337_v3 }
  0x32   : > { %229 = vst.msk [vmem:[#allocation2 + $0x10] sm:$0x3] %vm228_vm1, %v7625_v0 }
  0x33   : > { %232 = vst.msk [vmem:[#allocation2 + $0x28] sm:$0x3] %vm228_vm1, %v7625_v0 }
  0x34   : > { %235 = vst.msk [vmem:[#allocation2 + $0x40] sm:$0x3] %vm228_vm1, %v7625_v0 }
  0x35   : > { %238 = vst.msk [vmem:[#allocation2 + $0x58] sm:$0x3] %vm228_vm1, %v7625_v0 }
  0x36   : > { %241 = vst.msk [vmem:[#allocation2 + $0x70] sm:$0x3] %vm228_vm1, %v7625_v0 }
  0x37   : > { %v4636_v4 = vld [vmem:[#allocation2 + $0x31] sm:$0xff]  ;;  %244 = vst.msk [vmem:[#allocation2 + $0x88] sm:$0x3] %vm228_vm1, %v7625_v0 }
  0x38   : > { %731 = vrot.lane.b32.xlu2 %v4636_v4, %s4488_s20  ;;  %v4642_v5 = vld [vmem:[#allocation2 + $0x19] sm:$0xff]  ;;  %247 = vst.msk [vmem:[#allocation2 + $0xa0] sm:$0x3] %vm228_vm1, %v7625_v0 }
  0x39   : > { %727 = vrot.lane.b32.xlu1 %v4642_v5, %s4488_s20  ;;  %v435_v6 = vld [vmem:[#allocation2 + $0x9] sm:$0xff]  ;;  %250 = vst.msk [vmem:[#allocation2 + $0xb8] sm:$0x3] %vm228_vm1, %v7625_v0 }
  0x3a   : > { %725 = vrot.lane.b32.xlu0 %v435_v6, %s4488_s20  ;;  %253 = vst.msk [vmem:[#allocation2 + $0xd0] sm:$0x3] %vm228_vm1, %v7625_v0  ;;  %v467_v1 = vld [vmem:[#allocation2 + $0xa] sm:$0xff] }
  0x3b   : > { %256 = vst.msk [vmem:[#allocation2 + $0xe8] sm:$0x3] %vm228_vm1, %v7625_v0 }
  0x3c   : > { %259 = vst.msk [vmem:[#allocation2 + $0x100] sm:$0x3] %vm228_vm1, %v7625_v0 }
  0x3d   : > { %262 = vst.msk [vmem:[#allocation2 + $0x118] sm:$0x3] %vm228_vm1, %v7625_v0 }
  0x3e   : > { %265 = vst.msk [vmem:[#allocation2 + $0x130] sm:$0x3] %vm228_vm1, %v7625_v0 }
  0x3f   : > { %268 = vst.msk [vmem:[#allocation2 + $0x148] sm:$0x3] %vm228_vm1, %v7625_v0 }
  0x40   : > { %271 = vst.msk [vmem:[#allocation2 + $0x160] sm:$0x3] %vm228_vm1, %v7625_v0 }
  0x41   : > { %274 = vst.msk [vmem:[#allocation2 + $0x178] sm:$0x3] %vm228_vm1, %v7625_v0 }
  0x42   : > { %277 = vst.msk [vmem:[#allocation2 + $0x190] sm:$0x3] %vm228_vm1, %v7625_v0 }
  0x43   : > { %280 = vst.msk [vmem:[#allocation2 + $0x1a8] sm:$0x3] %vm228_vm1, %v7625_v0 }
  0x44   : > { %373 = vst.msk [vmem:[#allocation2 + $0x39] sm:$0xff] %vm225_vm0, %v340_v7 }
  0x45   : > { %371 = vst.msk [vmem:[#allocation2 + $0x21] sm:$0xff] %vm225_vm0, %v338_v8 }
  0x46   : > { %374 = vst.msk [vmem:[#allocation2 + $0x49] sm:$0xff] %vm225_vm0, %v341_v9 }
  0x47   : > { %376 = vst.msk [vmem:[#allocation2 + $0x61] sm:$0xff] %vm225_vm0, %v343_v10 }
  0x48   : > { %375 = vst.msk [vmem:[#allocation2 + $0x51] sm:$0xff] %vm225_vm0, %v342_v11 }
  0x49   : > { %377 = vst.msk [vmem:[#allocation2 + $0x69] sm:$0xff] %vm225_vm0, %v344_v12 }
  0x4a   : > { %379 = vst.msk [vmem:[#allocation2 + $0x81] sm:$0xff] %vm225_vm0, %v346_v13 }
  0x4b   : > { %v4688_v17 = vld [vmem:[#allocation2 + $0x39] sm:$0xff]  ;;  %378 = vst.msk [vmem:[#allocation2 + $0x79] sm:$0xff] %vm225_vm0, %v345_v14 }
  0x4c   : > { %733 = vrot.lane.b32.xlu2 %v4688_v17, %s4488_s20  ;;  %v4694_v19 = vld [vmem:[#allocation2 + $0x21] sm:$0xff]  ;;  %380 = vst.msk [vmem:[#allocation2 + $0x91] sm:$0xff] %vm225_vm0, %v347_v15  ;;  %v4845_v6 = vld [vmem:[#allocation2 + $0x32] sm:$0xff] }
  0x4d   : > { %729 = vrot.lane.b32.xlu1 %v4694_v19, %s4488_s20  ;;  %v4700_v21 = vld [vmem:[#allocation2 + $0x49] sm:$0xff]  ;;  %382 = vst.msk [vmem:[#allocation2 + $0xa9] sm:$0xff] %vm225_vm0, %v349_v16  ;;  %v4843_v3 = vld [vmem:[#allocation2 + $0x1a] sm:$0xff] }
  0x4e   : > { %735 = vrot.lane.b32.xlu0 %v4700_v21, %s4488_s20  ;;  %381 = vst.msk [vmem:[#allocation2 + $0x99] sm:$0xff] %vm225_vm0, %v348_v18  ;;  %v4712_v26 = vld [vmem:[#allocation2 + $0x61] sm:$0xff] }
  0x4f   : > { %383 = vst.msk [vmem:[#allocation2 + $0xb1] sm:$0xff] %vm225_vm0, %v350_v20  ;;  %v4716_v28 = vld [vmem:[#allocation2 + $0x51] sm:$0xff]  ;;  %v4841_v2 = vld [vmem:[#allocation2 + $0x22] sm:$0xff]  ;;  %v4857_v9 = vld [vmem:[#allocation2 + $0x3a] sm:$0xff] }
  0x50   : > { %385 = vst.msk [vmem:[#allocation2 + $0xc9] sm:$0xff] %vm225_vm0, %v352_v22  ;;  %v4720_v30 = vld [vmem:[#allocation2 + $0x69] sm:$0xff]  ;;  %v4859_v10 = vld [vmem:[#allocation2 + $0x52] sm:$0xff] }
  0x51   : > { %384 = vst.msk [vmem:[#allocation2 + $0xc1] sm:$0xff] %vm225_vm0, %v351_v23  ;;  %v4737_v34 = vld [vmem:[#allocation2 + $0x81] sm:$0xff]  ;;  %v4855_v8 = vld [vmem:[#allocation2 + $0x4a] sm:$0xff] }
  0x52   : > { %386 = vst.msk [vmem:[#allocation2 + $0xd9] sm:$0xff] %vm225_vm0, %v353_v24  ;;  %v4739_v35 = vld [vmem:[#allocation2 + $0x79] sm:$0xff]  ;;  %v4869_v12 = vld [vmem:[#allocation2 + $0x6a] sm:$0xff]  ;;  %v4871_v13 = vld [vmem:[#allocation2 + $0x62] sm:$0xff] }
  0x53   : > { %388 = vst.msk [vmem:[#allocation2 + $0xf1] sm:$0xff] %vm225_vm0, %v355_v25  ;;  %v4741_v36 = vld [vmem:[#allocation2 + $0x91] sm:$0xff]  ;;  %v4873_v14 = vld [vmem:[#allocation2 + $0x7a] sm:$0xff]  ;;  %v4887_v20 = vld [vmem:[#allocation2 + $0x82] sm:$0xff] }
  0x54   : > { %739 = vrot.lane.b32.xlu2 %v4712_v26, %s4488_s20  ;;  %387 = vst.msk [vmem:[#allocation2 + $0xe1] sm:$0xff] %vm225_vm0, %v354_v27  ;;  %v4755_v40 = vld [vmem:[#allocation2 + $0xa9] sm:$0xff] }
  0x55   : > { %737 = vrot.lane.b32.xlu1 %v4716_v28, %s4488_s20  ;;  %389 = vst.msk [vmem:[#allocation2 + $0xf9] sm:$0xff] %vm225_vm0, %v356_v29  ;;  %v4757_v41 = vld [vmem:[#allocation2 + $0x99] sm:$0xff] }
  0x56   : > { %741 = vrot.lane.b32.xlu0 %v4720_v30, %s4488_s20  ;;  %391 = vst.msk [vmem:[#allocation2 + $0x111] sm:$0xff] %vm225_vm0, %v358_v31  ;;  %v4759_v42 = vld [vmem:[#allocation2 + $0xb1] sm:$0xff]  ;;  %v4889_v22 = vld [vmem:[#allocation2 + $0x9a] sm:$0xff] }
  0x57   : > { %390 = vst.msk [vmem:[#allocation2 + $0x109] sm:$0xff] %vm225_vm0, %v357_v32  ;;  %v4773_v46 = vld [vmem:[#allocation2 + $0xc9] sm:$0xff]  ;;  %v4885_v18 = vld [vmem:[#allocation2 + $0x92] sm:$0xff] }
  0x58   : > { %392 = vst.msk [vmem:[#allocation2 + $0x121] sm:$0xff] %vm225_vm0, %v359_v33  ;;  %v4775_v47 = vld [vmem:[#allocation2 + $0xc1] sm:$0xff]  ;;  %v4903_v27 = vld [vmem:[#allocation2 + $0xb2] sm:$0xff]  ;;  %v4905_v29 = vld [vmem:[#allocation2 + $0xaa] sm:$0xff] }
  0x59   : > { %394 = vst.msk [vmem:[#allocation2 + $0x139] sm:$0xff] %vm225_vm0, %v361_v37  ;;  %v4777_v48 = vld [vmem:[#allocation2 + $0xd9] sm:$0xff]  ;;  %v4907_v31 = vld [vmem:[#allocation2 + $0xc2] sm:$0xff] }
  0x5a   : > { %393 = vst.msk [vmem:[#allocation2 + $0x129] sm:$0xff] %vm225_vm0, %v360_v38  ;;  %v4787_v50 = vld [vmem:[#allocation2 + $0xf1] sm:$0xff] }
  0x5b   : > { %395 = vst.msk [vmem:[#allocation2 + $0x141] sm:$0xff] %vm225_vm0, %v362_v39  ;;  %v4789_v51 = vld [vmem:[#allocation2 + $0xe1] sm:$0xff]  ;;  %v4923_v39 = vld [vmem:[#allocation2 + $0xca] sm:$0xff] }
  0x5c   : > { %745 = vrot.lane.b32.xlu2 %v4737_v34, %s4488_s20  ;;  %397 = vst.msk [vmem:[#allocation2 + $0x159] sm:$0xff] %vm225_vm0, %v364_v43  ;;  %v4791_v52 = vld [vmem:[#allocation2 + $0xf9] sm:$0xff]  ;;  %v4925_v43 = vld [vmem:[#allocation2 + $0xe2] sm:$0xff] }
  0x5d   : > { %743 = vrot.lane.b32.xlu1 %v4739_v35, %s4488_s20  ;;  %396 = vst.msk [vmem:[#allocation2 + $0x151] sm:$0xff] %vm225_vm0, %v363_v44  ;;  %v4799_v53 = vld [vmem:[#allocation2 + $0x111] sm:$0xff]  ;;  %v4921_v38 = vld [vmem:[#allocation2 + $0xda] sm:$0xff] }
  0x5e   : > { %747 = vrot.lane.b32.xlu0 %v4741_v36, %s4488_s20  ;;  %398 = vst.msk [vmem:[#allocation2 + $0x169] sm:$0xff] %vm225_vm0, %v365_v45  ;;  %v4801_v54 = vld [vmem:[#allocation2 + $0x109] sm:$0xff] }
  0x5f   : > { %399 = vst.msk [vmem:[#allocation2 + $0x171] sm:$0xff] %vm225_vm0, %v366_v49  ;;  %v4803_v55 = vld [vmem:[#allocation2 + $0x121] sm:$0xff]  ;;  %v4943_v0 = vld [vmem:[#allocation2 + $0x10a] sm:$0xff] }
  0x60   : > { %v4811_v56 = vld [vmem:[#allocation2 + $0x139] sm:$0xff] }
  0x61   : > { %v4813_v57 = vld [vmem:[#allocation2 + $0x129] sm:$0xff] }
  0x62   : > { %v4815_v58 = vld [vmem:[#allocation2 + $0x141] sm:$0xff] }
  0x63   : > { %v4823_v59 = vld [vmem:[#allocation2 + $0x159] sm:$0xff] }
  0x64   : > { %751 = vrot.lane.b32.xlu2 %v4755_v40, %s4488_s20  ;;  %v4825_v60 = vld [vmem:[#allocation2 + $0x151] sm:$0xff] }
  0x65   : > { %749 = vrot.lane.b32.xlu1 %v4757_v41, %s4488_s20  ;;  %v4827_v61 = vld [vmem:[#allocation2 + $0x169] sm:$0xff] }
  0x66   : > { %753 = vrot.lane.b32.xlu0 %v4759_v42, %s4488_s20  ;;  %v4835_v63 = vld [vmem:[#allocation2 + $0x171] sm:$0xff] }
  0x6c   : > { %757 = vrot.lane.b32.xlu2 %v4773_v46, %s4488_s20 }
  0x6d   : > { %755 = vrot.lane.b32.xlu1 %v4775_v47, %s4488_s20 }
  0x6e   : > { %759 = vrot.lane.b32.xlu0 %v4777_v48, %s4488_s20 }
  0x74   : > { %763 = vrot.lane.b32.xlu2 %v4787_v50, %s4488_s20 }
  0x75   : > { %761 = vrot.lane.b32.xlu1 %v4789_v51, %s4488_s20 }
  0x76   : > { %765 = vrot.lane.b32.xlu0 %v4791_v52, %s4488_s20 }
  0x7c   : > { %769 = vrot.lane.b32.xlu2 %v4799_v53, %s4488_s20 }
  0x7d   : > { %767 = vrot.lane.b32.xlu1 %v4801_v54, %s4488_s20 }
  0x7e   : > { %771 = vrot.lane.b32.xlu0 %v4803_v55, %s4488_s20 }
  0x84   : > { %775 = vrot.lane.b32.xlu2 %v4811_v56, %s4488_s20 }
  0x85   : > { %773 = vrot.lane.b32.xlu1 %v4813_v57, %s4488_s20 }
  0x86   : > { %777 = vrot.lane.b32.xlu0 %v4815_v58, %s4488_s20 }
  0x87   : > { %v4877_v15 = vpop.permute.xlu0 %723 }
  0x88   : > { %7685 = vst [vmem:[#allocation6_spill] sm:$0xff] %v4877_v15  ;;  %v405_v15 = vld [vmem:[#allocation2 + $0x20] sm:$0xff] }
  0x8c   : > { %781 = vrot.lane.b32.xlu2 %v4823_v59, %s4488_s20 }
  0x8d   : > { %779 = vrot.lane.b32.xlu1 %v4825_v60, %s4488_s20 }
  0x8e   : > { %783 = vrot.lane.b32.xlu0 %v4827_v61, %s4488_s20 }
  0x92   : > { %v4849_v7 = vpop.permute.xlu2 %731 }
  0x93   : > { %7683 = vst [vmem:[#allocation4_spill] sm:$0xff] %v4849_v7  ;;  %v4979_v7 = vld [vmem:[#allocation2 + $0x152] sm:$0xff] }
  0x94   : > { %851 = vrot.lane.b32.xlu2 %v466_v62, %s4489_s25  ;;  %v4939_v62 = vld [vmem:[#allocation2 + $0xfa] sm:$0xff]  ;;  %7704 = vst [vmem:[#allocation25_spill] sm:$0xff] %v4979_v7 }
  0x95   : > { %785 = vrot.lane.b32.xlu1 %v4835_v63, %s4488_s20 }
  0x96   : > { %853 = vrot.lane.b32.xlu0 %v467_v1, %s4489_s25  ;;  %v4941_v1 = vld [vmem:[#allocation2 + $0xf2] sm:$0xff] }
  0x9c   : > { %857 = vrot.lane.b32.xlu2 %v4841_v2, %s4489_s25 }
  0x9d   : > { %855 = vrot.lane.b32.xlu1 %v4843_v3, %s4489_s25 }
  0x9e   : > { %859 = vrot.lane.b32.xlu0 %v4845_v6, %s4489_s25 }
  0xa4   : > { %863 = vrot.lane.b32.xlu2 %v4855_v8, %s4489_s25 }
  0xa5   : > { %861 = vrot.lane.b32.xlu1 %v4857_v9, %s4489_s25 }
  0xa6   : > { %865 = vrot.lane.b32.xlu0 %v4859_v10, %s4489_s25  ;;  %v4867_v11 = vpop.permute.xlu2 %733 }
  0xa7   : > { %7684 = vst [vmem:[#allocation5_spill] sm:$0xff] %v4867_v11  ;;  %v4977_v11 = vld [vmem:[#allocation2 + $0x13a] sm:$0xff] }
  0xab   : > { %v4895_v23 = vpop.permute.xlu1 %727 }
  0xac   : > { %869 = vrot.lane.b32.xlu2 %v4869_v12, %s4489_s25  ;;  %7687 = vst [vmem:[#allocation8_spill] sm:$0xff] %v4895_v23  ;;  %v4901_v25 = vpop.permute.xlu0 %725  ;;  %v4995_v23 = vld [vmem:[#allocation2 + $0x15a] sm:$0xff] }
  0xad   : > { %867 = vrot.lane.b32.xlu1 %v4871_v13, %s4489_s25  ;;  %7689 = vst [vmem:[#allocation10_spill] sm:$0xff] %v4901_v25  ;;  %v4997_v25 = vld [vmem:[#allocation2 + $0x172] sm:$0xff] }
  0xae   : > { %871 = vrot.lane.b32.xlu0 %v4873_v14, %s4489_s25  ;;  %v4883_v16 = vpop.permute.xlu2 %739  ;;  %7709 = vst [vmem:[#allocation30_spill] sm:$0xff] %v4995_v23 }
  0xaf   : > { %7686 = vst [vmem:[#allocation7_spill] sm:$0xff] %v4883_v16  ;;  %v4957_v16 = vld [vmem:[#allocation2 + $0x122] sm:$0xff] }
  0xb0   : > { %7710 = vst [vmem:[#allocation31_spill] sm:$0xff] %v4997_v25 }
  0xb4   : > { %875 = vrot.lane.b32.xlu2 %v4885_v18, %s4489_s25 }
  0xb5   : > { %873 = vrot.lane.b32.xlu1 %v4887_v20, %s4489_s25 }
  0xb6   : > { %877 = vrot.lane.b32.xlu0 %v4889_v22, %s4489_s25  ;;  %v4899_v24 = vpop.permute.xlu2 %745 }
  0xb7   : > { %7688 = vst [vmem:[#allocation9_spill] sm:$0xff] %v4899_v24 }
  0xbc   : > { %881 = vrot.lane.b32.xlu2 %v4903_v27, %s4489_s25 }
  0xbd   : > { %879 = vrot.lane.b32.xlu1 %v4905_v29, %s4489_s25 }
  0xbe   : > { %883 = vrot.lane.b32.xlu0 %v4907_v31, %s4489_s25  ;;  %v4915_v32 = vpop.permute.xlu2 %751 }
  0xbf   : > { %7690 = vst [vmem:[#allocation11_spill] sm:$0xff] %v4915_v32  ;;  %v4917_v33 = vpop.permute.xlu1 %729 }
  0xc0   : > { %7691 = vst [vmem:[#allocation12_spill] sm:$0xff] %v4917_v33  ;;  %v4919_v37 = vpop.permute.xlu0 %735 }
  0xc1   : > { %7692 = vst [vmem:[#allocation13_spill] sm:$0xff] %v4919_v37  ;;  %v4975_v37 = vld [vmem:[#allocation2 + $0x142] sm:$0xff] }
  0xc2   : > { %7703 = vst [vmem:[#allocation24_spill] sm:$0xff] %v4975_v37 }
  0xc4   : > { %887 = vrot.lane.b32.xlu2 %v4921_v38, %s4489_s25 }
  0xc5   : > { %885 = vrot.lane.b32.xlu1 %v4923_v39, %s4489_s25 }
  0xc6   : > { %889 = vrot.lane.b32.xlu0 %v4925_v43, %s4489_s25  ;;  %v4933_v44 = vpop.permute.xlu2 %757 }
  0xc7   : > { %7693 = vst [vmem:[#allocation14_spill] sm:$0xff] %v4933_v44  ;;  %v4935_v45 = vpop.permute.xlu1 %737  ;;  %v4961_v44 = vld [vmem:[#allocation2 + $0x12a] sm:$0xff] }
  0xc8   : > { %7694 = vst [vmem:[#allocation15_spill] sm:$0xff] %v4935_v45  ;;  %v4937_v49 = vpop.permute.xlu0 %741  ;;  %v4959_v45 = vld [vmem:[#allocation2 + $0x112] sm:$0xff] }
  0xc9   : > { %7695 = vst [vmem:[#allocation16_spill] sm:$0xff] %v4937_v49 }
  0xca   : > { %7699 = vst [vmem:[#allocation20_spill] sm:$0xff] %v4961_v44 }
  0xcc   : > { %893 = vrot.lane.b32.xlu2 %v4939_v62, %s4489_s25 }
  0xcd   : > { %891 = vrot.lane.b32.xlu1 %v4941_v1, %s4489_s25 }
  0xce   : > { %895 = vrot.lane.b32.xlu0 %v4943_v0, %s4489_s25  ;;  %v4951_v32 = vpop.permute.xlu2 %763 }
  0xcf   : > { %7696 = vst [vmem:[#allocation17_spill] sm:$0xff] %v4951_v32  ;;  %v4953_v24 = vpop.permute.xlu1 %743 }
  0xd0   : > { %7697 = vst [vmem:[#allocation18_spill] sm:$0xff] %v4953_v24  ;;  %v4955_v49 = vpop.permute.xlu0 %747 }
  0xd1   : > { %7698 = vst [vmem:[#allocation19_spill] sm:$0xff] %v4955_v49 }
  0xd4   : > { %899 = vrot.lane.b32.xlu2 %v4957_v16, %s4489_s25 }
  0xd5   : > { %897 = vrot.lane.b32.xlu1 %v4959_v45, %s4489_s25 }
  0xd6   : > { %901 = vrot.lane.b32.xlu0 %v4961_v44, %s4489_s25  ;;  %v4969_v32 = vpop.permute.xlu2 %769  ;;  %v5086_v44 = vld [vmem:[#allocation2 + $0xe0] sm:$0xff] }
  0xd7   : > { %7700 = vst [vmem:[#allocation21_spill] sm:$0xff] %v4969_v32  ;;  %v4971_v24 = vpop.permute.xlu1 %749 }
  0xd8   : > { %7701 = vst [vmem:[#allocation22_spill] sm:$0xff] %v4971_v24  ;;  %v4973_v49 = vpop.permute.xlu0 %753 }
  0xd9   : > { %7702 = vst [vmem:[#allocation23_spill] sm:$0xff] %v4973_v49  ;;  %v4993_v49 = vld [vmem:[#allocation2 + $0x16a] sm:$0xff] }
  0xda   : > { %7708 = vst [vmem:[#allocation29_spill] sm:$0xff] %v4993_v49 }
  0xdc   : > { %905 = vrot.lane.b32.xlu2 %v4975_v37, %s4489_s25  ;;  %v406_v37 = vld [vmem:[#allocation2 + $0x30] sm:$0xff] }
  0xdd   : > { %903 = vrot.lane.b32.xlu1 %v4977_v11, %s4489_s25 }
  0xde   : > { %907 = vrot.lane.b32.xlu0 %v4979_v7, %s4489_s25  ;;  %v4987_v32 = vpop.permute.xlu2 %775  ;;  %v404_v7 = vld [vmem:[#allocation2 + $0x18] sm:$0xff] }
  0xdf   : > { %7705 = vst [vmem:[#allocation26_spill] sm:$0xff] %v4987_v32  ;;  %v4989_v24 = vpop.permute.xlu1 %755 }
  0xe0   : > { %7706 = vst [vmem:[#allocation27_spill] sm:$0xff] %v4989_v24  ;;  %v4991_v33 = vpop.permute.xlu0 %759 }
  0xe1   : > { %7707 = vst [vmem:[#allocation28_spill] sm:$0xff] %v4991_v33 }
  0xe4   : > { %911 = vrot.lane.b32.xlu2 %v4993_v49, %s4489_s25 }
  0xe5   : > { %909 = vrot.lane.b32.xlu1 %v4995_v23, %s4489_s25 }
  0xe6   : > { %913 = vrot.lane.b32.xlu0 %v4997_v25, %s4489_s25  ;;  %v5005_v32 = vpop.permute.xlu2 %781 }
  0xe7   : > { %7711 = vst [vmem:[#allocation32_spill] sm:$0xff] %v5005_v32  ;;  %v5007_v24 = vpop.permute.xlu1 %761  ;;  %v5020_v32 = vld [vmem:[#allocation2 + $0x48] sm:$0xff] }
  0xe8   : > { %7712 = vst [vmem:[#allocation33_spill] sm:$0xff] %v5007_v24  ;;  %v5009_v33 = vpop.permute.xlu0 %765  ;;  %v407_v24 = vld [vmem:[#allocation2 + $0x38] sm:$0xff] }
  0xe9   : > { %7713 = vst [vmem:[#allocation34_spill] sm:$0xff] %v5009_v33  ;;  %v5024_v33 = vld [vmem:[#allocation2 + $0x50] sm:$0xff] }
  0xea   : > { %7717 = vst [vmem:[#allocation38_spill] sm:$0xff] %v5020_v32 }
  0xeb   : > { %7718 = vst [vmem:[#allocation39_spill] sm:$0xff] %v5024_v33 }
  0xec   : > { %981 = vrot.lane.b32.xlu2 %v405_v15, %s4490_s26 }
  0xed   : > { %979 = vrot.lane.b32.xlu1 %v404_v7, %s4490_s26 }
  0xee   : > { %983 = vrot.lane.b32.xlu0 %v406_v37, %s4490_s26  ;;  %v5014_v49 = vpop.permute.xlu2 %851 }
  0xef   : > { %7714 = vst [vmem:[#allocation35_spill] sm:$0xff] %v5014_v49  ;;  %v5016_v23 = vpop.permute.xlu1 %767  ;;  %v5039_v49 = vld [vmem:[#allocation2 + $0x78] sm:$0xff] }
  0xf0   : > { %7715 = vst [vmem:[#allocation36_spill] sm:$0xff] %v5016_v23  ;;  %v5018_v25 = vpop.permute.xlu0 %771  ;;  %v410_v23 = vld [vmem:[#allocation2 + $0x60] sm:$0xff] }
  0xf1   : > { %7716 = vst [vmem:[#allocation37_spill] sm:$0xff] %v5018_v25  ;;  %v5035_v25 = vld [vmem:[#allocation2 + $0x68] sm:$0xff] }
  0xf2   : > { %7722 = vst [vmem:[#allocation43_spill] sm:$0xff] %v5035_v25 }
  0xf3   : > { %7723 = vst [vmem:[#allocation44_spill] sm:$0xff] %v5039_v49 }
  0xf4   : > { %987 = vrot.lane.b32.xlu2 %v5020_v32, %s4490_s26  ;;  %v368_v32 = vld [vmem:[%s4610_s24 + $0xf8] sm:$0xff] }
  0xf5   : > { %985 = vrot.lane.b32.xlu1 %v407_v24, %s4490_s26  ;;  %401 = vst.msk [vmem:[#allocation2 + $0x189] sm:$0xff] %vm225_vm0, %v368_v32 }
  0xf6   : > { %989 = vrot.lane.b32.xlu0 %v5024_v33, %s4490_s26  ;;  %v5029_v7 = vpop.permute.xlu2 %857  ;;  %v413_v33 = vld [vmem:[#allocation2 + $0x80] sm:$0xff] }
  0xf7   : > { %7719 = vst [vmem:[#allocation40_spill] sm:$0xff] %v5029_v7  ;;  %v5031_v15 = vpop.permute.xlu1 %773 }
  0xf8   : > { %7720 = vst [vmem:[#allocation41_spill] sm:$0xff] %v5031_v15  ;;  %v5033_v37 = vpop.permute.xlu0 %777 }
  0xf9   : > { %7721 = vst [vmem:[#allocation42_spill] sm:$0xff] %v5033_v37  ;;  %v5050_v37 = vld [vmem:[#allocation2 + $0x90] sm:$0xff] }
  0xfa   : > { %7727 = vst [vmem:[#allocation48_spill] sm:$0xff] %v5050_v37 }
  0xfc   : > { %993 = vrot.lane.b32.xlu2 %v5035_v25, %s4490_s26  ;;  %v5054_v25 = vld [vmem:[#allocation2 + $0x98] sm:$0xff] }
  0xfd   : > { %991 = vrot.lane.b32.xlu1 %v410_v23, %s4490_s26  ;;  %7728 = vst [vmem:[#allocation49_spill] sm:$0xff] %v5054_v25 }
  0xfe   : > { %995 = vrot.lane.b32.xlu0 %v5039_v49, %s4490_s26  ;;  %v5044_v24 = vpop.permute.xlu2 %863  ;;  %v416_v49 = vld [vmem:[#allocation2 + $0xa8] sm:$0xff] }
  0xff   : > { %7724 = vst [vmem:[#allocation45_spill] sm:$0xff] %v5044_v24  ;;  %v5046_v7 = vpop.permute.xlu1 %779  ;;  %v5065_v24 = vld [vmem:[#allocation2 + $0xb0] sm:$0xff] }
 0x100   : > { %7725 = vst [vmem:[#allocation46_spill] sm:$0xff] %v5046_v7  ;;  %v5048_v15 = vpop.permute.xlu0 %783 }
 0x101   : > { %7726 = vst [vmem:[#allocation47_spill] sm:$0xff] %v5048_v15 }
 0x102   : > { %7732 = vst [vmem:[#allocation53_spill] sm:$0xff] %v5065_v24 }
 0x104   : > { %999 = vrot.lane.b32.xlu2 %v5050_v37, %s4490_s26  ;;  %v5069_v37 = vld [vmem:[#allocation2 + $0xc0] sm:$0xff] }
 0x105   : > { %997 = vrot.lane.b32.xlu1 %v413_v33, %s4490_s26 }
 0x106   : > { %1001 = vrot.lane.b32.xlu0 %v5054_v25, %s4490_s26  ;;  %v5059_v23 = vpop.permute.xlu2 %869  ;;  %v419_v25 = vld [vmem:[#allocation2 + $0xc8] sm:$0xff] }
 0x107   : > { %7729 = vst [vmem:[#allocation50_spill] sm:$0xff] %v5059_v23  ;;  %v5061_v7 = vpop.permute.xlu1 %785 }
 0x108   : > { %7730 = vst [vmem:[#allocation51_spill] sm:$0xff] %v5061_v7  ;;  %v5063_v15 = vpop.permute.xlu0 %853 }
 0x109   : > { %7731 = vst [vmem:[#allocation52_spill] sm:$0xff] %v5063_v15  ;;  %v5080_v15 = vld [vmem:[#allocation2 + $0xd8] sm:$0xff] }
 0x10a   : > { %7736 = vst [vmem:[#allocation57_spill] sm:$0xff] %v5080_v15 }
 0x10c   : > { %1005 = vrot.lane.b32.xlu2 %v5065_v24, %s4490_s26  ;;  %v367_v24 = vld [vmem:[%s4610_s24 + $0xf0] sm:$0xff] }
 0x10d   : > { %1003 = vrot.lane.b32.xlu1 %v416_v49, %s4490_s26  ;;  %400 = vst.msk [vmem:[#allocation2 + $0x181] sm:$0xff] %vm225_vm0, %v367_v24 }
 0x10e   : > { %1007 = vrot.lane.b32.xlu0 %v5069_v37, %s4490_s26  ;;  %v5074_v33 = vpop.permute.xlu2 %875 }
 0x10f   : > { %7733 = vst [vmem:[#allocation54_spill] sm:$0xff] %v5074_v33  ;;  %v5076_v23 = vpop.permute.xlu1 %855 }
 0x110   : > { %7734 = vst [vmem:[#allocation55_spill] sm:$0xff] %v5076_v23  ;;  %v5078_v7 = vpop.permute.xlu0 %859  ;;  %v5099_v23 = vld [vmem:[#allocation2 + $0xf8] sm:$0xff] }
 0x111   : > { %7735 = vst [vmem:[#allocation56_spill] sm:$0xff] %v5078_v7 }
 0x112   : > { %7740 = vst [vmem:[#allocation61_spill] sm:$0xff] %v5099_v23 }
 0x114   : > { %1011 = vrot.lane.b32.xlu2 %v5080_v15, %s4490_s26  ;;  %v422_v15 = vld [vmem:[#allocation2 + $0xf0] sm:$0xff] }
 0x115   : > { %1009 = vrot.lane.b32.xlu1 %v419_v25, %s4490_s26  ;;  %v5103_v25 = vld [vmem:[#allocation2 + $0x108] sm:$0xff] }
 0x116   : > { %1013 = vrot.lane.b32.xlu0 %v5086_v44, %s4490_s26  ;;  %v5092_v49 = vpop.permute.xlu2 %881  ;;  %7741 = vst [vmem:[#allocation62_spill] sm:$0xff] %v5103_v25 }
 0x117   : > { %7737 = vst [vmem:[#allocation58_spill] sm:$0xff] %v5092_v49  ;;  %v5095_v33 = vpop.permute.xlu1 %861  ;;  %v425_v49 = vld [vmem:[#allocation2 + $0x110] sm:$0xff] }
 0x118   : > { %7738 = vst [vmem:[#allocation59_spill] sm:$0xff] %v5095_v33  ;;  %v5097_v7 = vpop.permute.xlu0 %865 }
 0x119   : > { %7739 = vst [vmem:[#allocation60_spill] sm:$0xff] %v5097_v7  ;;  %v5114_v7 = vld [vmem:[#allocation2 + $0x120] sm:$0xff] }
 0x11a   : > { %7745 = vst [vmem:[#allocation66_spill] sm:$0xff] %v5114_v7 }
 0x11c   : > { %1017 = vrot.lane.b32.xlu2 %v5099_v23, %s4490_s26  ;;  %v5118_v23 = vld [vmem:[#allocation2 + $0x128] sm:$0xff] }
 0x11d   : > { %1015 = vrot.lane.b32.xlu1 %v422_v15, %s4490_s26  ;;  %7746 = vst [vmem:[#allocation67_spill] sm:$0xff] %v5118_v23 }
 0x11e   : > { %1019 = vrot.lane.b32.xlu0 %v5103_v25, %s4490_s26  ;;  %v5108_v24 = vpop.permute.xlu2 %887  ;;  %v5131_v25 = vld [vmem:[#allocation2 + $0x138] sm:$0xff] }
 0x11f   : > { %7742 = vst [vmem:[#allocation63_spill] sm:$0xff] %v5108_v24  ;;  %v5110_v32 = vpop.permute.xlu1 %867 }
 0x120   : > { %7743 = vst [vmem:[#allocation64_spill] sm:$0xff] %v5110_v32  ;;  %v5112_v33 = vpop.permute.xlu0 %871 }
 0x121   : > { %7744 = vst [vmem:[#allocation65_spill] sm:$0xff] %v5112_v33  ;;  %v5129_v33 = vld [vmem:[#allocation2 + $0x140] sm:$0xff] }
 0x122   : > { %7750 = vst [vmem:[#allocation71_spill] sm:$0xff] %v5129_v33 }
 0x123   : > { %7751 = vst [vmem:[#allocation72_spill] sm:$0xff] %v5131_v25 }
 0x124   : > { %1023 = vrot.lane.b32.xlu2 %v5114_v7, %s4490_s26  ;;  %v5135_v7 = vld [vmem:[#allocation2 + $0x150] sm:$0xff] }
 0x125   : > { %1021 = vrot.lane.b32.xlu1 %v425_v49, %s4490_s26  ;;  %7752 = vst [vmem:[#allocation73_spill] sm:$0xff] %v5135_v7 }
 0x126   : > { %1025 = vrot.lane.b32.xlu0 %v5118_v23, %s4490_s26  ;;  %v5123_v15 = vpop.permute.xlu2 %893  ;;  %v5149_v23 = vld [vmem:[#allocation2 + $0x158] sm:$0xff] }
 0x127   : > { %7747 = vst [vmem:[#allocation68_spill] sm:$0xff] %v5123_v15  ;;  %v5125_v24 = vpop.permute.xlu1 %873  ;;  %v5147_v15 = vld [vmem:[#allocation2 + $0x168] sm:$0xff] }
 0x128   : > { %7748 = vst [vmem:[#allocation69_spill] sm:$0xff] %v5125_v24  ;;  %v5127_v32 = vpop.permute.xlu0 %877 }
 0x129   : > { %7749 = vst [vmem:[#allocation70_spill] sm:$0xff] %v5127_v32 }
 0x12a   : > { %7756 = vst [vmem:[#allocation77_spill] sm:$0xff] %v5147_v15 }
 0x12c   : > { %1029 = vrot.lane.b32.xlu2 %v5129_v33, %s4490_s26  ;;  %v5153_v33 = vld [vmem:[#allocation2 + $0x170] sm:$0xff] }
 0x12d   : > { %1027 = vrot.lane.b32.xlu1 %v5131_v25, %s4490_s26  ;;  %v5167_v25 = vld [vmem:[#allocation2 + $0x180] sm:$0xff] }
 0x12e   : > { %1031 = vrot.lane.b32.xlu0 %v5135_v7, %s4490_s26  ;;  %v5141_v49 = vpop.permute.xlu2 %899  ;;  %v5165_v7 = vld [vmem:[#allocation2 + $0x188] sm:$0xff] }
 0x12f   : > { %7753 = vst [vmem:[#allocation74_spill] sm:$0xff] %v5141_v49  ;;  %v5143_v24 = vpop.permute.xlu1 %879 }
 0x130   : > { %7754 = vst [vmem:[#allocation75_spill] sm:$0xff] %v5143_v24  ;;  %v5145_v32 = vpop.permute.xlu0 %883 }
 0x131   : > { %7755 = vst [vmem:[#allocation76_spill] sm:$0xff] %v5145_v32 }
 0x132   : > { %7760 = vst [vmem:[#allocation81_spill] sm:$0xff] %v5165_v7 }
 0x134   : > { %1035 = vrot.lane.b32.xlu2 %v5147_v15, %s4490_s26 }
 0x135   : > { %1033 = vrot.lane.b32.xlu1 %v5149_v23, %s4490_s26 }
 0x136   : > { %1037 = vrot.lane.b32.xlu0 %v5153_v33, %s4490_s26  ;;  %v5159_v49 = vpop.permute.xlu2 %905 }
 0x137   : > { %7757 = vst [vmem:[#allocation78_spill] sm:$0xff] %v5159_v49  ;;  %v5161_v24 = vpop.permute.xlu1 %885 }
 0x138   : > { %7758 = vst [vmem:[#allocation79_spill] sm:$0xff] %v5161_v24  ;;  %v5163_v32 = vpop.permute.xlu0 %889 }
 0x139   : > { %7759 = vst [vmem:[#allocation80_spill] sm:$0xff] %v5163_v32 }
 0x13c   : > { %1041 = vrot.lane.b32.xlu2 %v5165_v7, %s4490_s26 }
 0x13d   : > { %1039 = vrot.lane.b32.xlu1 %v5167_v25, %s4490_s26 }
 0x13e   : > { %v5173_v15 = vpop.permute.xlu2 %911  ;;  %1107 = vrot.lane.b32.xlu0 %v4642_v5, %s4491_s27 }
 0x13f   : > { %7761 = vst [vmem:[#allocation82_spill] sm:$0xff] %v5173_v15  ;;  %v5177_v49 = vpop.permute.xlu1 %891 }
 0x140   : > { %7762 = vst [vmem:[#allocation83_spill] sm:$0xff] %v5177_v49  ;;  %v5179_v24 = vpop.permute.xlu0 %895  ;;  %v649_v49 = vld [vmem:[#allocation2 + $0x139] sm:$0xff] }
 0x141   : > { %7763 = vst [vmem:[#allocation84_spill] sm:$0xff] %v5179_v24 }
 0x144   : > { %1111 = vrot.lane.b32.xlu2 %v4636_v4, %s4491_s27 }
 0x145   : > { %1109 = vrot.lane.b32.xlu1 %v4694_v19, %s4491_s27 }
 0x146   : > { %1113 = vrot.lane.b32.xlu0 %v4688_v17, %s4491_s27  ;;  %v5187_v32 = vpop.permute.xlu2 %981 }
 0x147   : > { %v5189_v15 = vpop.permute.xlu1 %897 }
 0x148   : > { %7764 = vst [vmem:[#allocation85_spill] sm:$0xff] %v5189_v15  ;;  %v5191_v7 = vpop.permute.xlu0 %901 }
 0x149   : > { %7765 = vst [vmem:[#allocation86_spill] sm:$0xff] %v5191_v7  ;;  %v5425_v7 = vld [vmem:[#allocation2 + $0x182] sm:$0xff] }
 0x14c   : > { %1117 = vrot.lane.b32.xlu2 %v4716_v28, %s4491_s27 }
 0x14d   : > { %1115 = vrot.lane.b32.xlu1 %v4700_v21, %s4491_s27 }
 0x14e   : > { %1119 = vrot.lane.b32.xlu0 %v4712_v26, %s4491_s27  ;;  %v5199_v4 = vpop.permute.xlu2 %987 }
 0x14f   : > { %v5201_v5 = vpop.permute.xlu1 %903 }
 0x150   : > { %7766 = vst [vmem:[#allocation87_spill] sm:$0xff] %v5201_v5  ;;  %v5203_v17 = vpop.permute.xlu0 %907 }
 0x151   : > { %7767 = vst [vmem:[#allocation88_spill] sm:$0xff] %v5203_v17 }
 0x154   : > { %1123 = vrot.lane.b32.xlu2 %v4739_v35, %s4491_s27 }
 0x155   : > { %1121 = vrot.lane.b32.xlu1 %v4720_v30, %s4491_s27 }
 0x156   : > { %1125 = vrot.lane.b32.xlu0 %v4737_v34, %s4491_s27  ;;  %v5211_v19 = vpop.permute.xlu2 %993 }
 0x157   : > { %v5213_v21 = vpop.permute.xlu1 %909 }
 0x158   : > { %7768 = vst [vmem:[#allocation89_spill] sm:$0xff] %v5213_v21  ;;  %v5215_v26 = vpop.permute.xlu0 %913  ;;  %v605_v21 = vld [vmem:[#allocation2 + $0xa8] sm:$0xff] }
 0x159   : > { %7769 = vst [vmem:[#allocation90_spill] sm:$0xff] %v5215_v26 }
 0x15c   : > { %1129 = vrot.lane.b32.xlu2 %v4757_v41, %s4491_s27 }
 0x15d   : > { %1127 = vrot.lane.b32.xlu1 %v4741_v36, %s4491_s27 }
 0x15e   : > { %1131 = vrot.lane.b32.xlu0 %v4755_v40, %s4491_s27  ;;  %v5223_v28 = vpop.permute.xlu2 %999 }
 0x15f   : > { %7770 = vst [vmem:[#allocation91_spill] sm:$0xff] %v5223_v28  ;;  %v5225_v30 = vpop.permute.xlu1 %979  ;;  %v7832_v28 = vld [vmem:[#allocation67_spill] sm:$0xff] }
 0x160   : > { %v5227_v34 = vpop.permute.xlu0 %983 }
 0x164   : > { %1135 = vrot.lane.b32.xlu2 %v4775_v47, %s4491_s27 }
 0x165   : > { %1133 = vrot.lane.b32.xlu1 %v4759_v42, %s4491_s27 }
 0x166   : > { %1137 = vrot.lane.b32.xlu0 %v4773_v46, %s4491_s27  ;;  %v5235_v35 = vpop.permute.xlu2 %1005 }
 0x167   : > { %7771 = vst [vmem:[#allocation92_spill] sm:$0xff] %v5235_v35  ;;  %v5237_v36 = vpop.permute.xlu1 %985  ;;  %v7802_v35 = vld [vmem:[#allocation25_spill] sm:$0xff] }
 0x168   : > { %v5239_v40 = vpop.permute.xlu0 %989 }
 0x16c   : > { %1141 = vrot.lane.b32.xlu2 %v4789_v51, %s4491_s27 }
 0x16d   : > { %1139 = vrot.lane.b32.xlu1 %v4777_v48, %s4491_s27 }
 0x16e   : > { %1143 = vrot.lane.b32.xlu0 %v4787_v50, %s4491_s27  ;;  %v5247_v41 = vpop.permute.xlu2 %1011 }
 0x16f   : > { %v5249_v42 = vpop.permute.xlu1 %991 }
 0x170   : > { %v5251_v46 = vpop.permute.xlu0 %995 }
 0x171   : > { %7772 = vst [vmem:[#allocation93_spill] sm:$0xff] %v5251_v46  ;;  %v650_v46 = vld [vmem:[#allocation2 + $0x141] sm:$0xff] }
 0x174   : > { %1147 = vrot.lane.b32.xlu2 %v4801_v54, %s4491_s27 }
 0x175   : > { %1145 = vrot.lane.b32.xlu1 %v4791_v52, %s4491_s27 }
 0x176   : > { %1149 = vrot.lane.b32.xlu0 %v4799_v53, %s4491_s27  ;;  %v5259_v47 = vpop.permute.xlu2 %1017 }
 0x177   : > { %v5261_v48 = vpop.permute.xlu1 %997 }
 0x178   : > { %7773 = vst [vmem:[#allocation94_spill] sm:$0xff] %v5261_v48  ;;  %v5263_v50 = vpop.permute.xlu0 %1001  ;;  %v634_v48 = vld [vmem:[#allocation2 + $0x81] sm:$0xff] }
 0x179   : > { %7774 = vst [vmem:[#allocation95_spill] sm:$0xff] %v5263_v50 }
 0x17c   : > { %1153 = vrot.lane.b32.xlu2 %v4813_v57, %s4491_s27  ;;  %v5289_v57 = vld [vmem:[#allocation2 + $0x181] sm:$0xff] }
 0x17d   : > { %1151 = vrot.lane.b32.xlu1 %v4803_v55, %s4491_s27 }
 0x17e   : > { %1155 = vrot.lane.b32.xlu0 %v4811_v56, %s4491_s27  ;;  %v5271_v51 = vpop.permute.xlu2 %1023 }
 0x17f   : > { %7775 = vst [vmem:[#allocation96_spill] sm:$0xff] %v5271_v51  ;;  %v5273_v52 = vpop.permute.xlu1 %1003  ;;  %v7831_v51 = vld [vmem:[#allocation72_spill] sm:$0xff] }
 0x180   : > { %7776 = vst [vmem:[#allocation97_spill] sm:$0xff] %v5273_v52  ;;  %v5275_v53 = vpop.permute.xlu0 %1007 }
 0x181   : > { %7777 = vst [vmem:[#allocation98_spill] sm:$0xff] %v5275_v53  ;;  %v5303_v53 = vld [vmem:[#allocation2 + $0x189] sm:$0xff] }
 0x184   : > { %1159 = vrot.lane.b32.xlu2 %v4825_v60, %s4491_s27 }
 0x185   : > { %1157 = vrot.lane.b32.xlu1 %v4815_v58, %s4491_s27 }
 0x186   : > { %1161 = vrot.lane.b32.xlu0 %v4823_v59, %s4491_s27  ;;  %v5283_v54 = vpop.permute.xlu2 %1029 }
 0x187   : > { %7778 = vst [vmem:[#allocation99_spill] sm:$0xff] %v5283_v54  ;;  %v5285_v55 = vpop.permute.xlu1 %1009 }
 0x188   : > { %v5287_v56 = vpop.permute.xlu0 %1013 }
 0x18c   : > { %1165 = vrot.lane.b32.xlu2 %v4835_v63, %s4491_s27 }
 0x18d   : > { %1163 = vrot.lane.b32.xlu1 %v4827_v61, %s4491_s27 }
 0x18e   : > { %1167 = vrot.lane.b32.xlu0 %v5289_v57, %s4491_s27  ;;  %v5297_v58 = vpop.permute.xlu2 %1035 }
 0x18f   : > { %7779 = vst [vmem:[#allocation100_spill] sm:$0xff] %v5297_v58  ;;  %v5299_v59 = vpop.permute.xlu1 %1015 }
 0x190   : > { %v5301_v60 = vpop.permute.xlu0 %1019 }
 0x191   : > { %7780 = vst [vmem:[#allocation101_spill] sm:$0xff] %v5301_v60  ;;  %v648_v60 = vld [vmem:[#allocation2 + $0x129] sm:$0xff] }
 0x194   : > { %1235 = vrot.lane.b32.xlu2 %v4843_v3, %s4492_s28 }
 0x195   : > { %1169 = vrot.lane.b32.xlu1 %v5303_v53, %s4491_s27 }
 0x196   : > { %1237 = vrot.lane.b32.xlu0 %v4841_v2, %s4492_s28  ;;  %v5311_v61 = vpop.permute.xlu2 %1041 }
 0x197   : > { %7781 = vst [vmem:[#allocation102_spill] sm:$0xff] %v5311_v61  ;;  %v5313_v63 = vpop.permute.xlu1 %1021  ;;  %v7801_v61 = vld [vmem:[#allocation30_spill] sm:$0xff] }
 0x198   : > { %7782 = vst [vmem:[#allocation103_spill] sm:$0xff] %v5313_v63  ;;  %v5315_v5 = vpop.permute.xlu0 %1025  ;;  %v633_v63 = vld [vmem:[#allocation2 + $0x79] sm:$0xff] }
 0x199   : > { %7783 = vst [vmem:[#allocation104_spill] sm:$0xff] %v5315_v5  ;;  %v602_v5 = vld [vmem:[#allocation2 + $0x80] sm:$0xff] }
 0x19c   : > { %1241 = vrot.lane.b32.xlu2 %v4857_v9, %s4492_s28 }
 0x19d   : > { %1239 = vrot.lane.b32.xlu1 %v4845_v6, %s4492_s28 }
 0x19e   : > { %1243 = vrot.lane.b32.xlu0 %v4855_v8, %s4492_s28  ;;  %v5323_v3 = vpop.permute.xlu2 %1111 }
 0x19f   : > { %v5325_v54 = vpop.permute.xlu1 %1027 }
 0x1a0   : > { %7784 = vst [vmem:[#allocation105_spill] sm:$0xff] %v5325_v54  ;;  %v5327_v2 = vpop.permute.xlu0 %1031  ;;  %v7809_v54 = vld [vmem:[#allocation38_spill] sm:$0xff] }
 0x1a1   : > { %7785 = vst [vmem:[#allocation106_spill] sm:$0xff] %v5327_v2 }
 0x1a4   : > { %1247 = vrot.lane.b32.xlu2 %v4871_v13, %s4492_s28 }
 0x1a5   : > { %1245 = vrot.lane.b32.xlu1 %v4859_v10, %s4492_s28 }
 0x1a6   : > { %1249 = vrot.lane.b32.xlu0 %v4869_v12, %s4492_s28  ;;  %v5335_v9 = vpop.permute.xlu2 %1117 }
 0x1a7   : > { %v5337_v6 = vpop.permute.xlu1 %1033 }
 0x1a8   : > { %v5339_v8 = vpop.permute.xlu0 %1037 }
 0x1a9   : > { %7786 = vst [vmem:[#allocation107_spill] sm:$0xff] %v5339_v8  ;;  %v7813_v8 = vld [vmem:[#allocation43_spill] sm:$0xff] }
 0x1ac   : > { %1253 = vrot.lane.b32.xlu2 %v4887_v20, %s4492_s28 }
 0x1ad   : > { %1251 = vrot.lane.b32.xlu1 %v4873_v14, %s4492_s28 }
 0x1ae   : > { %1255 = vrot.lane.b32.xlu0 %v4885_v18, %s4492_s28  ;;  %v5347_v13 = vpop.permute.xlu2 %1123 }
 0x1af   : > { %7787 = vst [vmem:[#allocation108_spill] sm:$0xff] %v5347_v13  ;;  %v5349_v10 = vpop.permute.xlu1 %1039  ;;  %v646_v13 = vld [vmem:[#allocation2 + $0x111] sm:$0xff] }
 0x1b0   : > { %7788 = vst [vmem:[#allocation109_spill] sm:$0xff] %v5349_v10  ;;  %v5351_v12 = vpop.permute.xlu0 %1107  ;;  %v595_v10 = vld [vmem:[#allocation2 + $0x30] sm:$0xff] }
 0x1b4   : > { %1259 = vrot.lane.b32.xlu2 %v4905_v29, %s4492_s28 }
 0x1b5   : > { %1257 = vrot.lane.b32.xlu1 %v4889_v22, %s4492_s28 }
 0x1b6   : > { %1261 = vrot.lane.b32.xlu0 %v4903_v27, %s4492_s28  ;;  %v5359_v20 = vpop.permute.xlu2 %1129 }
 0x1b7   : > { %7789 = vst [vmem:[#allocation110_spill] sm:$0xff] %v5359_v20  ;;  %v5361_v14 = vpop.permute.xlu1 %1109  ;;  %v7812_v20 = vld [vmem:[#allocation39_spill] sm:$0xff] }
 0x1b8   : > { %v5363_v18 = vpop.permute.xlu0 %1113 }
 0x1bc   : > { %1265 = vrot.lane.b32.xlu2 %v4923_v39, %s4492_s28 }
 0x1bd   : > { %1263 = vrot.lane.b32.xlu1 %v4907_v31, %s4492_s28 }
 0x1be   : > { %1267 = vrot.lane.b32.xlu0 %v4921_v38, %s4492_s28  ;;  %v5371_v29 = vpop.permute.xlu2 %1135 }
 0x1bf   : > { %7790 = vst [vmem:[#allocation111_spill] sm:$0xff] %v5371_v29  ;;  %v5373_v22 = vpop.permute.xlu1 %1115  ;;  %v7797_v29 = vld [vmem:[#allocation20_spill] sm:$0xff] }
 0x1c0   : > { %v5375_v27 = vpop.permute.xlu0 %1119 }
 0x1c4   : > { %1271 = vrot.lane.b32.xlu2 %v4941_v1, %s4492_s28 }
 0x1c5   : > { %1269 = vrot.lane.b32.xlu1 %v4925_v43, %s4492_s28 }
 0x1c6   : > { %1273 = vrot.lane.b32.xlu0 %v4939_v62, %s4492_s28  ;;  %v5383_v39 = vpop.permute.xlu2 %1141 }
 0x1c7   : > { %7791 = vst [vmem:[#allocation112_spill] sm:$0xff] %v5383_v39  ;;  %v5385_v31 = vpop.permute.xlu1 %1121  ;;  %v7893_v39 = vld [vmem:[#allocation35_spill] sm:$0xff] }
 0x1c8   : > { %7792 = vst [vmem:[#allocation113_spill] sm:$0xff] %v5385_v31  ;;  %v5387_v38 = vpop.permute.xlu0 %1125 }
 0x1c9   : > { %7793 = vst [vmem:[#allocation114_spill] sm:$0xff] %v5387_v38  ;;  %v631_v38 = vld [vmem:[#allocation2 + $0x61] sm:$0xff] }
 0x1cc   : > { %1277 = vrot.lane.b32.xlu2 %v4959_v45, %s4492_s28  ;;  %v7798_v45 = vld [vmem:[#allocation24_spill] sm:$0xff] }
 0x1cd   : > { %1275 = vrot.lane.b32.xlu1 %v4943_v0, %s4492_s28 }
 0x1ce   : > { %1279 = vrot.lane.b32.xlu0 %v4957_v16, %s4492_s28  ;;  %v5395_v1 = vpop.permute.xlu2 %1147 }
 0x1cf   : > { %7794 = vst [vmem:[#allocation115_spill] sm:$0xff] %v5395_v1  ;;  %v5397_v43 = vpop.permute.xlu1 %1127  ;;  %v645_v1 = vld [vmem:[#allocation2 + $0x109] sm:$0xff] }
 0x1d0   : > { %7795 = vst [vmem:[#allocation116_spill] sm:$0xff] %v5397_v43  ;;  %v5399_v62 = vpop.permute.xlu0 %1131  ;;  %v7827_v43 = vld [vmem:[#allocation62_spill] sm:$0xff] }
 0x1d1   : > { %7796 = vst [vmem:[#allocation117_spill] sm:$0xff] %v5399_v62  ;;  %v596_v62 = vld [vmem:[#allocation2 + $0x38] sm:$0xff] }
 0x1d4   : > { %1283 = vrot.lane.b32.xlu2 %v4977_v11, %s4492_s28  ;;  %v7803_v11 = vld [vmem:[#allocation29_spill] sm:$0xff] }
 0x1d5   : > { %1281 = vrot.lane.b32.xlu1 %v7797_v29, %s4492_s28 }
 0x1d6   : > { %1285 = vrot.lane.b32.xlu0 %v7798_v45, %s4492_s28  ;;  %v5407_v2 = vpop.permute.xlu2 %1153 }
 0x1d7   : > { %7799 = vst [vmem:[#allocation20_spill] sm:$0xff] %v5407_v2  ;;  %v5409_v0 = vpop.permute.xlu1 %1133 }
 0x1d8   : > { %7800 = vst [vmem:[#allocation24_spill] sm:$0xff] %v5409_v0  ;;  %v5411_v16 = vpop.permute.xlu0 %1137  ;;  %v5427_v0 = vld [vmem:[#allocation2 + $0x18a] sm:$0xff] }
 0x1dc   : > { %1289 = vrot.lane.b32.xlu2 %v7801_v61, %s4492_s28  ;;  %v7805_v61 = vld [vmem:[#allocation31_spill] sm:$0xff] }
 0x1dd   : > { %1287 = vrot.lane.b32.xlu1 %v7802_v35, %s4492_s28 }
 0x1de   : > { %1291 = vrot.lane.b32.xlu0 %v7803_v11, %s4492_s28  ;;  %v5419_v26 = vpop.permute.xlu2 %1159 }
 0x1df   : > { %7804 = vst [vmem:[#allocation30_spill] sm:$0xff] %v5419_v26  ;;  %v5421_v29 = vpop.permute.xlu1 %1139 }
 0x1e0   : > { %v5423_v45 = vpop.permute.xlu0 %1143 }
 0x1e4   : > { %1295 = vrot.lane.b32.xlu2 %v5425_v7, %s4492_s28 }
 0x1e5   : > { %1293 = vrot.lane.b32.xlu1 %v7805_v61, %s4492_s28 }
 0x1e6   : > { %1297 = vrot.lane.b32.xlu0 %v5427_v0, %s4492_s28  ;;  %v5435_v35 = vpop.permute.xlu2 %1165 }
 0x1e7   : > { %7806 = vst [vmem:[#allocation25_spill] sm:$0xff] %v5435_v35  ;;  %v5437_v11 = vpop.permute.xlu1 %1145  ;;  %v599_v35 = vld [vmem:[#allocation2 + $0x60] sm:$0xff] }
 0x1e8   : > { %7807 = vst [vmem:[#allocation29_spill] sm:$0xff] %v5437_v11  ;;  %v5439_v26 = vpop.permute.xlu0 %1149  ;;  %v678_v11 = vld [vmem:[#allocation2 + $0x112] sm:$0xff] }
 0x1e9   : > { %7808 = vst [vmem:[#allocation31_spill] sm:$0xff] %v5439_v26  ;;  %v630_v26 = vld [vmem:[#allocation2 + $0x51] sm:$0xff] }
 0x1ec   : > { %1365 = vrot.lane.b32.xlu2 %v596_v62, %s4493_s29 }
 0x1ed   : > { %1363 = vrot.lane.b32.xlu1 %v595_v10, %s4493_s29 }
 0x1ee   : > { %1367 = vrot.lane.b32.xlu0 %v7809_v54, %s4493_s29  ;;  %v5445_v61 = vpop.permute.xlu2 %1235 }
 0x1ef   : > { %v5447_v52 = vpop.permute.xlu1 %1151 }
 0x1f0   : > { %7810 = vst [vmem:[#allocation38_spill] sm:$0xff] %v5447_v52  ;;  %v5449_v2 = vpop.permute.xlu0 %1155  ;;  %v608_v52 = vld [vmem:[#allocation2 + $0xc8] sm:$0xff] }
 0x1f1   : > { %7811 = vst [vmem:[#allocation118_spill] sm:$0xff] %v5449_v2  ;;  %v7815_v2 = vld [vmem:[#allocation44_spill] sm:$0xff] }
 0x1f4   : > { %1371 = vrot.lane.b32.xlu2 %v599_v35, %s4493_s29  ;;  %v7816_v35 = vld [vmem:[#allocation48_spill] sm:$0xff] }
 0x1f5   : > { %1369 = vrot.lane.b32.xlu1 %v7812_v20, %s4493_s29 }
 0x1f6   : > { %1373 = vrot.lane.b32.xlu0 %v7813_v8, %s4493_s29  ;;  %v5456_v62 = vpop.permute.xlu2 %1241 }
 0x1f7   : > { %v5458_v10 = vpop.permute.xlu1 %1157 }
 0x1f8   : > { %7814 = vst [vmem:[#allocation39_spill] sm:$0xff] %v5458_v10  ;;  %v5460_v54 = vpop.permute.xlu0 %1161  ;;  %v7819_v10 = vld [vmem:[#allocation49_spill] sm:$0xff] }
 0x1fc   : > { %1377 = vrot.lane.b32.xlu2 %v602_v5, %s4493_s29  ;;  %v7820_v5 = vld [vmem:[#allocation53_spill] sm:$0xff] }
 0x1fd   : > { %1375 = vrot.lane.b32.xlu1 %v7815_v2, %s4493_s29 }
 0x1fe   : > { %1379 = vrot.lane.b32.xlu0 %v7816_v35, %s4493_s29  ;;  %v5467_v50 = vpop.permute.xlu2 %1247 }
 0x1ff   : > { %v5469_v20 = vpop.permute.xlu1 %1163 }
 0x200   : > { %7817 = vst [vmem:[#allocation43_spill] sm:$0xff] %v5469_v20  ;;  %v5471_v8 = vpop.permute.xlu0 %1167  ;;  %v611_v20 = vld [vmem:[#allocation2 + $0xf0] sm:$0xff] }
 0x201   : > { %7818 = vst [vmem:[#allocation44_spill] sm:$0xff] %v5471_v8 }
 0x204   : > { %1383 = vrot.lane.b32.xlu2 %v605_v21, %s4493_s29  ;;  %v7823_v21 = vld [vmem:[#allocation57_spill] sm:$0xff] }
 0x205   : > { %1381 = vrot.lane.b32.xlu1 %v7819_v10, %s4493_s29 }
 0x206   : > { %1385 = vrot.lane.b32.xlu0 %v7820_v5, %s4493_s29  ;;  %v5478_v15 = vpop.permute.xlu2 %1253 }
 0x207   : > { %7821 = vst [vmem:[#allocation48_spill] sm:$0xff] %v5478_v15  ;;  %v5480_v2 = vpop.permute.xlu1 %1169  ;;  %v628_v15 = vld [vmem:[#allocation2 + $0x39] sm:$0xff] }
 0x208   : > { %7822 = vst [vmem:[#allocation49_spill] sm:$0xff] %v5480_v2  ;;  %v5482_v35 = vpop.permute.xlu0 %1237 }
 0x20c   : > { %1389 = vrot.lane.b32.xlu2 %v608_v52, %s4493_s29  ;;  %v7825_v52 = vld [vmem:[#allocation61_spill] sm:$0xff] }
 0x20d   : > { %1387 = vrot.lane.b32.xlu1 %v5069_v37, %s4493_s29 }
 0x20e   : > { %1391 = vrot.lane.b32.xlu0 %v7823_v21, %s4493_s29  ;;  %v5489_v8 = vpop.permute.xlu2 %1259 }
 0x20f   : > { %7824 = vst [vmem:[#allocation53_spill] sm:$0xff] %v5489_v8  ;;  %v5491_v10 = vpop.permute.xlu1 %1239  ;;  %v614_v8 = vld [vmem:[#allocation2 + $0x110] sm:$0xff] }
 0x210   : > { %v5493_v5 = vpop.permute.xlu0 %1243 }
 0x214   : > { %1395 = vrot.lane.b32.xlu2 %v611_v20, %s4493_s29  ;;  %v7828_v20 = vld [vmem:[#allocation66_spill] sm:$0xff] }
 0x215   : > { %1393 = vrot.lane.b32.xlu1 %v5086_v44, %s4493_s29 }
 0x216   : > { %1397 = vrot.lane.b32.xlu0 %v7825_v52, %s4493_s29  ;;  %v5500_v2 = vpop.permute.xlu2 %1265 }
 0x217   : > { %v5502_v37 = vpop.permute.xlu1 %1245 }
 0x218   : > { %v5504_v21 = vpop.permute.xlu0 %1249 }
 0x219   : > { %7826 = vst [vmem:[#allocation57_spill] sm:$0xff] %v5504_v21  ;;  %v670_v21 = vld [vmem:[#allocation2 + $0xb2] sm:$0xff] }
 0x21c   : > { %1401 = vrot.lane.b32.xlu2 %v614_v8, %s4493_s29  ;;  %v7833_v8 = vld [vmem:[#allocation71_spill] sm:$0xff] }
 0x21d   : > { %1399 = vrot.lane.b32.xlu1 %v7827_v43, %s4493_s29 }
 0x21e   : > { %1403 = vrot.lane.b32.xlu0 %v7828_v20, %s4493_s29  ;;  %v5511_v58 = vpop.permute.xlu2 %1271 }
 0x21f   : > { %v5513_v44 = vpop.permute.xlu1 %1251 }
 0x220   : > { %7829 = vst [vmem:[#allocation61_spill] sm:$0xff] %v5513_v44  ;;  %v5515_v52 = vpop.permute.xlu0 %1255  ;;  %v640_v44 = vld [vmem:[#allocation2 + $0xc9] sm:$0xff] }
 0x221   : > { %7830 = vst [vmem:[#allocation62_spill] sm:$0xff] %v5515_v52  ;;  %v7837_v52 = vld [vmem:[#allocation73_spill] sm:$0xff] }
 0x224   : > { %1407 = vrot.lane.b32.xlu2 %v7831_v51, %s4493_s29  ;;  %v7838_v51 = vld [vmem:[#allocation77_spill] sm:$0xff] }
 0x225   : > { %1405 = vrot.lane.b32.xlu1 %v7832_v28, %s4493_s29 }
 0x226   : > { %1409 = vrot.lane.b32.xlu0 %v7833_v8, %s4493_s29  ;;  %v5523_v17 = vpop.permute.xlu2 %1277 }
 0x227   : > { %7834 = vst [vmem:[#allocation66_spill] sm:$0xff] %v5523_v17  ;;  %v5525_v43 = vpop.permute.xlu1 %1257  ;;  %v629_v17 = vld [vmem:[#allocation2 + $0x49] sm:$0xff] }
 0x228   : > { %7835 = vst [vmem:[#allocation72_spill] sm:$0xff] %v5525_v43  ;;  %v5527_v20 = vpop.permute.xlu0 %1261  ;;  %v625_v43 = vld [vmem:[#allocation2 + $0x198] sm:$0xff] }
 0x229   : > { %7836 = vst [vmem:[#allocation67_spill] sm:$0xff] %v5527_v20 }
 0x22c   : > { %1413 = vrot.lane.b32.xlu2 %v5149_v23, %s4493_s29  ;;  %v7841_v23 = vld [vmem:[#allocation81_spill] sm:$0xff] }
 0x22d   : > { %1411 = vrot.lane.b32.xlu1 %v7837_v52, %s4493_s29 }
 0x22e   : > { %1415 = vrot.lane.b32.xlu0 %v7838_v51, %s4493_s29  ;;  %v5535_v24 = vpop.permute.xlu2 %1283 }
 0x22f   : > { %7839 = vst [vmem:[#allocation71_spill] sm:$0xff] %v5535_v24  ;;  %v5537_v28 = vpop.permute.xlu1 %1263  ;;  %v626_v24 = vld [vmem:[#allocation2 + $0x1a0] sm:$0xff] }
 0x230   : > { %7840 = vst [vmem:[#allocation73_spill] sm:$0xff] %v5537_v28  ;;  %v5539_v8 = vpop.permute.xlu0 %1267  ;;  %v627_v28 = vld [vmem:[#allocation2 + $0x31] sm:$0xff] }
 0x234   : > { %1419 = vrot.lane.b32.xlu2 %v5167_v25, %s4493_s29 }
 0x235   : > { %1417 = vrot.lane.b32.xlu1 %v5153_v33, %s4493_s29 }
 0x236   : > { %1421 = vrot.lane.b32.xlu0 %v7841_v23, %s4493_s29  ;;  %v5547_v20 = vpop.permute.xlu2 %1289 }
 0x237   : > { %7842 = vst [vmem:[#allocation77_spill] sm:$0xff] %v5547_v20  ;;  %v5549_v52 = vpop.permute.xlu1 %1269  ;;  %v1977_v20 = vld [vmem:[%s7620_s1] sm:$0xff] }
 0x238   : > { %7843 = vst [vmem:[#allocation81_spill] sm:$0xff] %v5549_v52  ;;  %v5551_v51 = vpop.permute.xlu0 %1273  ;;  %v676_v52 = vld [vmem:[#allocation2 + $0xfa] sm:$0xff] }
 0x239   : > { %7844 = vst [vmem:[#allocation119_spill] sm:$0xff] %v5551_v51  ;;  %v667_v51 = vld [vmem:[#allocation2 + $0x92] sm:$0xff] }
 0x23c   : > { %1425 = vrot.lane.b32.xlu2 %v626_v24, %s4493_s29 }
 0x23d   : > { %1423 = vrot.lane.b32.xlu1 %v625_v43, %s4493_s29  ;;  %s3932_s29 = sshll.u32 %s8138_s19, 3 }
 0x23e   : > { %1491 = vrot.lane.b32.xlu0 %v627_v28, %s4494_s30  ;;  %v5556_v33 = vpop.permute.xlu2 %1295  ;;  %s224_s7 = scalar_lea.vmem %s7624_s5, %s3932_s29 }
 0x23f   : > { %7845 = vst [vmem:[#allocation120_spill] sm:$0xff] %v5556_v33  ;;  %v5558_v25 = vpop.permute.xlu1 %1275  ;;  %v632_v33 = vld [vmem:[#allocation2 + $0x69] sm:$0xff] }
 0x240   : > { %7846 = vst [vmem:[#allocation121_spill] sm:$0xff] %v5558_v25  ;;  %v5560_v23 = vpop.permute.xlu0 %1279  ;;  %v637_v25 = vld [vmem:[#allocation2 + $0xa9] sm:$0xff] }
 0x241   : > { %7847 = vst [vmem:[#allocation122_spill] sm:$0xff] %v5560_v23  ;;  %v635_v23 = vld [vmem:[#allocation2 + $0x91] sm:$0xff] }
 0x244   : > { %1495 = vrot.lane.b32.xlu2 %v629_v17, %s4494_s30 }
 0x245   : > { %1493 = vrot.lane.b32.xlu1 %v628_v15, %s4494_s30 }
 0x246   : > { %1497 = vrot.lane.b32.xlu0 %v630_v26, %s4494_s30  ;;  %v5565_v24 = vpop.permute.xlu2 %1365 }
 0x247   : > { %v5567_v43 = vpop.permute.xlu1 %1281 }
 0x248   : > { %7848 = vst [vmem:[#allocation123_spill] sm:$0xff] %v5567_v43  ;;  %v5569_v28 = vpop.permute.xlu0 %1285  ;;  %v636_v43 = vld [vmem:[#allocation2 + $0x99] sm:$0xff] }
 0x249   : > { %7849 = vst [vmem:[#allocation124_spill] sm:$0xff] %v5569_v28  ;;  %v638_v28 = vld [vmem:[#allocation2 + $0xb1] sm:$0xff] }
 0x24c   : > { %1501 = vrot.lane.b32.xlu2 %v632_v33, %s4494_s30 }
 0x24d   : > { %1499 = vrot.lane.b32.xlu1 %v631_v38, %s4494_s30 }
 0x24e   : > { %1503 = vrot.lane.b32.xlu0 %v633_v63, %s4494_s30  ;;  %v5574_v17 = vpop.permute.xlu2 %1371 }
 0x24f   : > { %v5576_v15 = vpop.permute.xlu1 %1287 }
 0x250   : > { %7850 = vst [vmem:[#allocation125_spill] sm:$0xff] %v5576_v15  ;;  %v5578_v26 = vpop.permute.xlu0 %1291  ;;  %v639_v15 = vld [vmem:[#allocation2 + $0xc1] sm:$0xff] }
 0x251   : > { %7851 = vst [vmem:[#allocation126_spill] sm:$0xff] %v5578_v26  ;;  %v641_v26 = vld [vmem:[#allocation2 + $0xd9] sm:$0xff] }
 0x254   : > { %1507 = vrot.lane.b32.xlu2 %v635_v23, %s4494_s30 }
 0x255   : > { %1505 = vrot.lane.b32.xlu1 %v634_v48, %s4494_s30 }
 0x256   : > { %1509 = vrot.lane.b32.xlu0 %v636_v43, %s4494_s30  ;;  %v5583_v33 = vpop.permute.xlu2 %1377 }
 0x257   : > { %7852 = vst [vmem:[#allocation127_spill] sm:$0xff] %v5583_v33  ;;  %v5585_v38 = vpop.permute.xlu1 %1293  ;;  %v651_v33 = vld [vmem:[#allocation2 + $0x151] sm:$0xff] }
 0x258   : > { %7853 = vst [vmem:[#allocation128_spill] sm:$0xff] %v5585_v38  ;;  %v5587_v63 = vpop.permute.xlu0 %1297  ;;  %v642_v38 = vld [vmem:[#allocation2 + $0xe1] sm:$0xff] }
 0x259   : > { %7854 = vst [vmem:[#allocation129_spill] sm:$0xff] %v5587_v63  ;;  %v644_v63 = vld [vmem:[#allocation2 + $0xf9] sm:$0xff] }
 0x25c   : > { %1513 = vrot.lane.b32.xlu2 %v638_v28, %s4494_s30 }
 0x25d   : > { %1511 = vrot.lane.b32.xlu1 %v637_v25, %s4494_s30 }
 0x25e   : > { %1515 = vrot.lane.b32.xlu0 %v639_v15, %s4494_s30  ;;  %v5592_v23 = vpop.permute.xlu2 %1383 }
 0x25f   : > { %7855 = vst [vmem:[#allocation130_spill] sm:$0xff] %v5592_v23  ;;  %v5594_v48 = vpop.permute.xlu1 %1363  ;;  %v643_v23 = vld [vmem:[#allocation2 + $0xf1] sm:$0xff] }
 0x260   : > { %v5596_v43 = vpop.permute.xlu0 %1367 }
 0x264   : > { %1519 = vrot.lane.b32.xlu2 %v641_v26, %s4494_s30 }
 0x265   : > { %1517 = vrot.lane.b32.xlu1 %v640_v44, %s4494_s30 }
 0x266   : > { %1521 = vrot.lane.b32.xlu0 %v642_v38, %s4494_s30  ;;  %v5601_v28 = vpop.permute.xlu2 %1389 }
 0x267   : > { %7856 = vst [vmem:[#allocation131_spill] sm:$0xff] %v5601_v28  ;;  %v5603_v25 = vpop.permute.xlu1 %1369  ;;  %v647_v28 = vld [vmem:[#allocation2 + $0x121] sm:$0xff] }
 0x268   : > { %v5605_v15 = vpop.permute.xlu0 %1373 }
 0x26c   : > { %1525 = vrot.lane.b32.xlu2 %v644_v63, %s4494_s30 }
 0x26d   : > { %1523 = vrot.lane.b32.xlu1 %v643_v23, %s4494_s30 }
 0x26e   : > { %1527 = vrot.lane.b32.xlu0 %v645_v1, %s4494_s30  ;;  %v5610_v26 = vpop.permute.xlu2 %1395 }
 0x26f   : > { %v5612_v44 = vpop.permute.xlu1 %1375 }
 0x270   : > { %v5614_v38 = vpop.permute.xlu0 %1379 }
 0x271   : > { %7857 = vst [vmem:[#allocation132_spill] sm:$0xff] %v5614_v38  ;;  %v653_v38 = vld [vmem:[#allocation2 + $0x169] sm:$0xff] }
 0x274   : > { %1531 = vrot.lane.b32.xlu2 %v647_v28, %s4494_s30 }
 0x275   : > { %1529 = vrot.lane.b32.xlu1 %v646_v13, %s4494_s30 }
 0x276   : > { %1533 = vrot.lane.b32.xlu0 %v648_v60, %s4494_s30  ;;  %v5619_v63 = vpop.permute.xlu2 %1401 }
 0x277   : > { %7858 = vst [vmem:[#allocation133_spill] sm:$0xff] %v5619_v63  ;;  %v5621_v23 = vpop.permute.xlu1 %1381  ;;  %v652_v63 = vld [vmem:[#allocation2 + $0x159] sm:$0xff] }
 0x278   : > { %7859 = vst [vmem:[#allocation134_spill] sm:$0xff] %v5621_v23  ;;  %v5623_v1 = vpop.permute.xlu0 %1385  ;;  %v654_v23 = vld [vmem:[#allocation2 + $0x171] sm:$0xff] }
 0x279   : > { %7860 = vst [vmem:[#allocation135_spill] sm:$0xff] %v5623_v1  ;;  %v657_v1 = vld [vmem:[#allocation2 + $0x199] sm:$0xff] }
 0x27c   : > { %1537 = vrot.lane.b32.xlu2 %v650_v46, %s4494_s30 }
 0x27d   : > { %1535 = vrot.lane.b32.xlu1 %v649_v49, %s4494_s30 }
 0x27e   : > { %1539 = vrot.lane.b32.xlu0 %v651_v33, %s4494_s30  ;;  %v5628_v28 = vpop.permute.xlu2 %1407 }
 0x27f   : > { %7861 = vst [vmem:[#allocation136_spill] sm:$0xff] %v5628_v28  ;;  %v5630_v13 = vpop.permute.xlu1 %1387  ;;  %v661_v28 = vld [vmem:[#allocation2 + $0x4a] sm:$0xff] }
 0x280   : > { %7862 = vst [vmem:[#allocation137_spill] sm:$0xff] %v5630_v13  ;;  %v5632_v60 = vpop.permute.xlu0 %1391  ;;  %v660_v13 = vld [vmem:[#allocation2 + $0x3a] sm:$0xff] }
 0x281   : > { %7863 = vst [vmem:[#allocation138_spill] sm:$0xff] %v5632_v60  ;;  %v659_v60 = vld [vmem:[#allocation2 + $0x32] sm:$0xff] }
 0x284   : > { %1543 = vrot.lane.b32.xlu2 %v653_v38, %s4494_s30 }
 0x285   : > { %1541 = vrot.lane.b32.xlu1 %v652_v63, %s4494_s30 }
 0x286   : > { %1545 = vrot.lane.b32.xlu0 %v654_v23, %s4494_s30  ;;  %v5637_v46 = vpop.permute.xlu2 %1413 }
 0x287   : > { %7864 = vst [vmem:[#allocation139_spill] sm:$0xff] %v5637_v46  ;;  %v5639_v49 = vpop.permute.xlu1 %1393  ;;  %v658_v46 = vld [vmem:[#allocation2 + $0x1a1] sm:$0xff] }
 0x288   : > { %v5641_v33 = vpop.permute.xlu0 %1397 }
 0x289   : > { %7865 = vst [vmem:[#allocation140_spill] sm:$0xff] %v5641_v33  ;;  %v663_v33 = vld [vmem:[#allocation2 + $0x62] sm:$0xff] }
 0x28c   : > { %1549 = vrot.lane.b32.xlu2 %v5303_v53, %s4494_s30 }
 0x28d   : > { %1547 = vrot.lane.b32.xlu1 %v5289_v57, %s4494_s30 }
 0x28e   : > { %1551 = vrot.lane.b32.xlu0 %v657_v1, %s4494_s30  ;;  %v5648_v38 = vpop.permute.xlu2 %1419 }
 0x28f   : > { %7866 = vst [vmem:[#allocation141_spill] sm:$0xff] %v5648_v38  ;;  %v5650_v63 = vpop.permute.xlu1 %1399  ;;  %v662_v38 = vld [vmem:[#allocation2 + $0x52] sm:$0xff] }
 0x290   : > { %v5652_v23 = vpop.permute.xlu0 %1403 }
 0x291   : > { %7867 = vst [vmem:[#allocation142_spill] sm:$0xff] %v5652_v23  ;;  %v664_v23 = vld [vmem:[#allocation2 + $0x6a] sm:$0xff] }
 0x294   : > { %1619 = vrot.lane.b32.xlu2 %v659_v60, %s4495_s6 }
 0x295   : > { %1553 = vrot.lane.b32.xlu1 %v658_v46, %s4494_s30 }
 0x296   : > { %1621 = vrot.lane.b32.xlu0 %v660_v13, %s4495_s6  ;;  %v5657_v53 = vpop.permute.xlu2 %1425 }
 0x297   : > { %7868 = vst [vmem:[#allocation143_spill] sm:$0xff] %v5657_v53  ;;  %v5659_v57 = vpop.permute.xlu1 %1405  ;;  %v665_v53 = vld [vmem:[#allocation2 + $0x7a] sm:$0xff] }
 0x298   : > { %7869 = vst [vmem:[#allocation144_spill] sm:$0xff] %v5659_v57  ;;  %v5661_v1 = vpop.permute.xlu0 %1409  ;;  %v666_v57 = vld [vmem:[#allocation2 + $0x82] sm:$0xff] }
 0x299   : > { %7870 = vst [vmem:[#allocation145_spill] sm:$0xff] %v5661_v1  ;;  %v668_v1 = vld [vmem:[#allocation2 + $0x9a] sm:$0xff] }
 0x29c   : > { %1625 = vrot.lane.b32.xlu2 %v662_v38, %s4495_s6 }
 0x29d   : > { %1623 = vrot.lane.b32.xlu1 %v661_v28, %s4495_s6 }
 0x29e   : > { %1627 = vrot.lane.b32.xlu0 %v663_v33, %s4495_s6  ;;  %v5666_v60 = vpop.permute.xlu2 %1495 }
 0x29f   : > { %v5668_v46 = vpop.permute.xlu1 %1411 }
 0x2a0   : > { %7871 = vst [vmem:[#allocation146_spill] sm:$0xff] %v5668_v46  ;;  %v5670_v13 = vpop.permute.xlu0 %1415  ;;  %v669_v46 = vld [vmem:[#allocation2 + $0xaa] sm:$0xff] }
 0x2a1   : > { %7872 = vst [vmem:[#allocation147_spill] sm:$0xff] %v5670_v13  ;;  %v671_v13 = vld [vmem:[#allocation2 + $0xc2] sm:$0xff] }
 0x2a4   : > { %1631 = vrot.lane.b32.xlu2 %v665_v53, %s4495_s6 }
 0x2a5   : > { %1629 = vrot.lane.b32.xlu1 %v664_v23, %s4495_s6 }
 0x2a6   : > { %1633 = vrot.lane.b32.xlu0 %v666_v57, %s4495_s6  ;;  %v5675_v38 = vpop.permute.xlu2 %1501 }
 0x2a7   : > { %v5677_v28 = vpop.permute.xlu1 %1417 }
 0x2a8   : > { %7873 = vst [vmem:[#allocation148_spill] sm:$0xff] %v5677_v28  ;;  %v5679_v33 = vpop.permute.xlu0 %1421  ;;  %v672_v28 = vld [vmem:[#allocation2 + $0xca] sm:$0xff] }
 0x2a9   : > { %7874 = vst [vmem:[#allocation149_spill] sm:$0xff] %v5679_v33  ;;  %v674_v33 = vld [vmem:[#allocation2 + $0xe2] sm:$0xff] }
 0x2ac   : > { %1637 = vrot.lane.b32.xlu2 %v668_v1, %s4495_s6 }
 0x2ad   : > { %1635 = vrot.lane.b32.xlu1 %v667_v51, %s4495_s6 }
 0x2ae   : > { %1639 = vrot.lane.b32.xlu0 %v669_v46, %s4495_s6  ;;  %v5684_v53 = vpop.permute.xlu2 %1507 }
 0x2af   : > { %7875 = vst [vmem:[#allocation150_spill] sm:$0xff] %v5684_v53  ;;  %v5686_v23 = vpop.permute.xlu1 %1423  ;;  %v673_v53 = vld [vmem:[#allocation2 + $0xda] sm:$0xff] }
 0x2b0   : > { %7876 = vst [vmem:[#allocation151_spill] sm:$0xff] %v5686_v23  ;;  %v5688_v57 = vpop.permute.xlu0 %1491  ;;  %v675_v23 = vld [vmem:[#allocation2 + $0xf2] sm:$0xff] }
 0x2b4   : > { %1643 = vrot.lane.b32.xlu2 %v671_v13, %s4495_s6 }
 0x2b5   : > { %1641 = vrot.lane.b32.xlu1 %v670_v21, %s4495_s6 }
 0x2b6   : > { %1645 = vrot.lane.b32.xlu0 %v672_v28, %s4495_s6  ;;  %v5693_v1 = vpop.permute.xlu2 %1513 }
 0x2b7   : > { %7877 = vst [vmem:[#allocation152_spill] sm:$0xff] %v5693_v1  ;;  %v5695_v51 = vpop.permute.xlu1 %1493  ;;  %v677_v1 = vld [vmem:[#allocation2 + $0x10a] sm:$0xff] }
 0x2b8   : > { %v5697_v46 = vpop.permute.xlu0 %1497 }
 0x2bc   : > { %1649 = vrot.lane.b32.xlu2 %v674_v33, %s4495_s6 }
 0x2bd   : > { %1647 = vrot.lane.b32.xlu1 %v673_v53, %s4495_s6 }
 0x2be   : > { %1651 = vrot.lane.b32.xlu0 %v675_v23, %s4495_s6  ;;  %v5702_v13 = vpop.permute.xlu2 %1519  ;;  %v1981_v23 = vld [vmem:[%s7620_s1 + $0x20] sm:$0xf] }
 0x2bf   : > { %7878 = vst [vmem:[#allocation153_spill] sm:$0xff] %v5702_v13  ;;  %v5704_v21 = vpop.permute.xlu1 %1499  ;;  %3860 = vmatpush.msk.msra.mxu0 %vm2083_vm2, %v1981_v23  ;;  %3934 = vmatpush.msk.msra.mxu2 %vm2083_vm2, %v1981_v23 }
 0x2c0   : > { %v5706_v28 = vpop.permute.xlu0 %1503  ;;  %3933 = vmatpush.msk.msra.mxu1 %vm2083_vm2, %v1981_v23 }
 0x2c4   : > { %1655 = vrot.lane.b32.xlu2 %v677_v1, %s4495_s6  ;;  %v680_v1 = vld [vmem:[#allocation2 + $0x12a] sm:$0xff] }
 0x2c5   : > { %1653 = vrot.lane.b32.xlu1 %v676_v52, %s4495_s6  ;;  %v1979_v52 = vld [vmem:[%s7620_s1 + $0x10] sm:$0xff] }
 0x2c6   : > { %1657 = vrot.lane.b32.xlu0 %v678_v11, %s4495_s6  ;;  %v5711_v33 = vpop.permute.xlu2 %1525  ;;  %v1980_v11 = vld [vmem:[%s7620_s1 + $0x18] sm:$0xff] }
 0x2c7   : > { %7879 = vst [vmem:[#allocation154_spill] sm:$0xff] %v5711_v33  ;;  %v5713_v53 = vpop.permute.xlu1 %1505  ;;  %2099 = vmatpush.msra.mxu0 %v1980_v11  ;;  %3936 = vmatpush.msra.mxu2 %v1980_v11  ;;  %v681_v33 = vld [vmem:[#allocation2 + $0x13a] sm:$0xff] }
 0x2c8   : > { %7880 = vst [vmem:[#allocation155_spill] sm:$0xff] %v5713_v53  ;;  %v5718_v13 = vpop.permute.xlu0 %1509  ;;  %v679_v53 = vld [vmem:[#allocation2 + $0x122] sm:$0xff]  ;;  %3935 = vmatpush.msra.mxu1 %v1980_v11 }
 0x2c9   : > { %7881 = vst [vmem:[#allocation156_spill] sm:$0xff] %v5718_v13  ;;  %v1978_v13 = vld [vmem:[%s7620_s1 + $0x8] sm:$0xff]  ;;  %2100 = vmatpush.msra.mxu0 %v1979_v52  ;;  %3938 = vmatpush.msra.mxu2 %v1979_v52 }
 0x2ca   : > { %3937 = vmatpush.msra.mxu1 %v1979_v52 }
 0x2cb   : > { %2101 = vmatpush.msra.mxu0 %v1978_v13  ;;  %3940 = vmatpush.msra.mxu2 %v1978_v13 }
 0x2cc   : > { %1661 = vrot.lane.b32.xlu2 %v680_v1, %s4495_s6  ;;  %v7885_v1 = vmov 0.0   ;;  %3939 = vmatpush.msra.mxu1 %v1978_v13 }
 0x2cd   : > { %1659 = vrot.lane.b32.xlu1 %v679_v53, %s4495_s6  ;;  %2102 = vmatpush.msra.mxu0 %v1977_v20  ;;  %282 = vst.msk [vmem:[#allocation3] sm:$0xff] %vm281_vm3, %v7885_v1  ;;  %v683_v53 = vld [vmem:[#allocation2 + $0x152] sm:$0xff] }
 0x2ce   : > { %1663 = vrot.lane.b32.xlu0 %v681_v33, %s4495_s6  ;;  %v5735_v31 = vpop.permute.xlu2 %1531  ;;  %283 = vst.msk [vmem:[#allocation3 + $0x8] sm:$0xff] %vm281_vm3, %v7885_v1  ;;  %3942 = vmatpush.msra.mxu2 %v1977_v20  ;;  %v682_v33 = vld [vmem:[#allocation2 + $0x142] sm:$0xff] }
 0x2cf   : > { %7882 = vst [vmem:[#allocation157_spill] sm:$0xff] %v5735_v31  ;;  %v5737_v23 = vpop.permute.xlu1 %1511  ;;  %3941 = vmatpush.msra.mxu1 %v1977_v20 }
 0x2d0   : > { %7883 = vst [vmem:[#allocation158_spill] sm:$0xff] %v5737_v23  ;;  %v5742_v11 = vpop.permute.xlu0 %1515  ;;  %v684_v23 = vld [vmem:[#allocation2 + $0x15a] sm:$0xff] }
 0x2d1   : > { %7884 = vst [vmem:[#allocation159_spill] sm:$0xff] %v5742_v11 }
 0x2d2   : > { %286 = vst.msk [vmem:[#allocation3 + $0x18] sm:$0xff] %vm281_vm3, %v7885_v1 }
 0x2d3   : > { %287 = vst.msk [vmem:[#allocation3 + $0x20] sm:$0xff] %vm281_vm3, %v7885_v1 }
 0x2d4   : > { %1667 = vrot.lane.b32.xlu2 %v683_v53, %s4495_s6  ;;  %289 = vst.msk [vmem:[#allocation3 + $0x30] sm:$0xff] %vm281_vm3, %v7885_v1  ;;  %v686_v53 = vld [vmem:[#allocation2 + $0x172] sm:$0xff] }
 0x2d5   : > { %1665 = vrot.lane.b32.xlu1 %v682_v33, %s4495_s6  ;;  %290 = vst.msk [vmem:[#allocation3 + $0x38] sm:$0xff] %vm281_vm3, %v7885_v1 }
 0x2d6   : > { %1669 = vrot.lane.b32.xlu0 %v684_v23, %s4495_s6  ;;  %v5759_v13 = vpop.permute.xlu2 %1537  ;;  %292 = vst.msk [vmem:[#allocation3 + $0x48] sm:$0xff] %vm281_vm3, %v7885_v1  ;;  %v685_v23 = vld [vmem:[#allocation2 + $0x16a] sm:$0xff] }
 0x2d7   : > { %7886 = vst [vmem:[#allocation160_spill] sm:$0xff] %v5759_v13  ;;  %v5763_v52 = vpop.permute.xlu1 %1517 }
 0x2d8   : > { %7887 = vst [vmem:[#allocation161_spill] sm:$0xff] %v5763_v52  ;;  %v5767_v20 = vpop.permute.xlu0 %1521 }
 0x2d9   : > { %293 = vst.msk [vmem:[#allocation3 + $0x50] sm:$0xff] %vm281_vm3, %v7885_v1 }
 0x2da   : > { %295 = vst.msk [vmem:[#allocation3 + $0x60] sm:$0xff] %vm281_vm3, %v7885_v1 }
 0x2db   : > { %296 = vst.msk [vmem:[#allocation3 + $0x68] sm:$0xff] %vm281_vm3, %v7885_v1 }
 0x2dc   : > { %298 = vst.msk [vmem:[#allocation3 + $0x78] sm:$0xff] %vm281_vm3, %v7885_v1  ;;  %1673 = vrot.lane.b32.xlu2 %v686_v53, %s4495_s6 }
 0x2dd   : > { %299 = vst.msk [vmem:[#allocation3 + $0x80] sm:$0xff] %vm281_vm3, %v7885_v1  ;;  %1671 = vrot.lane.b32.xlu1 %v685_v23, %s4495_s6  ;;  %v689_v23 = vld [vmem:[#allocation2 + $0x19a] sm:$0xff] }
 0x2de   : > { %301 = vst.msk [vmem:[#allocation3 + $0x90] sm:$0xff] %vm281_vm3, %v7885_v1  ;;  %1675 = vrot.lane.b32.xlu0 %v5425_v7, %s4495_s6  ;;  %v5785_v33 = vpop.permute.xlu2 %1543  ;;  %v690_v7 = vld [vmem:[#allocation2 + $0x1a2] sm:$0xff] }
 0x2df   : > { %302 = vst.msk [vmem:[#allocation3 + $0x98] sm:$0xff] %vm281_vm3, %v7885_v1  ;;  %v5789_v52 = vpop.permute.xlu1 %1523 }
 0x2e0   : > { %7888 = vst [vmem:[#allocation162_spill] sm:$0xff] %v5785_v33  ;;  %v5793_v53 = vpop.permute.xlu0 %1527  ;;  %v402_v33 = vld [vmem:[#allocation2] sm:$0xff] }
 0x2e1   : > { %304 = vst.msk [vmem:[#allocation3 + $0xa8] sm:$0xff] %vm281_vm3, %v7885_v1 }
 0x2e2   : > { %305 = vst.msk [vmem:[#allocation3 + $0xb0] sm:$0xff] %vm281_vm3, %v7885_v1 }
 0x2e3   : > { %307 = vst.msk [vmem:[#allocation3 + $0xc0] sm:$0xff] %vm281_vm3, %v7885_v1 }
 0x2e4   : > { %308 = vst.msk [vmem:[#allocation3 + $0xc8] sm:$0xff] %vm281_vm3, %v7885_v1  ;;  %1679 = vrot.lane.b32.xlu2 %v689_v23, %s4495_s6  ;;  %v7891_v23 = vld [vmem:[#allocation6_spill] sm:$0xff] }
 0x2e5   : > { %310 = vst.msk [vmem:[#allocation3 + $0xd8] sm:$0xff] %vm281_vm3, %v7885_v1  ;;  %1677 = vrot.lane.b32.xlu1 %v5427_v0, %s4495_s6  ;;  %v1715_v31 = vsel %vm225_vm0, %v402_v33, %v7891_v23 }
 0x2e6   : > { %311 = vst.msk [vmem:[#allocation3 + $0xe0] sm:$0xff] %vm281_vm3, %v7885_v1  ;;  %1681 = vrot.lane.b32.xlu0 %v690_v7, %s4495_s6  ;;  %v5811_v11 = vpop.permute.xlu2 %1549  ;;  %v1748_v7 = vsel %vm1747_vm4, %v1715_v31, %v7893_v39 }
 0x2e7   : > { %313 = vst.msk [vmem:[#allocation3 + $0xf0] sm:$0xff] %vm281_vm3, %v7885_v1  ;;  %v5815_v13 = vpop.permute.xlu1 %1529 }
 0x2e8   : > { %314 = vst.msk [vmem:[#allocation3 + $0xf8] sm:$0xff] %vm281_vm3, %v7885_v1  ;;  %v5821_v0 = vpop.permute.xlu0 %1533 }
 0x2e9   : > { %7889 = vst [vmem:[#allocation163_spill] sm:$0xff] %v5811_v11  ;;  %v1781_v11 = vsel %vm1780_vm5, %v1748_v7, %v5225_v30 }
 0x2ea   : > { %316 = vst.msk [vmem:[#allocation3 + $0x108] sm:$0xff] %vm281_vm3, %v7885_v1  ;;  %v1814_v33 = vsel %vm1813_vm7, %v1781_v11, %v5351_v12 }
 0x2eb   : > { %7890 = vst [vmem:[#allocation164_spill] sm:$0xff] %v5815_v13  ;;  %v1847_v39 = vsel %vm1846_vm6, %v1814_v33, %v5445_v61 }
 0x2ec   : > { %317 = vst.msk [vmem:[#allocation3 + $0x110] sm:$0xff] %vm281_vm3, %v7885_v1  ;;  %v1880_v30 = vsel %vm1879_vm8, %v1847_v39, %v5594_v48  ;;  %v403_v39 = vld [vmem:[#allocation2 + $0x8] sm:$0xff] }
 0x2ed   : > { %7892 = vst [vmem:[#allocation6_spill] sm:$0xff] %v5821_v0  ;;  %v1913_v12 = vsel %vm1912_vm9, %v1880_v30, %v5688_v57 }
 0x2ee   : > { %319 = vst.msk [vmem:[#allocation3 + $0x120] sm:$0xff] %vm281_vm3, %v7885_v1  ;;  %v1620_v31 = vpop.permute.xlu2 %1619 }
 0x2ef   : > { %320 = vst.msk [vmem:[#allocation3 + $0x128] sm:$0xff] %vm281_vm3, %v7885_v1  ;;  %v5849_v61 = vpop.permute.xlu1 %1535  ;;  %v1945_v11 = vsel %vm281_vm3, %v1913_v12, %v1620_v31  ;;  %v7899_v31 = vld [vmem:[#allocation10_spill] sm:$0xff] }
 0x2f0   : > { %322 = vst.msk [vmem:[#allocation3 + $0x138] sm:$0xff] %vm281_vm3, %v7885_v1  ;;  %v5854_v48 = vpop.permute.xlu0 %1539  ;;  %3861 = vmatmul.msk.f32.vlgmr.msra.gmra.mxu0 %vm1986_vm10, %v1945_v11  ;;  %v1716_v11 = vsel %vm225_vm0, %v403_v39, %v7899_v31 }
 0x2f1   : > { %323 = vst.msk [vmem:[#allocation3 + $0x140] sm:$0xff] %vm281_vm3, %v7885_v1 }
 0x2f2   : > { %325 = vst.msk [vmem:[#allocation3 + $0x150] sm:$0xff] %vm281_vm3, %v7885_v1 }
 0x2f3   : > { %326 = vst.msk [vmem:[#allocation3 + $0x158] sm:$0xff] %vm281_vm3, %v7885_v1 }
 0x2f4   : > { %328 = vst.msk [vmem:[#allocation3 + $0x168] sm:$0xff] %vm281_vm3, %v7885_v1 }
 0x2f5   : > { %7894 = vst [vmem:[#allocation35_spill] sm:$0xff] %v5849_v61 }
 0x2f6   : > { %329 = vst.msk [vmem:[#allocation3 + $0x170] sm:$0xff] %vm281_vm3, %v7885_v1  ;;  %v1626_v57 = vpop.permute.xlu2 %1625 }
 0x2f7   : > { %7895 = vst [vmem:[#allocation165_spill] sm:$0xff] %v5854_v48  ;;  %v5865_v23 = vpop.permute.xlu1 %1541  ;;  %v7900_v48 = vld [vmem:[#allocation52_spill] sm:$0xff] }
 0x2f8   : > { %331 = vst.msk [vmem:[#allocation3 + $0x180] sm:$0xff] %vm281_vm3, %v7885_v1  ;;  %v5867_v7 = vpop.permute.xlu0 %1545  ;;  %v1749_v61 = vsel %vm1747_vm4, %v1716_v11, %v7900_v48 }
 0x2f9   : > { %332 = vst.msk [vmem:[#allocation3 + $0x188] sm:$0xff] %vm281_vm3, %v7885_v1 }
 0x2fa   : > { %334 = vst.msk [vmem:[#allocation3 + $0x198] sm:$0xff] %vm281_vm3, %v7885_v1 }
 0x2fb   : > { %335 = vst.msk [vmem:[#allocation3 + $0x1a0] sm:$0xff] %vm281_vm3, %v7885_v1  ;;  %v1782_v1 = vsel %vm1780_vm5, %v1749_v61, %v5187_v32  ;;  %v4449_v32 = vld [vmem:[#allocation2 + $0x18] sm:$0xff]  ;;  %v7901_v61 = vld [vmem:[#allocation8_spill] sm:$0xff] }
 0x2fc   : > { %7896 = vst [vmem:[#allocation166_spill] sm:$0xff] %v5865_v23  ;;  %v1815_v23 = vsel %vm1813_vm7, %v1782_v1, %v5361_v14  ;;  %v1717_v14 = vsel %vm225_vm0, %v4449_v32, %v7901_v61  ;;  %v7904_v61 = vld [vmem:[#allocation58_spill] sm:$0xff] }
 0x2fd   : > { %v1848_v0 = vsel %vm1846_vm6, %v1815_v23, %v5482_v35  ;;  %v7902_v35 = vld [vmem:[#allocation55_spill] sm:$0xff] }
 0x2fe   : > { %v5869_v33 = vpop.permute.xlu2 %1631  ;;  %v1750_v1 = vsel %vm1747_vm4, %v1717_v14, %v7902_v35  ;;  %v7905_v35 = vld [vmem:[#allocation12_spill] sm:$0xff] }
 0x2ff   : > { %v5871_v30 = vpop.permute.xlu1 %1547 }
 0x300   : > { %7897 = vst [vmem:[#allocation167_spill] sm:$0xff] %v5871_v30  ;;  %v5873_v12 = vpop.permute.xlu0 %1551 }
 0x301   : > { %7898 = vst [vmem:[#allocation168_spill] sm:$0xff] %v5873_v12  ;;  %v1881_v12 = vsel %vm1879_vm8, %v1848_v0, %v5565_v24  ;;  %v1783_v24 = vsel %vm1780_vm5, %v1750_v1, %v5227_v34 }
 0x302   : > { %v1914_v39 = vsel %vm1912_vm9, %v1881_v12, %v5695_v51  ;;  %v1816_v0 = vsel %vm1813_vm7, %v1783_v24, %v5323_v3  ;;  %v7906_v24 = vld [vmem:[#allocation40_spill] sm:$0xff] }
 0x303   : > { %v1849_v51 = vsel %vm1846_vm6, %v1816_v0, %v5491_v10  ;;  %v4451_v10 = vld [vmem:[#allocation2 + $0x20] sm:$0xff] }
 0x304   : > { %v1882_v12 = vsel %vm1879_vm8, %v1849_v51, %v5596_v43  ;;  %v1718_v1 = vsel %vm225_vm0, %v4451_v10, %v7905_v35  ;;  %v4453_v10 = vld [vmem:[#allocation2 + $0x30] sm:$0xff] }
 0x305   : > { %v1915_v32 = vsel %vm1912_vm9, %v1882_v12, %v5666_v60  ;;  %v1751_v0 = vsel %vm1747_vm4, %v1718_v1, %v7906_v24 }
 0x306   : > { %v5885_v13 = vpop.permute.xlu2 %1637  ;;  %v1784_v51 = vsel %vm1780_vm5, %v1751_v0, %v5237_v36 }
 0x307   : > { %v5889_v30 = vpop.permute.xlu1 %1553 }
 0x308   : > { %v1622_v48 = vpop.permute.xlu0 %1621 }
 0x309   : > { %v1946_v31 = vsel %vm281_vm3, %v1914_v39, %v1622_v48  ;;  %v4450_v39 = vld [vmem:[#allocation2 + $0xb0] sm:$0xff]  ;;  %v7903_v48 = vld [vmem:[#allocation23_spill] sm:$0xff] }
 0x30a   : > { %3862 = vmatmul.msk.f32.gmra.mxu0 %vm1986_vm10, %v1946_v31  ;;  %v1730_v31 = vsel %vm225_vm0, %v4450_v39, %v7903_v48 }
 0x30b   : > { %v1763_v3 = vsel %vm1747_vm4, %v1730_v31, %v7904_v61  ;;  %v7907_v61 = vld [vmem:[#allocation28_spill] sm:$0xff] }
 0x30c   : > { %v1796_v43 = vsel %vm1780_vm5, %v1763_v3, %v5285_v55 }
 0x30d   : > { %v1829_v60 = vsel %vm1813_vm7, %v1796_v43, %v5411_v16  ;;  %v7910_v43 = vld [vmem:[#allocation56_spill] sm:$0xff] }
 0x30e   : > { %v5905_v23 = vpop.permute.xlu2 %1643  ;;  %v1862_v12 = vsel %vm1846_vm6, %v1829_v60, %v5500_v2  ;;  %v4452_v2 = vld [vmem:[#allocation2 + $0xd8] sm:$0xff] }
 0x30f   : > { %v1624_v11 = vpop.permute.xlu1 %1623  ;;  %v1895_v55 = vsel %vm1879_vm8, %v1862_v12, %v5639_v49 }
 0x310   : > { %v1628_v34 = vpop.permute.xlu0 %1627  ;;  %v1947_v14 = vsel %vm281_vm3, %v1915_v32, %v1624_v11  ;;  %v1817_v11 = vsel %vm1813_vm7, %v1784_v51, %v5363_v18  ;;  %v1928_v48 = vsel %vm1912_vm9, %v1895_v55, %v5767_v20  ;;  %v1733_v18 = vsel %vm225_vm0, %v4452_v2, %v7907_v61 }
 0x311   : > { %v1850_v39 = vsel %vm1846_vm6, %v1817_v11, %v5456_v62  ;;  %v7908_v62 = vld [vmem:[#allocation63_spill] sm:$0xff] }
 0x312   : > { %3863 = vmatmul.msk.f32.gmra.mxu0 %vm1986_vm10, %v1947_v14  ;;  %v1883_v16 = vsel %vm1879_vm8, %v1850_v39, %v5603_v25  ;;  %v1766_v20 = vsel %vm1747_vm4, %v1733_v18, %v7908_v62  ;;  %v7909_v25 = vld [vmem:[#allocation4_spill] sm:$0xff]  ;;  %v7911_v39 = vld [vmem:[#allocation5_spill] sm:$0xff] }
 0x313   : > { %v1916_v49 = vsel %vm1912_vm9, %v1883_v16, %v5697_v46  ;;  %v1719_v35 = vsel %vm225_vm0, %v4453_v10, %v7909_v25  ;;  %v1799_v1 = vsel %vm1780_vm5, %v1766_v20, %v5299_v59  ;;  %v4455_v62 = vld [vmem:[#allocation2 + $0x48] sm:$0xff] }
 0x314   : > { %v1948_v14 = vsel %vm281_vm3, %v1916_v49, %v1626_v57  ;;  %v1752_v24 = vsel %vm1747_vm4, %v1719_v35, %v7910_v43  ;;  %v1832_v46 = vsel %vm1813_vm7, %v1799_v1, %v5423_v45  ;;  %v7913_v20 = vld [vmem:[#allocation13_spill] sm:$0xff]  ;;  %v7916_v35 = vld [vmem:[#allocation76_spill] sm:$0xff] }
 0x315   : > { %v1785_v0 = vsel %vm1780_vm5, %v1752_v24, %v5199_v4  ;;  %v1865_v57 = vsel %vm1846_vm6, %v1832_v46, %v5511_v58 }
 0x316   : > { %v1650_v31 = vpop.permute.xlu2 %1649  ;;  %v1818_v60 = vsel %vm1813_vm7, %v1785_v0, %v5373_v22  ;;  %v1898_v59 = vsel %vm1879_vm8, %v1865_v57, %v5650_v63 }
 0x317   : > { %v1630_v36 = vpop.permute.xlu1 %1629  ;;  %v5940_v32 = vsel %vm281_vm3, %v1928_v48, %v1650_v31  ;;  %v1851_v51 = vsel %vm1846_vm6, %v1818_v60, %v5493_v5  ;;  %v1931_v12 = vsel %vm1912_vm9, %v1898_v59, %v5793_v53  ;;  %v4454_v5 = vld [vmem:[#allocation2 + $0x38] sm:$0xff]  ;;  %v7917_v59 = vld [vmem:[#allocation42_spill] sm:$0xff] }
 0x318   : > { %v5946_v3 = vpop.permute.xlu0 %1633  ;;  %v1884_v45 = vsel %vm1879_vm8, %v1851_v51, %v5574_v17  ;;  %v1720_v53 = vsel %vm225_vm0, %v4454_v5, %v7911_v39  ;;  %v7912_v48 = vld [vmem:[#allocation59_spill] sm:$0xff]  ;;  %v4459_v5 = vld [vmem:[#allocation2 + $0x50] sm:$0xff] }
 0x319   : > { %v1917_v22 = vsel %vm1912_vm9, %v1884_v45, %v5704_v21  ;;  %v1753_v17 = vsel %vm1747_vm4, %v1720_v53, %v7912_v48  ;;  %v7919_v45 = vld [vmem:[#allocation78_spill] sm:$0xff]  ;;  %v7920_v39 = vld [vmem:[#allocation15_spill] sm:$0xff]  ;;  %v4460_v53 = vld [vmem:[#allocation2 + $0xe0] sm:$0xff] }
 0x31a   : > { %3864 = vmatmul.msk.f32.gmra.mxu0 %vm1986_vm10, %v1948_v14  ;;  %v1949_v63 = vsel %vm281_vm3, %v1917_v22, %v1628_v34  ;;  %v1786_v31 = vsel %vm1780_vm5, %v1753_v17, %v5239_v40  ;;  %v4456_v14 = vld [vmem:[#allocation2 + $0xc0] sm:$0xff]  ;;  %v7922_v17 = vld [vmem:[#allocation79_spill] sm:$0xff] }
 0x31b   : > { %v1819_v16 = vsel %vm1813_vm7, %v1786_v31, %v5335_v9  ;;  %v1721_v9 = vsel %vm225_vm0, %v4455_v62, %v7913_v20 }
 0x31c   : > { %v1852_v21 = vsel %vm1846_vm6, %v1819_v16, %v5502_v37  ;;  %v7914_v37 = vld [vmem:[#allocation27_spill] sm:$0xff] }
 0x31d   : > { %v1885_v34 = vsel %vm1879_vm8, %v1852_v21, %v5605_v15  ;;  %v1731_v10 = vsel %vm225_vm0, %v4456_v14, %v7914_v37  ;;  %v7915_v15 = vld [vmem:[#allocation45_spill] sm:$0xff] }
 0x31e   : > { %v1656_v11 = vpop.permute.xlu2 %1655  ;;  %v1918_v18 = vsel %vm1912_vm9, %v1885_v34, %v5675_v38  ;;  %v1754_v25 = vsel %vm1747_vm4, %v1721_v9, %v7915_v15  ;;  %v1764_v38 = vsel %vm1747_vm4, %v1731_v10, %v7916_v35  ;;  %v7924_v34 = vld [vmem:[#allocation80_spill] sm:$0xff]  ;;  %v7926_v37 = vld [vmem:[#allocation77_spill] sm:$0xff] }
 0x31f   : > { %v5974_v4 = vpop.permute.xlu1 %1635  ;;  %v5977_v58 = vsel %vm281_vm3, %v1931_v12, %v1656_v11  ;;  %v1950_v40 = vsel %vm281_vm3, %v1918_v18, %v1630_v36  ;;  %v1797_v1 = vsel %vm1780_vm5, %v1764_v38, %v5247_v41  ;;  %v1787_v36 = vsel %vm1780_vm5, %v1754_v25, %v5249_v42  ;;  %v4458_v12 = vld [vmem:[#allocation2 + $0xc8] sm:$0xff]  ;;  %v7918_v11 = vld [vmem:[#allocation14_spill] sm:$0xff]  ;;  %v7925_v9 = vld [vmem:[#allocation112_spill] sm:$0xff] }
 0x320   : > { %v5981_v55 = vpop.permute.xlu0 %1639  ;;  %v1820_v43 = vsel %vm1813_vm7, %v1787_v36, %v5375_v27  ;;  %v1830_v24 = vsel %vm1813_vm7, %v1797_v1, %v5421_v29  ;;  %v4457_v27 = vld [vmem:[#allocation2 + $0x140] sm:$0xff]  ;;  %v7927_v15 = vld [vmem:[#allocation113_spill] sm:$0xff] }
 0x321   : > { %v1853_v46 = vsel %vm1846_vm6, %v1820_v43, %v5467_v50  ;;  %v1863_v0 = vsel %vm1846_vm6, %v1830_v24, %v5539_v8  ;;  %v1742_v29 = vsel %vm225_vm0, %v4457_v27, %v7917_v59  ;;  %v7928_v35 = vld [vmem:[#allocation29_spill] sm:$0xff]  ;;  %v7930_v1 = vld [vmem:[#allocation148_spill] sm:$0xff]  ;;  %v7932_v43 = vld [vmem:[#allocation119_spill] sm:$0xff] }
 0x322   : > { %3865 = vmatmul.msk.f32.gmra.mxu0 %vm1986_vm10, %v1949_v63  ;;  %v1896_v41 = vsel %vm1879_vm8, %v1863_v0, %v5610_v26  ;;  %v1886_v42 = vsel %vm1879_vm8, %v1853_v46, %v5612_v44  ;;  %v1732_v26 = vsel %vm225_vm0, %v4458_v12, %v7918_v11  ;;  %v1775_v44 = vsel %vm1747_vm4, %v1742_v29, %v7919_v45  ;;  %v7929_v38 = vld [vmem:[#allocation81_spill] sm:$0xff]  ;;  %v7933_v46 = vld [vmem:[#allocation140_spill] sm:$0xff]  ;;  %v7934_v27 = vld [vmem:[#allocation127_spill] sm:$0xff] }
 0x323   : > { %v1919_v50 = vsel %vm1912_vm9, %v1886_v42, %v5706_v28  ;;  %v1929_v8 = vsel %vm1912_vm9, %v1896_v41, %v5789_v52  ;;  %v1722_v28 = vsel %vm225_vm0, %v4459_v5, %v7920_v39  ;;  %v7921_v52 = vld [vmem:[#allocation33_spill] sm:$0xff]  ;;  %v1765_v31 = vsel %vm1747_vm4, %v1732_v26, %v7922_v17  ;;  %v7937_v26 = vld [vmem:[#allocation155_spill] sm:$0xff]  ;;  %v4462_v17 = vld [vmem:[#allocation2 + $0xf0] sm:$0xff] }
 0x324   : > { %v1951_v22 = vsel %vm281_vm3, %v1919_v50, %v5869_v33  ;;  %v1734_v48 = vsel %vm225_vm0, %v4460_v53, %v7921_v52  ;;  %v1808_v16 = vsel %vm1780_vm5, %v1775_v44, %v5337_v6  ;;  %v7923_v33 = vld [vmem:[#allocation60_spill] sm:$0xff]  ;;  %v7931_v36 = vld [vmem:[#allocation57_spill] sm:$0xff]  ;;  %v7939_v52 = vld [vmem:[#allocation7_spill] sm:$0xff] }
 0x325   : > { %v1755_v21 = vsel %vm1747_vm4, %v1722_v28, %v7923_v33  ;;  %v1767_v18 = vsel %vm1747_vm4, %v1734_v48, %v7924_v34  ;;  %v1841_v62 = vsel %vm1813_vm7, %v1808_v16, %v5460_v54  ;;  %v7935_v29 = vld [vmem:[#allocation133_spill] sm:$0xff]  ;;  %v7938_v44 = vld [vmem:[#allocation164_spill] sm:$0xff]  ;;  %v7942_v34 = vld [vmem:[#allocation83_spill] sm:$0xff] }
 0x326   : > { %v5995_v2 = vpop.permute.xlu2 %1661  ;;  %v1788_v20 = vsel %vm1780_vm5, %v1755_v21, %v5211_v19  ;;  %v1800_v6 = vsel %vm1780_vm5, %v1767_v18, %v5259_v47  ;;  %v1874_v10 = vsel %vm1846_vm6, %v1841_v62, %v7926_v37  ;;  %v4461_v53 = vld [vmem:[#allocation2 + $0x60] sm:$0xff]  ;;  %v7943_v18 = vld [vmem:[#allocation93_spill] sm:$0xff] }
 0x327   : > { %v5999_v61 = vpop.permute.xlu1 %1641  ;;  %v1821_v25 = vsel %vm1813_vm7, %v1788_v20, %v7927_v15  ;;  %v1907_v19 = vsel %vm1879_vm8, %v1874_v10, %v7930_v1  ;;  %v1723_v48 = vsel %vm225_vm0, %v4461_v53, %v7939_v52  ;;  %v7941_v33 = vld [vmem:[#allocation64_spill] sm:$0xff]  ;;  %v7944_v62 = vld [vmem:[#allocation101_spill] sm:$0xff] }
 0x328   : > { %v6003_v49 = vpop.permute.xlu0 %1645  ;;  %v1854_v47 = vsel %vm1846_vm6, %v1821_v25, %v7931_v36  ;;  %v1940_v41 = vsel %vm1912_vm9, %v1907_v19, %v5867_v7  ;;  %v1756_v21 = vsel %vm1747_vm4, %v1723_v48, %v7941_v33  ;;  %v7947_v10 = vld [vmem:[#allocation61_spill] sm:$0xff]  ;;  %v7951_v36 = vld [vmem:[#allocation150_spill] sm:$0xff]  ;;  %v7961_v52 = vld [vmem:[#allocation48_spill] sm:$0xff] }
 0x329   : > { %v1887_v59 = vsel %vm1879_vm8, %v1854_v47, %v7934_v27  ;;  %v7948_v25 = vld [vmem:[#allocation121_spill] sm:$0xff]  ;;  %v7953_v27 = vld [vmem:[#allocation16_spill] sm:$0xff] }
 0x32a   : > { %3866 = vmatmul.msk.f32.gmra.mxu0 %vm1986_vm10, %v1950_v40  ;;  %v1798_v40 = vsel %vm1780_vm5, %v1765_v31, %v5287_v56  ;;  %v1833_v56 = vsel %vm1813_vm7, %v1800_v6, %v7928_v35  ;;  %v1920_v45 = vsel %vm1912_vm9, %v1887_v59, %v7937_v26  ;;  %v7940_v31 = vld [vmem:[#allocation17_spill] sm:$0xff]  ;;  %v7945_v6 = vld [vmem:[#allocation108_spill] sm:$0xff]  ;;  %v7957_v26 = vld [vmem:[#allocation94_spill] sm:$0xff] }
 0x32b   : > { %v1831_v14 = vsel %vm1813_vm7, %v1798_v40, %v7925_v9  ;;  %v1866_v24 = vsel %vm1846_vm6, %v1833_v56, %v7932_v43  ;;  %v1952_v39 = vsel %vm281_vm3, %v1920_v45, %v5946_v3  ;;  %v1735_v16 = vsel %vm225_vm0, %v4462_v17, %v7940_v31  ;;  %v7949_v56 = vld [vmem:[#allocation132_spill] sm:$0xff]  ;;  %v7952_v43 = vld [vmem:[#allocation157_spill] sm:$0xff]  ;;  %v7962_v17 = vld [vmem:[#allocation66_spill] sm:$0xff] }
 0x32c   : > { %v1864_v54 = vsel %vm1846_vm6, %v1831_v14, %v7929_v38  ;;  %v1899_v50 = vsel %vm1879_vm8, %v1866_v24, %v7935_v29  ;;  %v1768_v3 = vsel %vm1747_vm4, %v1735_v16, %v7942_v34  ;;  %v1789_v40 = vsel %vm1780_vm5, %v1756_v21, %v7943_v18  ;;  %v7946_v14 = vld [vmem:[#allocation115_spill] sm:$0xff]  ;;  %v7963_v16 = vld [vmem:[#allocation134_spill] sm:$0xff]  ;;  %v7964_v21 = vld [vmem:[#allocation144_spill] sm:$0xff] }
 0x32d   : > { %v1897_v0 = vsel %vm1879_vm8, %v1864_v54, %v7933_v46  ;;  %v1801_v20 = vsel %vm1780_vm5, %v1768_v3, %v7944_v62  ;;  %v1822_v9 = vsel %vm1813_vm7, %v1789_v40, %v7945_v6  ;;  %v7950_v54 = vld [vmem:[#allocation142_spill] sm:$0xff]  ;;  %v4464_v29 = vld [vmem:[#allocation2 + $0xf8] sm:$0xff]  ;;  %v7965_v18 = vld [vmem:[#allocation156_spill] sm:$0xff] }
 0x32e   : > { %v6027_v57 = vpop.permute.xlu2 %1667  ;;  %v1834_v37 = vsel %vm1813_vm7, %v1801_v20, %v7946_v14  ;;  %v1855_v15 = vsel %vm1846_vm6, %v1822_v9, %v7947_v10  ;;  %v7966_v62 = vld [vmem:[#allocation6_spill] sm:$0xff] }
 0x32f   : > { %v6033_v60 = vpop.permute.xlu1 %1647  ;;  %v1867_v35 = vsel %vm1846_vm6, %v1834_v37, %v7948_v25  ;;  %v1888_v38 = vsel %vm1879_vm8, %v1855_v15, %v7949_v56  ;;  %v4465_v37 = vld [vmem:[#allocation2 + $0x78] sm:$0xff]  ;;  %v7967_v10 = vld [vmem:[#allocation18_spill] sm:$0xff]  ;;  %v4466_v25 = vld [vmem:[#allocation2 + $0x108] sm:$0xff] }
 0x330   : > { %v1652_v51 = vpop.permute.xlu0 %1651  ;;  %v1900_v1 = vsel %vm1879_vm8, %v1867_v35, %v7950_v54  ;;  %v1921_v47 = vsel %vm1912_vm9, %v1888_v38, %v7951_v36  ;;  %v1725_v15 = vsel %vm225_vm0, %v4465_v37, %v7967_v10  ;;  %v7968_v35 = vld [vmem:[#allocation36_spill] sm:$0xff]  ;;  %v4467_v38 = vld [vmem:[#allocation2 + $0x150] sm:$0xff]  ;;  %v7988_v10 = vld [vmem:[#allocation9_spill] sm:$0xff] }
 0x331   : > { %v6048_v63 = vsel %vm281_vm3, %v1929_v8, %v1652_v51  ;;  %v7936_v8 = vld [vmem:[#allocation154_spill] sm:$0xff]  ;;  %v1933_v24 = vsel %vm1912_vm9, %v1900_v1, %v7952_v43  ;;  %v1737_v56 = vsel %vm225_vm0, %v4466_v25, %v7968_v35  ;;  %v4468_v37 = vld [vmem:[#allocation2 + $0x80] sm:$0xff]  ;;  %v7989_v35 = vld [vmem:[#allocation21_spill] sm:$0xff] }
 0x332   : > { %3867 = vmatmul.msk.f32.gmra.mxu0 %vm1986_vm10, %v1951_v22  ;;  %v1930_v51 = vsel %vm1912_vm9, %v1897_v0, %v7936_v8  ;;  %v1932_v22 = vsel %vm1912_vm9, %v1899_v50, %v7938_v44  ;;  %v1953_v0 = vsel %vm281_vm3, %v1921_v47, %v5974_v4  ;;  %v7954_v50 = vld [vmem:[#allocation34_spill] sm:$0xff]  ;;  %v7958_v44 = vld [vmem:[#allocation103_spill] sm:$0xff]  ;;  %v7972_v47 = vld [vmem:[#allocation88_spill] sm:$0xff] }
 0x333   : > { %v1736_v8 = vsel %vm225_vm0, %v4464_v29, %v7954_v50  ;;  %v7969_v54 = vld [vmem:[#allocation46_spill] sm:$0xff]  ;;  %v7976_v29 = vld [vmem:[#allocation116_spill] sm:$0xff] }
 0x334   : > { %v1743_v1 = vsel %vm225_vm0, %v4467_v38, %v7969_v54  ;;  %v4469_v25 = vld [vmem:[#allocation2 + $0x110] sm:$0xff]  ;;  %v4470_v38 = vld [vmem:[#allocation2 + $0x158] sm:$0xff]  ;;  %v7990_v54 = vld [vmem:[#allocation32_spill] sm:$0xff] }
 0x335   : > { %v1776_v43 = vsel %vm1747_vm4, %v1743_v1, %v7972_v47  ;;  %v7991_v1 = vld [vmem:[#allocation69_spill] sm:$0xff]  ;;  %v7994_v47 = vld [vmem:[#allocation95_spill] sm:$0xff] }
 0x336   : > { %v1674_v42 = vpop.permute.xlu2 %1673 }
 0x337   : > { %v1654_v12 = vpop.permute.xlu1 %1653  ;;  %v1972_v11 = vsel %vm281_vm3, %v1940_v41, %v1674_v42  ;;  %v4463_v42 = vld [vmem:[#allocation2 + $0x68] sm:$0xff] }
 0x338   : > { %v1658_v7 = vpop.permute.xlu0 %1657  ;;  %3888 = vmatmul.msk.f32.vlgmr.msra.gmra.mxu2 %vm1986_vm10, %v1972_v11  ;;  %v6104_v5 = vsel %vm281_vm3, %v1930_v51, %v1654_v12  ;;  %v1724_v59 = vsel %vm225_vm0, %v4463_v42, %v7953_v27  ;;  %v7955_v51 = vld [vmem:[#allocation50_spill] sm:$0xff]  ;;  %v7956_v11 = vld [vmem:[#allocation68_spill] sm:$0xff] }
 0x339   : > { %v1964_v28 = vsel %vm281_vm3, %v1932_v22, %v1658_v7  ;;  %v1757_v12 = vsel %vm1747_vm4, %v1724_v59, %v7955_v51  ;;  %v1769_v4 = vsel %vm1747_vm4, %v1736_v8, %v7956_v11  ;;  %v7959_v7 = vld [vmem:[#allocation114_spill] sm:$0xff]  ;;  %v7975_v27 = vld [vmem:[#allocation100_spill] sm:$0xff] }
 0x33a   : > { %3868 = vmatmul.msk.f32.gmra.mxu0 %vm1986_vm10, %v1952_v39  ;;  %3880 = vmatmul.msk.f32.vlgmr.msra.gmra.mxu1 %vm1986_vm10, %v1964_v28  ;;  %v1790_v45 = vsel %vm1780_vm5, %v1757_v12, %v7957_v26  ;;  %v1802_v22 = vsel %vm1780_vm5, %v1769_v4, %v7958_v44  ;;  %v7960_v28 = vld [vmem:[#allocation31_spill] sm:$0xff]  ;;  %v1809_v59 = vsel %vm1780_vm5, %v1776_v43, %v7975_v27  ;;  %v7977_v8 = vld [vmem:[#allocation38_spill] sm:$0xff] }
 0x33b   : > { %v1823_v39 = vsel %vm1813_vm7, %v1790_v45, %v7959_v7  ;;  %v1835_v53 = vsel %vm1813_vm7, %v1802_v22, %v7960_v28  ;;  %v7978_v12 = vld [vmem:[#allocation43_spill] sm:$0xff]  ;;  %v7979_v4 = vld [vmem:[#allocation62_spill] sm:$0xff] }
 0x33c   : > { %v1856_v48 = vsel %vm1846_vm6, %v1823_v39, %v7961_v52  ;;  %v1868_v31 = vsel %vm1846_vm6, %v1835_v53, %v7962_v17  ;;  %v1842_v11 = vsel %vm1813_vm7, %v1809_v59, %v7978_v12  ;;  %v7980_v45 = vld [vmem:[#allocation122_spill] sm:$0xff]  ;;  %v7983_v53 = vld [vmem:[#allocation136_spill] sm:$0xff] }
 0x33d   : > { %v1889_v33 = vsel %vm1879_vm8, %v1856_v48, %v7963_v16  ;;  %v1901_v34 = vsel %vm1879_vm8, %v1868_v31, %v7964_v21  ;;  %v7981_v22 = vld [vmem:[#allocation126_spill] sm:$0xff]  ;;  %v7984_v48 = vld [vmem:[#allocation141_spill] sm:$0xff]  ;;  %v7986_v21 = vld [vmem:[#allocation35_spill] sm:$0xff] }
 0x33e   : > { %v1922_v40 = vsel %vm1912_vm9, %v1889_v33, %v7965_v18  ;;  %v1934_v20 = vsel %vm1912_vm9, %v1901_v34, %v7966_v62  ;;  %v1875_v7 = vsel %vm1846_vm6, %v1842_v11, %v7981_v22  ;;  %v7982_v39 = vld [vmem:[#allocation130_spill] sm:$0xff]  ;;  %v7987_v18 = vld [vmem:[#allocation167_spill] sm:$0xff]  ;;  %v8000_v12 = vld [vmem:[#allocation72_spill] sm:$0xff] }
 0x33f   : > { %v1660_v19 = vpop.permute.xlu1 %1659  ;;  %v1954_v9 = vsel %vm281_vm3, %v1922_v40, %v5885_v13  ;;  %v1966_v14 = vsel %vm281_vm3, %v1934_v20, %v5995_v2  ;;  %v7970_v13 = vld [vmem:[#allocation65_spill] sm:$0xff]  ;;  %v7971_v2 = vld [vmem:[#allocation84_spill] sm:$0xff]  ;;  %v1908_v17 = vsel %vm1879_vm8, %v1875_v7, %v7984_v48  ;;  %v7985_v16 = vld [vmem:[#allocation158_spill] sm:$0xff] }
 0x340   : > { %v1664_v46 = vpop.permute.xlu0 %1663  ;;  %v1965_v41 = vsel %vm281_vm3, %v1933_v24, %v1660_v19  ;;  %v1758_v19 = vsel %vm1747_vm4, %v1725_v15, %v7970_v13  ;;  %v1770_v36 = vsel %vm1747_vm4, %v1737_v56, %v7971_v2  ;;  %v7973_v24 = vld [vmem:[#allocation91_spill] sm:$0xff]  ;;  %v1941_v40 = vsel %vm1912_vm9, %v1908_v17, %v7987_v18  ;;  %v7992_v13 = vld [vmem:[#allocation85_spill] sm:$0xff]  ;;  %v7997_v27 = vld [vmem:[#allocation110_spill] sm:$0xff] }
 0x341   : > { %v1726_v15 = vsel %vm225_vm0, %v4468_v37, %v7988_v10  ;;  %v1738_v56 = vsel %vm225_vm0, %v4469_v25, %v7989_v35  ;;  %v7993_v2 = vld [vmem:[#allocation89_spill] sm:$0xff]  ;;  %v8003_v22 = vld [vmem:[#allocation135_spill] sm:$0xff]  ;;  %v8006_v17 = vld [vmem:[#allocation152_spill] sm:$0xff] }
 0x342   : > { %3869 = vmatmul.msk.f32.gmra.mxu0 %vm1986_vm10, %v1953_v0  ;;  %3881 = vmatmul.msk.f32.gmra.mxu1 %vm1986_vm10, %v1965_v41  ;;  %v1791_v0 = vsel %vm1780_vm5, %v1758_v19, %v7973_v24  ;;  %v7974_v41 = vld [vmem:[#allocation96_spill] sm:$0xff]  ;;  %v1771_v19 = vsel %vm1747_vm4, %v1738_v56, %v7992_v13  ;;  %v8010_v10 = vld [vmem:[#allocation37_spill] sm:$0xff]  ;;  %v8011_v56 = vld [vmem:[#allocation47_spill] sm:$0xff] }
 0x343   : > { %v1803_v42 = vsel %vm1780_vm5, %v1770_v36, %v7974_v41  ;;  %v1824_v50 = vsel %vm1813_vm7, %v1791_v0, %v7976_v29  ;;  %v7995_v24 = vld [vmem:[#allocation104_spill] sm:$0xff]  ;;  %v7996_v41 = vld [vmem:[#allocation107_spill] sm:$0xff]  ;;  %v4473_v35 = vld [vmem:[#allocation2 + $0x168] sm:$0xff] }
 0x344   : > { %v1836_v51 = vsel %vm1813_vm7, %v1803_v42, %v7977_v8  ;;  %v1857_v26 = vsel %vm1846_vm6, %v1824_v50, %v7979_v4  ;;  %v1804_v0 = vsel %vm1780_vm5, %v1771_v19, %v7995_v24  ;;  %v7998_v29 = vld [vmem:[#allocation20_spill] sm:$0xff]  ;;  %v7999_v8 = vld [vmem:[#allocation25_spill] sm:$0xff]  ;;  %v8001_v4 = vld [vmem:[#allocation123_spill] sm:$0xff] }
 0x345   : > { %v1869_v44 = vsel %vm1846_vm6, %v1836_v51, %v7980_v45  ;;  %v1890_v28 = vsel %vm1879_vm8, %v1857_v26, %v7982_v39  ;;  %v1837_v50 = vsel %vm1813_vm7, %v1804_v0, %v7998_v29  ;;  %v8002_v45 = vld [vmem:[#allocation128_spill] sm:$0xff]  ;;  %v8004_v39 = vld [vmem:[#allocation145_spill] sm:$0xff] }
 0x346   : > { %v1902_v52 = vsel %vm1879_vm8, %v1869_v44, %v7983_v53  ;;  %v1923_v33 = vsel %vm1912_vm9, %v1890_v28, %v7985_v16  ;;  %v1870_v26 = vsel %vm1846_vm6, %v1837_v50, %v8001_v4  ;;  %v4472_v37 = vld [vmem:[#allocation2 + $0x120] sm:$0xff]  ;;  %v8015_v13 = vld [vmem:[#allocation97_spill] sm:$0xff] }
 0x347   : > { %v6168_v3 = vpop.permute.xlu1 %1665  ;;  %v1935_v34 = vsel %vm1912_vm9, %v1902_v52, %v7986_v21  ;;  %v1955_v20 = vsel %vm281_vm3, %v1923_v33, %v5981_v55  ;;  %v1744_v55 = vsel %vm225_vm0, %v4470_v38, %v7990_v54  ;;  %v1903_v28 = vsel %vm1879_vm8, %v1870_v26, %v8004_v39  ;;  %v8005_v52 = vld [vmem:[#allocation149_spill] sm:$0xff]  ;;  %v8007_v33 = vld [vmem:[#allocation160_spill] sm:$0xff]  ;;  %v8012_v38 = vld [vmem:[#allocation54_spill] sm:$0xff] }
 0x348   : > { %v6174_v6 = vpop.permute.xlu0 %1669  ;;  %v1777_v36 = vsel %vm1747_vm4, %v1744_v55, %v7993_v2  ;;  %v1936_v21 = vsel %vm1912_vm9, %v1903_v28, %v8007_v33  ;;  %v8013_v54 = vld [vmem:[#allocation74_spill] sm:$0xff]  ;;  %v8016_v2 = vld [vmem:[#allocation105_spill] sm:$0xff]  ;;  %v8027_v28 = vld [vmem:[#allocation159_spill] sm:$0xff] }
 0x349   : > { %v1810_v42 = vsel %vm1780_vm5, %v1777_v36, %v7996_v41  ;;  %v8018_v24 = vld [vmem:[#allocation117_spill] sm:$0xff]  ;;  %v8019_v41 = vld [vmem:[#allocation118_spill] sm:$0xff] }
 0x34a   : > { %3870 = vmatmul.msk.f32.gmra.mxu0 %vm1986_vm10, %v1954_v9  ;;  %3882 = vmatmul.msk.f32.gmra.mxu1 %vm1986_vm10, %v1966_v14  ;;  %v1967_v9 = vsel %vm281_vm3, %v1935_v34, %v1664_v46  ;;  %v1759_v46 = vsel %vm1747_vm4, %v1726_v15, %v7991_v1  ;;  %v1843_v51 = vsel %vm1813_vm7, %v1810_v42, %v7999_v8  ;;  %v8008_v34 = vld [vmem:[#allocation163_spill] sm:$0xff]  ;;  %v8014_v1 = vld [vmem:[#allocation82_spill] sm:$0xff]  ;;  %v8021_v29 = vld [vmem:[#allocation53_spill] sm:$0xff] }
 0x34b   : > { %v1792_v43 = vsel %vm1780_vm5, %v1759_v46, %v7994_v47  ;;  %v1876_v44 = vsel %vm1846_vm6, %v1843_v51, %v8002_v45  ;;  %v1739_v15 = vsel %vm225_vm0, %v4472_v37, %v8010_v10  ;;  %v8017_v47 = vld [vmem:[#allocation109_spill] sm:$0xff]  ;;  %v8022_v8 = vld [vmem:[#allocation71_spill] sm:$0xff]  ;;  %v8025_v45 = vld [vmem:[#allocation146_spill] sm:$0xff] }
 0x34c   : > { %v1825_v59 = vsel %vm1813_vm7, %v1792_v43, %v7997_v27  ;;  %v1909_v48 = vsel %vm1879_vm8, %v1876_v44, %v8005_v52  ;;  %v1772_v55 = vsel %vm1747_vm4, %v1739_v15, %v8013_v54  ;;  %v8020_v27 = vld [vmem:[#allocation44_spill] sm:$0xff]  ;;  %v8024_v4 = vld [vmem:[#allocation137_spill] sm:$0xff]  ;;  %v4476_v37 = vld [vmem:[#allocation2 + $0x170] sm:$0xff] }
 0x34d   : > { %v1858_v11 = vsel %vm1846_vm6, %v1825_v59, %v8000_v12  ;;  %v1942_v18 = vsel %vm1912_vm9, %v1909_v48, %v8008_v34  ;;  %v1805_v36 = vsel %vm1780_vm5, %v1772_v55, %v8016_v2  ;;  %v8023_v12 = vld [vmem:[#allocation120_spill] sm:$0xff]  ;;  %v8028_v52 = vld [vmem:[#allocation165_spill] sm:$0xff]  ;;  %v4474_v34 = vld [vmem:[#allocation2 + $0x98] sm:$0xff] }
 0x34e   : > { %v1891_v7 = vsel %vm1879_vm8, %v1858_v11, %v8003_v22  ;;  %v1838_v42 = vsel %vm1813_vm7, %v1805_v36, %v8019_v41  ;;  %v1680_v22 = vpop.permute.xlu2 %1679  ;;  %v8038_v55 = vld [vmem:[#allocation99_spill] sm:$0xff] }
 0x34f   : > { %v6218_v31 = vpop.permute.xlu1 %1671  ;;  %v1924_v16 = vsel %vm1912_vm9, %v1891_v7, %v8006_v17  ;;  %v1871_v51 = vsel %vm1846_vm6, %v1838_v42, %v8022_v8  ;;  %v8026_v7 = vld [vmem:[#allocation151_spill] sm:$0xff]  ;;  %v8029_v17 = vld [vmem:[#allocation168_spill] sm:$0xff] }
 0x350   : > { %v1676_v62 = vpop.permute.xlu0 %1675  ;;  %v1904_v44 = vsel %vm1879_vm8, %v1871_v51, %v8025_v45  ;;  %v8041_v36 = vld [vmem:[#allocation39_spill] sm:$0xff]  ;;  %v8044_v42 = vld [vmem:[#allocation124_spill] sm:$0xff]  ;;  %v8049_v45 = vld [vmem:[#allocation161_spill] sm:$0xff] }
 0x351   : > { %v1973_v14 = vsel %vm281_vm3, %v1941_v40, %v1676_v62  ;;  %v1956_v40 = vsel %vm281_vm3, %v1924_v16, %v5999_v61  ;;  %v1968_v62 = vsel %vm281_vm3, %v1936_v21, %v6168_v3  ;;  %v1745_v61 = vsel %vm225_vm0, %v4473_v35, %v8011_v56  ;;  %v8047_v51 = vld [vmem:[#allocation139_spill] sm:$0xff] }
 0x352   : > { %3871 = vmatmul.msk.f32.gmra.mxu0 %vm1986_vm10, %v1955_v20  ;;  %3883 = vmatmul.msk.f32.gmra.mxu1 %vm1986_vm10, %v1967_v9  ;;  %v4471_v20 = vld [vmem:[#allocation2 + $0x90] sm:$0xff]  ;;  %v8009_v9 = vld [vmem:[#allocation19_spill] sm:$0xff]  ;;  %v1778_v46 = vsel %vm1747_vm4, %v1745_v61, %v8014_v1  ;;  %v1937_v48 = vsel %vm1912_vm9, %v1904_v44, %v8028_v52  ;;  %v8035_v56 = vmov 0.0   ;;  %v4477_v52 = vld [vmem:[#allocation2 + $0xa8] sm:$0xff] }
 0x353   : > { %3889 = vmatmul.msk.f32.gmra.mxu2 %vm1986_vm10, %v1973_v14  ;;  %v1727_v14 = vsel %vm225_vm0, %v4471_v20, %v8009_v9  ;;  %v1811_v43 = vsel %vm1780_vm5, %v1778_v46, %v8017_v47  ;;  %v1969_v21 = vsel %vm281_vm3, %v1937_v48, %v6027_v57  ;;  %v8031_v20 = vld [vmem:[#allocation41_spill] sm:$0xff]  ;;  %v8033_v57 = vld [vmem:[#allocation70_spill] sm:$0xff]  ;;  %288 = vst.msk [vmem:[#allocation3 + $0x28] sm:$0x3] %vm284_vm11, %v8035_v56  ;;  %v8051_v48 = vld [vmem:[#allocation11_spill] sm:$0xff] }
 0x354   : > { %v1760_v3 = vsel %vm1747_vm4, %v1727_v14, %v8012_v38  ;;  %v1844_v59 = vsel %vm1813_vm7, %v1811_v43, %v8020_v27  ;;  %v8036_v61 = vld [vmem:[#allocation90_spill] sm:$0xff]  ;;  %285 = vst.msk [vmem:[#allocation3 + $0x10] sm:$0x3] %vm284_vm11, %v8035_v56  ;;  %v8042_v43 = vld [vmem:[#allocation49_spill] sm:$0xff] }
 0x355   : > { %v1793_v19 = vsel %vm1780_vm5, %v1760_v3, %v8015_v13  ;;  %v1877_v11 = vsel %vm1846_vm6, %v1844_v59, %v8023_v12  ;;  %v8037_v3 = vld [vmem:[#allocation92_spill] sm:$0xff]  ;;  %v8039_v46 = vld [vmem:[#allocation102_spill] sm:$0xff]  ;;  %291 = vst.msk [vmem:[#allocation3 + $0x40] sm:$0x3] %vm284_vm11, %v8035_v56  ;;  %v8045_v59 = vld [vmem:[#allocation129_spill] sm:$0xff] }
 0x356   : > { %v1826_v0 = vsel %vm1813_vm7, %v1793_v19, %v8018_v24  ;;  %v1910_v39 = vsel %vm1879_vm8, %v1877_v11, %v8026_v7  ;;  %v8040_v19 = vld [vmem:[#allocation24_spill] sm:$0xff]  ;;  %294 = vst.msk [vmem:[#allocation3 + $0x58] sm:$0x3] %vm284_vm11, %v8035_v56 }
 0x357   : > { %v1678_v53 = vpop.permute.xlu1 %1677  ;;  %v1859_v50 = vsel %vm1846_vm6, %v1826_v0, %v8021_v29  ;;  %v1943_v16 = vsel %vm1912_vm9, %v1910_v39, %v8029_v17  ;;  %v8043_v0 = vld [vmem:[#allocation67_spill] sm:$0xff]  ;;  %297 = vst.msk [vmem:[#allocation3 + $0x70] sm:$0x3] %vm284_vm11, %v8035_v56  ;;  %v1729_v17 = vsel %vm225_vm0, %v4477_v52, %v8051_v48 }
 0x358   : > { %v1974_v25 = vsel %vm281_vm3, %v1942_v18, %v1678_v53  ;;  %v1892_v26 = vsel %vm1879_vm8, %v1859_v50, %v8024_v4  ;;  %v8030_v18 = vld [vmem:[#allocation22_spill] sm:$0xff]  ;;  %v1975_v14 = vsel %vm281_vm3, %v1943_v16, %v1680_v22  ;;  %v8046_v50 = vld [vmem:[#allocation131_spill] sm:$0xff]  ;;  %v1682_v11 = vpop.permute.xlu0 %1681  ;;  %300 = vst.msk [vmem:[#allocation3 + $0x88] sm:$0x3] %vm284_vm11, %v8035_v56 }
 0x359   : > { %v1925_v53 = vsel %vm1912_vm9, %v1892_v26, %v8027_v28  ;;  %v8048_v4 = vld [vmem:[#allocation143_spill] sm:$0xff]  ;;  %v8050_v22 = vld [vmem:[#allocation166_spill] sm:$0xff]  ;;  %303 = vst.msk [vmem:[#allocation3 + $0xa0] sm:$0x3] %vm284_vm11, %v8035_v56 }
 0x35a   : > { %3872 = vmatmul.msk.f32.gmra.mxu0 %vm1986_vm10, %v1956_v40  ;;  %3884 = vmatmul.msk.f32.gmra.mxu1 %vm1986_vm10, %v1968_v62  ;;  %v1957_v33 = vsel %vm281_vm3, %v1925_v53, %v5905_v23  ;;  %v1728_v40 = vsel %vm225_vm0, %v4474_v34, %v8030_v18  ;;  %v4475_v62 = vld [vmem:[#allocation2 + $0x128] sm:$0xff]  ;;  %v8032_v23 = vld [vmem:[#allocation51_spill] sm:$0xff]  ;;  %306 = vst.msk [vmem:[#allocation3 + $0xb8] sm:$0x3] %vm284_vm11, %v8035_v56 }
 0x35b   : > { %3890 = vmatmul.msk.f32.gmra.mxu2 %vm1986_vm10, %v1974_v25  ;;  %v1740_v9 = vsel %vm225_vm0, %v4475_v62, %v8031_v20  ;;  %v1746_v10 = vsel %vm225_vm0, %v4476_v37, %v8032_v23  ;;  %v1761_v15 = vsel %vm1747_vm4, %v1728_v40, %v8033_v57  ;;  %v8034_v25 = vld [vmem:[#allocation86_spill] sm:$0xff]  ;;  %v4478_v16 = vld [vmem:[#allocation2 + $0x138] sm:$0xff]  ;;  %309 = vst.msk [vmem:[#allocation3 + $0xd0] sm:$0x3] %vm284_vm11, %v8035_v56 }
 0x35c   : > { %v1773_v35 = vsel %vm1747_vm4, %v1740_v9, %v8034_v25  ;;  %v1779_v38 = vsel %vm1747_vm4, %v1746_v10, %v8036_v61  ;;  %v1794_v54 = vsel %vm1780_vm5, %v1761_v15, %v8037_v3  ;;  %v8054_v18 = vld [vmem:[#allocation87_spill] sm:$0xff]  ;;  %v8055_v62 = vld [vmem:[#allocation98_spill] sm:$0xff]  ;;  %312 = vst.msk [vmem:[#allocation3 + $0xe8] sm:$0x3] %vm284_vm11, %v8035_v56  ;;  %v8059_v25 = vld [vmem:[#allocation73_spill] sm:$0xff] }
 0x35d   : > { %v1806_v1 = vsel %vm1780_vm5, %v1773_v35, %v8038_v55  ;;  %v1812_v13 = vsel %vm1780_vm5, %v1779_v38, %v8039_v46  ;;  %v1827_v2 = vsel %vm1813_vm7, %v1794_v54, %v8040_v19  ;;  %v8056_v9 = vld [vmem:[#allocation106_spill] sm:$0xff]  ;;  %v8057_v37 = vld [vmem:[#allocation111_spill] sm:$0xff]  ;;  %315 = vst.msk [vmem:[#allocation3 + $0x100] sm:$0x3] %vm284_vm11, %v8035_v56  ;;  %v8060_v61 = vld [vmem:[#allocation125_spill] sm:$0xff] }
 0x35e   : > { %v1839_v47 = vsel %vm1813_vm7, %v1806_v1, %v8041_v36  ;;  %v1845_v24 = vsel %vm1813_vm7, %v1812_v13, %v8042_v43  ;;  %v1860_v41 = vsel %vm1846_vm6, %v1827_v2, %v8043_v0  ;;  %v8058_v10 = vld [vmem:[#allocation30_spill] sm:$0xff]  ;;  %318 = vst.msk [vmem:[#allocation3 + $0x118] sm:$0x3] %vm284_vm11, %v8035_v56  ;;  %v8062_v1 = vld [vmem:[#allocation147_spill] sm:$0xff]  ;;  %v8063_v13 = vld [vmem:[#allocation153_spill] sm:$0xff] }
 0x35f   : > { %v1872_v27 = vsel %vm1846_vm6, %v1839_v47, %v8044_v42  ;;  %v1878_v29 = vsel %vm1846_vm6, %v1845_v24, %v8045_v59  ;;  %v1893_v8 = vsel %vm1879_vm8, %v1860_v41, %v8046_v50  ;;  %v8061_v54 = vld [vmem:[#allocation138_spill] sm:$0xff]  ;;  %321 = vst.msk [vmem:[#allocation3 + $0x130] sm:$0x3] %vm284_vm11, %v8035_v56  ;;  %v2298_v42 = vld [vmem:[#allocation3 + $0x9] sm:$0xff] }
 0x360   : > { %v1905_v12 = vsel %vm1879_vm8, %v1872_v27, %v8047_v51  ;;  %v1911_v26 = vsel %vm1879_vm8, %v1878_v29, %v8048_v4  ;;  %v1926_v44 = vsel %vm1912_vm9, %v1893_v8, %v8049_v45  ;;  %v8064_v2 = vld [vmem:[#allocation162_spill] sm:$0xff]  ;;  %324 = vst.msk [vmem:[#allocation3 + $0x148] sm:$0x3] %vm284_vm11, %v8035_v56 }
 0x361   : > { %v1938_v7 = vsel %vm1912_vm9, %v1905_v12, %v8050_v22  ;;  %v1944_v39 = vsel %vm1912_vm9, %v1911_v26, %v5889_v30  ;;  %v1958_v28 = vsel %vm281_vm3, %v1926_v44, %v6003_v49  ;;  %v6403_v49 = vld [vmem:[%s7621_s2] ss:$0 sm:$0xff]  ;;  %327 = vst.msk [vmem:[#allocation3 + $0x160] sm:$0x3] %vm284_vm11, %v8035_v56 }
 0x362   : > { %3873 = vmatmul.msk.f32.gmra.mxu0 %vm1986_vm10, %v1957_v33  ;;  %3885 = vmatmul.msk.f32.gmra.mxu1 %vm1986_vm10, %v1969_v21  ;;  %v1970_v53 = vsel %vm281_vm3, %v1938_v7, %v6174_v6  ;;  %v8052_v33 = vld [vmem:[#allocation26_spill] sm:$0xff]  ;;  %v1976_v30 = vsel %vm281_vm3, %v1944_v39, %v1682_v11  ;;  %v8053_v6 = vld [vmem:[#allocation75_spill] sm:$0xff]  ;;  %330 = vst.msk [vmem:[#allocation3 + $0x178] sm:$0x3] %vm284_vm11, %v8035_v56 }
 0x363   : > { %3891 = vmatmul.msk.f32.gmra.mxu2 %vm1986_vm10, %v1975_v14  ;;  %v1741_v21 = vsel %vm225_vm0, %v4478_v16, %v8052_v33  ;;  %v1762_v34 = vsel %vm1747_vm4, %v1729_v17, %v8053_v6  ;;  %333 = vst.msk [vmem:[#allocation3 + $0x190] sm:$0x3] %vm284_vm11, %v8035_v56  ;;  %v2297_v41 = vld [vmem:[#allocation3 + $0x1] sm:$0xff] }
 0x364   : > { %v1774_v40 = vsel %vm1747_vm4, %v1741_v21, %v8054_v18  ;;  %v1795_v20 = vsel %vm1780_vm5, %v1762_v34, %v8055_v62  ;;  %336 = vst.msk [vmem:[#allocation3 + $0x1a8] sm:$0x3] %vm284_vm11, %v8035_v56  ;;  %v3963_v27 = vpack.i.bf16 %v2298_v42, %v2297_v41 }
 0x365   : > { %v1807_v14 = vsel %vm1780_vm5, %v1774_v40, %v8056_v9  ;;  %v1828_v23 = vsel %vm1813_vm7, %v1795_v20, %v8057_v37 }
 0x366   : > { %v1840_v57 = vsel %vm1813_vm7, %v1807_v14, %v8058_v10  ;;  %v1861_v35 = vsel %vm1846_vm6, %v1828_v23, %v8059_v25  ;;  %3964 = vrot.lane.b32.xlu1 %v3963_v27, %s4495_s6 }
 0x367   : > { %v1873_v38 = vsel %vm1846_vm6, %v1840_v57, %v8060_v61  ;;  %v1894_v55 = vsel %vm1879_vm8, %v1861_v35, %v8061_v54 }
 0x368   : > { %v1906_v46 = vsel %vm1879_vm8, %v1873_v38, %v8062_v1  ;;  %v1927_v19 = vsel %vm1912_vm9, %v1894_v55, %v8063_v13 }
 0x369   : > { %v1939_v36 = vsel %vm1912_vm9, %v1906_v46, %v8064_v2  ;;  %v1959_v43 = vsel %vm281_vm3, %v1927_v19, %v6033_v60 }
 0x36a   : > { %3874 = vmatmul.msk.f32.gmra.mxu0 %vm1986_vm10, %v1958_v28  ;;  %3886 = vmatmul.msk.f32.gmra.mxu1 %vm1986_vm10, %v1970_v53  ;;  %v1971_v24 = vsel %vm281_vm3, %v1939_v36, %v6218_v31 }
 0x36b   : > { %3892 = vmatmul.msk.f32.gmra.mxu2 %vm1986_vm10, %v1976_v30 }
 0x36d   : > { %v2104_v15 = vpop.f32.mrf.mxu0 }
 0x36e   : > { %v2105_v3 = vadd.f32 %v6403_v49, %v2104_v15 }
 0x370   : > { %v2200_v47 = vmax.f32 %v2105_v3, 0.0 }
 0x372   : > { %2233 = vst.msk [vmem:[#allocation3 + $0x19] sm:$0xff] %vm281_vm3, %v2200_v47  ;;  %3875 = vmatmul.msk.f32.gmra.mxu0 %vm1986_vm10, %v1959_v43  ;;  %3887 = vmatmul.msk.f32.gmra.mxu1 %vm1986_vm10, %v1971_v24 }
 0x37a   : > { %3876 = vmatmul.msk.f32.gmra.mxu0 %vm1986_vm10, %v5940_v32 }
 0x382   : > { %3877 = vmatmul.msk.f32.gmra.mxu0 %vm1986_vm10, %v6048_v63  ;;  %v2299_v63 = vld [vmem:[#allocation3 + $0x19] sm:$0xff] }
 0x387   : > { %v2107_v60 = vpop.f32.mrf.mxu0 }
 0x388   : > { %v2108_v31 = vadd.f32 %v6403_v49, %v2107_v60 }
 0x38a   : > { %v2201_v0 = vmax.f32 %v2108_v31, 0.0  ;;  %3878 = vmatmul.msk.f32.gmra.mxu0 %vm1986_vm10, %v6104_v5 }
 0x38c   : > { %2234 = vst.msk [vmem:[#allocation3 + $0x21] sm:$0xff] %vm281_vm3, %v2201_v0 }
 0x38f   : > { %v2110_v59 = vpop.f32.mrf.mxu0 }
 0x390   : > { %v2111_v32 = vadd.f32 %v6403_v49, %v2110_v59 }
 0x392   : > { %v2202_v56 = vmax.f32 %v2111_v32, 0.0  ;;  %3879 = vmatmul.msk.f32.gmra.mxu0 %vm1986_vm10, %v5977_v58 }
 0x393   : > { %v2300_v29 = vld [vmem:[#allocation3 + $0x21] sm:$0xff] }
 0x394   : > { %2235 = vst.msk [vmem:[#allocation3 + $0x31] sm:$0xff] %vm281_vm3, %v2202_v56  ;;  %v3968_v50 = vpack.i.bf16 %v2300_v29, %v2299_v63 }
 0x396   : > { %3969 = vrot.lane.b32.xlu2 %v3968_v50, %s4495_s6 }
 0x397   : > { %v2113_v5 = vpop.f32.mrf.mxu0 }
 0x398   : > { %v2114_v8 = vadd.f32 %v6403_v49, %v2113_v5 }
 0x39a   : > { %v2203_v51 = vmax.f32 %v2114_v8, 0.0 }
 0x39b   : > { %v2301_v26 = vld [vmem:[#allocation3 + $0x31] sm:$0xff] }
 0x39c   : > { %2236 = vst.msk [vmem:[#allocation3 + $0x39] sm:$0xff] %vm281_vm3, %v2203_v51  ;;  %v6498_v1 = vld [vmem:[#allocation3 + $0x30] sm:$0xff] }
 0x39d   : > { %8065 = vst [vmem:[#allocation10_spill] sm:$0xff] %v6498_v1 }
 0x39f   : > { %v2116_v12 = vpop.f32.mrf.mxu0 }
 0x3a0   : > { %v2117_v11 = vadd.f32 %v6403_v49, %v2116_v12 }
 0x3a2   : > { %v2204_v4 = vmax.f32 %v2117_v11, 0.0 }
 0x3a3   : > { %v2302_v45 = vld [vmem:[#allocation3 + $0x39] sm:$0xff] }
 0x3a4   : > { %2237 = vst.msk [vmem:[#allocation3 + $0x49] sm:$0xff] %vm281_vm3, %v2204_v4  ;;  %v3973_v58 = vpack.i.bf16 %v2302_v45, %v2301_v26 }
 0x3a6   : > { %3974 = vrot.lane.b32.xlu0 %v3973_v58, %s4495_s6 }
 0x3a7   : > { %v2119_v44 = vpop.f32.mrf.mxu0 }
 0x3a8   : > { %v2120_v22 = vadd.f32 %v6403_v49, %v2119_v44 }
 0x3aa   : > { %v2205_v7 = vmax.f32 %v2120_v22, 0.0 }
 0x3ab   : > { %v2303_v52 = vld [vmem:[#allocation3 + $0x49] sm:$0xff] }
 0x3ac   : > { %2238 = vst.msk [vmem:[#allocation3 + $0x51] sm:$0xff] %vm281_vm3, %v2205_v7 }
 0x3af   : > { %v2122_v39 = vpop.f32.mrf.mxu0 }
 0x3b0   : > { %v2123_v28 = vadd.f32 %v6403_v49, %v2122_v39 }
 0x3b2   : > { %v2206_v53 = vmax.f32 %v2123_v28, 0.0 }
 0x3b3   : > { %v2304_v48 = vld [vmem:[#allocation3 + $0x51] sm:$0xff] }
 0x3b4   : > { %2239 = vst.msk [vmem:[#allocation3 + $0x61] sm:$0xff] %vm281_vm3, %v2206_v53  ;;  %v3978_v17 = vpack.i.bf16 %v2304_v48, %v2303_v52 }
 0x3b6   : > { %3979 = vrot.lane.b32.xlu1 %v3978_v17, %s4495_s6 }
 0x3b7   : > { %v2125_v16 = vpop.f32.mrf.mxu0  ;;  %v2161_v33 = vpop.f32.mrf.mxu1 }
 0x3b8   : > { %v2126_v21 = vadd.f32 %v6403_v49, %v2125_v16  ;;  %v2162_v30 = vadd.f32 %v6403_v49, %v2161_v33 }
 0x3ba   : > { %v2207_v6 = vmax.f32 %v2126_v21, 0.0  ;;  %v2219_v34 = vmax.f32 %v2162_v30, 0.0 }
 0x3bb   : > { %v2185_v18 = vpop.f32.mrf.mxu2  ;;  %v2305_v57 = vld [vmem:[#allocation3 + $0x61] sm:$0xff] }
 0x3bc   : > { %2240 = vst.msk [vmem:[#allocation3 + $0x69] sm:$0xff] %vm281_vm3, %v2207_v6  ;;  %v2186_v40 = vadd.f32 %v6403_v49, %v2185_v18 }
 0x3bd   : > { %2252 = vst.msk [vmem:[#allocation3 + $0xf9] sm:$0xff] %vm281_vm3, %v2219_v34 }
 0x3be   : > { %v2227_v62 = vmax.f32 %v2186_v40, 0.0 }
 0x3bf   : > { %v2128_v20 = vpop.f32.mrf.mxu0  ;;  %v2164_v9 = vpop.f32.mrf.mxu1 }
 0x3c0   : > { %2260 = vst.msk [vmem:[#allocation3 + $0x159] sm:$0xff] %vm281_vm3, %v2227_v62  ;;  %v2129_v14 = vadd.f32 %v6403_v49, %v2128_v20  ;;  %v2165_v37 = vadd.f32 %v6403_v49, %v2164_v9 }
 0x3c2   : > { %v2208_v23 = vmax.f32 %v2129_v14, 0.0  ;;  %v2220_v10 = vmax.f32 %v2165_v37, 0.0 }
 0x3c3   : > { %v2306_v15 = vld [vmem:[#allocation3 + $0x69] sm:$0xff] }
 0x3c4   : > { %2241 = vst.msk [vmem:[#allocation3 + $0x79] sm:$0xff] %vm281_vm3, %v2208_v23  ;;  %v3983_v25 = vpack.i.bf16 %v2306_v15, %v2305_v57 }
 0x3c5   : > { %2253 = vst.msk [vmem:[#allocation3 + $0x109] sm:$0xff] %vm281_vm3, %v2220_v10 }
 0x3c6   : > { %3984 = vrot.lane.b32.xlu2 %v3983_v25, %s4495_s6 }
 0x3c7   : > { %v2131_v35 = vpop.f32.mrf.mxu0  ;;  %v2167_v61 = vpop.f32.mrf.mxu1  ;;  %v6511_v0 = vld [vmem:[#allocation3 + $0x159] sm:$0xff] }
 0x3c8   : > { %v2132_v38 = vadd.f32 %v6403_v49, %v2131_v35  ;;  %v2168_v3 = vadd.f32 %v6403_v49, %v2167_v61  ;;  %8069 = vst [vmem:[#allocation23_spill] sm:$0xff] %v6511_v0 }
 0x3ca   : > { %v2209_v54 = vmax.f32 %v2132_v38, 0.0  ;;  %v2221_v55 = vmax.f32 %v2168_v3, 0.0 }
 0x3cb   : > { %v6507_v60 = vld [vmem:[#allocation3 + $0x79] sm:$0xff] }
 0x3cc   : > { %2242 = vst.msk [vmem:[#allocation3 + $0x81] sm:$0xff] %vm281_vm3, %v2209_v54  ;;  %v6500_v46 = vld [vmem:[#allocation3 + $0x108] sm:$0xff] }
 0x3cd   : > { %8066 = vst [vmem:[#allocation52_spill] sm:$0xff] %v6500_v46 }
 0x3ce   : > { %2254 = vst.msk [vmem:[#allocation3 + $0x111] sm:$0xff] %vm281_vm3, %v2221_v55 }
 0x3cf   : > { %v2134_v19 = vpop.f32.mrf.mxu0  ;;  %v2170_v2 = vpop.f32.mrf.mxu1  ;;  %8067 = vst [vmem:[#allocation8_spill] sm:$0xff] %v6507_v60 }
 0x3d0   : > { %v2135_v36 = vadd.f32 %v6403_v49, %v2134_v19  ;;  %v2171_v47 = vadd.f32 %v6403_v49, %v2170_v2  ;;  %v6782_v2 = vld [vmem:[#allocation3 + $0x48] sm:$0xff] }
 0x3d2   : > { %v2210_v43 = vmax.f32 %v2135_v36, 0.0  ;;  %v2222_v24 = vmax.f32 %v2171_v47, 0.0 }
 0x3d3   : > { %v6509_v31 = vld [vmem:[#allocation3 + $0x81] sm:$0xff] }
 0x3d4   : > { %8068 = vst [vmem:[#allocation55_spill] sm:$0xff] %v6509_v31  ;;  %v3988_v41 = vpack.i.bf16 %v6509_v31, %v6507_v60  ;;  %v6780_v13 = vld [vmem:[#allocation3 + $0x80] sm:$0xff] }
 0x3d5   : > { %2243 = vst.msk [vmem:[#allocation3 + $0x91] sm:$0xff] %vm281_vm3, %v2210_v43 }
 0x3d6   : > { %2255 = vst.msk [vmem:[#allocation3 + $0x121] sm:$0xff] %vm281_vm3, %v2222_v24  ;;  %v2188_v27 = vpop.f32.mrf.mxu2  ;;  %3989 = vrot.lane.b32.xlu0 %v3988_v41, %s4495_s6 }
 0x3d7   : > { %v2189_v59 = vadd.f32 %v6403_v49, %v2188_v27  ;;  %v2137_v32 = vpop.f32.mrf.mxu0  ;;  %v2173_v56 = vpop.f32.mrf.mxu1  ;;  %8087 = vst [vmem:[#allocation33_spill] sm:$0xff] %v6780_v13 }
 0x3d8   : > { %v2138_v63 = vadd.f32 %v6403_v49, %v2137_v32  ;;  %v2174_v29 = vadd.f32 %v6403_v49, %v2173_v56 }
 0x3d9   : > { %v2228_v50 = vmax.f32 %v2189_v59, 0.0 }
 0x3da   : > { %v2211_v5 = vmax.f32 %v2138_v63, 0.0  ;;  %v2223_v8 = vmax.f32 %v2174_v29, 0.0 }
 0x3db   : > { %2261 = vst.msk [vmem:[#allocation3 + $0x169] sm:$0xff] %vm281_vm3, %v2228_v50  ;;  %v2320_v50 = vld [vmem:[#allocation3 + $0x111] sm:$0xff] }
 0x3dc   : > { %2244 = vst.msk [vmem:[#allocation3 + $0x99] sm:$0xff] %vm281_vm3, %v2211_v5  ;;  %v6529_v7 = vld [vmem:[#allocation3 + $0x91] sm:$0xff] }
 0x3dd   : > { %2256 = vst.msk [vmem:[#allocation3 + $0x129] sm:$0xff] %vm281_vm3, %v2223_v8  ;;  %v2319_v8 = vld [vmem:[#allocation3 + $0x109] sm:$0xff] }
 0x3de   : > { %v2191_v51 = vpop.f32.mrf.mxu2 }
 0x3df   : > { %v2192_v12 = vadd.f32 %v6403_v49, %v2191_v51  ;;  %v2140_v11 = vpop.f32.mrf.mxu0  ;;  %v2176_v4 = vpop.f32.mrf.mxu1  ;;  %v4018_v51 = vpack.i.bf16 %v2320_v50, %v2319_v8  ;;  %v6672_v8 = vld [vmem:[#allocation3 + $0x4a] sm:$0xff] }
 0x3e0   : > { %v2141_v26 = vadd.f32 %v6403_v49, %v2140_v11  ;;  %v2177_v45 = vadd.f32 %v6403_v49, %v2176_v4 }
 0x3e1   : > { %v2229_v58 = vmax.f32 %v2192_v12, 0.0 }
 0x3e2   : > { %v2212_v44 = vmax.f32 %v2141_v26, 0.0  ;;  %v2224_v22 = vmax.f32 %v2177_v45, 0.0  ;;  %v6531_v39 = vld [vmem:[#allocation3 + $0x169] sm:$0xff] }
 0x3e3   : > { %2262 = vst.msk [vmem:[#allocation3 + $0x171] sm:$0xff] %vm281_vm3, %v2229_v58  ;;  %v6534_v28 = vld [vmem:[#allocation3 + $0x99] sm:$0xff] }
 0x3e4   : > { %2245 = vst.msk [vmem:[#allocation3 + $0xa9] sm:$0xff] %vm281_vm3, %v2212_v44  ;;  %v3993_v52 = vpack.i.bf16 %v6534_v28, %v6529_v7  ;;  %v6803_v62 = vld [vmem:[#allocation3 + $0x98] sm:$0xff] }
 0x3e5   : > { %2257 = vst.msk [vmem:[#allocation3 + $0x139] sm:$0xff] %vm281_vm3, %v2224_v22 }
 0x3e6   : > { %v2194_v48 = vpop.f32.mrf.mxu2  ;;  %3994 = vrot.lane.b32.xlu1 %v3993_v52, %s4495_s6 }
 0x3e7   : > { %v2195_v17 = vadd.f32 %v6403_v49, %v2194_v48  ;;  %v2143_v16 = vpop.f32.mrf.mxu0  ;;  %v2179_v33 = vpop.f32.mrf.mxu1  ;;  %v2322_v48 = vld [vmem:[#allocation3 + $0x129] sm:$0xff] }
 0x3e8   : > { %v2144_v21 = vadd.f32 %v6403_v49, %v2143_v16  ;;  %v2180_v30 = vadd.f32 %v6403_v49, %v2179_v33  ;;  %v2318_v16 = vld [vmem:[#allocation3 + $0xf9] sm:$0xff]  ;;  %v2321_v33 = vld [vmem:[#allocation3 + $0x121] sm:$0xff] }
 0x3e9   : > { %v2230_v6 = vmax.f32 %v2195_v17, 0.0  ;;  %v2331_v17 = vld [vmem:[#allocation3 + $0x1a] sm:$0xff] }
 0x3ea   : > { %v2213_v34 = vmax.f32 %v2144_v21, 0.0  ;;  %v2225_v18 = vmax.f32 %v2180_v30, 0.0  ;;  %v6546_v40 = vld [vmem:[#allocation3 + $0x171] sm:$0xff]  ;;  %v2332_v21 = vld [vmem:[#allocation3 + $0x22] sm:$0xff] }
 0x3eb   : > { %2263 = vst.msk [vmem:[#allocation3 + $0x181] sm:$0xff] %vm281_vm3, %v2230_v6  ;;  %v6557_v35 = vld [vmem:[#allocation3 + $0xa9] sm:$0xff] }
 0x3ec   : > { %2246 = vst.msk [vmem:[#allocation3 + $0xb1] sm:$0xff] %vm281_vm3, %v2213_v34 }
 0x3ed   : > { %2258 = vst.msk [vmem:[#allocation3 + $0x141] sm:$0xff] %vm281_vm3, %v2225_v18 }
 0x3ee   : > { %v2197_v20 = vpop.f32.mrf.mxu2 }
 0x3ef   : > { %v2198_v9 = vadd.f32 %v6403_v49, %v2197_v20  ;;  %v2146_v14 = vpop.f32.mrf.mxu0  ;;  %v2182_v37 = vpop.f32.mrf.mxu1  ;;  %v4023_v20 = vpack.i.bf16 %v2322_v48, %v2321_v33  ;;  %v6688_v48 = vld [vmem:[#allocation3 + $0xfa] sm:$0xff] }
 0x3f0   : > { %v2147_v23 = vadd.f32 %v6403_v49, %v2146_v14  ;;  %v2183_v10 = vadd.f32 %v6403_v49, %v2182_v37  ;;  %v6620_v14 = vpack.i.bf16 %v2332_v21, %v2331_v17  ;;  %8079 = vst [vmem:[#allocation13_spill] sm:$0xff] %v6688_v48  ;;  %v6778_v37 = vld [vmem:[#allocation3 + $0x50] sm:$0xff]  ;;  %v6799_v53 = vpop.permute.xlu2 %3969 }
 0x3f1   : > { %v2231_v57 = vmax.f32 %v2198_v9, 0.0 }
 0x3f2   : > { %v2214_v15 = vmax.f32 %v2147_v23, 0.0  ;;  %v2226_v25 = vmax.f32 %v2183_v10, 0.0  ;;  %v6632_v10 = vld [vmem:[#allocation3 + $0x62] sm:$0xff] }
 0x3f3   : > { %2264 = vst.msk [vmem:[#allocation3 + $0x189] sm:$0xff] %vm281_vm3, %v2231_v57  ;;  %v6559_v61 = vld [vmem:[#allocation3 + $0xb1] sm:$0xff] }
 0x3f4   : > { %2247 = vst.msk [vmem:[#allocation3 + $0xc1] sm:$0xff] %vm281_vm3, %v2214_v15  ;;  %v3998_v38 = vpack.i.bf16 %v6559_v61, %v6557_v35  ;;  %v6573_v24 = vld [vmem:[#allocation3 + $0xb2] sm:$0xff]  ;;  %v6630_v23 = vld [vmem:[#allocation3 + $0x141] sm:$0xff]  ;;  %v6634_v57 = vld [vmem:[#allocation3 + $0x6a] sm:$0xff] }
 0x3f5   : > { %2259 = vst.msk [vmem:[#allocation3 + $0x151] sm:$0xff] %vm281_vm3, %v2226_v25  ;;  %v6636_v15 = vld [vmem:[#allocation3 + $0x139] sm:$0xff]  ;;  %v6699_v33 = vld [vmem:[#allocation3 + $0x142] sm:$0xff] }
 0x3f6   : > { %3999 = vrot.lane.b32.xlu2 %v3998_v38, %s4495_s6  ;;  %8073 = vst [vmem:[#allocation28_spill] sm:$0xff] %v6630_v23  ;;  %v4028_v25 = vpack.i.bf16 %v6630_v23, %v6636_v15  ;;  %v4038_v38 = vpack.i.bf16 %v6546_v40, %v6531_v39  ;;  %v6807_v56 = vld [vmem:[#allocation3 + $0x140] sm:$0xff] }
 0x3f7   : > { %v2149_v3 = vpop.f32.mrf.mxu0  ;;  %8074 = vst [vmem:[#allocation63_spill] sm:$0xff] %v6632_v10 }
 0x3f8   : > { %v2150_v54 = vadd.f32 %v6403_v49, %v2149_v3  ;;  %8075 = vst [vmem:[#allocation4_spill] sm:$0xff] %v6634_v57  ;;  %v4063_v3 = vpack.i.bf16 %v6634_v57, %v6632_v10 }
 0x3f9   : > { %8076 = vst [vmem:[#allocation56_spill] sm:$0xff] %v6636_v15 }
 0x3fa   : > { %v2215_v55 = vmax.f32 %v2150_v54, 0.0  ;;  %v6649_v54 = vld [vmem:[#allocation3 + $0xaa] sm:$0xff]  ;;  %8081 = vst [vmem:[#allocation45_spill] sm:$0xff] %v6699_v33  ;;  %v6786_v42 = vld [vmem:[#allocation3 + $0x182] sm:$0xff] }
 0x3fb   : > { %v6575_v41 = vld [vmem:[#allocation3 + $0xc1] sm:$0xff]  ;;  %v4078_v50 = vpack.i.bf16 %v6573_v24, %v6649_v54  ;;  %8088 = vst [vmem:[#allocation79_spill] sm:$0xff] %v6807_v56 }
 0x3fc   : > { %2248 = vst.msk [vmem:[#allocation3 + $0xc9] sm:$0xff] %vm281_vm3, %v2215_v55  ;;  %v6568_v19 = vld [vmem:[#allocation3 + $0x151] sm:$0xff]  ;;  %v2329_v55 = vld [vmem:[#allocation3 + $0x2] sm:$0xff] }
 0x3fd   : > { %8070 = vst [vmem:[#allocation58_spill] sm:$0xff] %v6568_v19  ;;  %v4033_v22 = vpack.i.bf16 %v6511_v0, %v6568_v19  ;;  %v6834_v60 = vld [vmem:[#allocation3 + $0x188] sm:$0xff]  ;;  %v6857_v0 = vld [vmem:[#allocation3 + $0x158] sm:$0xff] }
 0x3ff   : > { %v2152_v36 = vpop.f32.mrf.mxu0 }
 0x400   : > { %v2153_v47 = vadd.f32 %v6403_v49, %v2152_v36  ;;  %v2330_v36 = vld [vmem:[#allocation3 + $0xa] sm:$0xff] }
 0x402   : > { %v2216_v43 = vmax.f32 %v2153_v47, 0.0  ;;  %v6653_v47 = vld [vmem:[#allocation3 + $0x32] sm:$0xff] }
 0x403   : > { %v6577_v27 = vld [vmem:[#allocation3 + $0xc9] sm:$0xff] }
 0x404   : > { %v6579_v59 = vld [vmem:[#allocation3 + $0xc2] sm:$0xff]  ;;  %2249 = vst.msk [vmem:[#allocation3 + $0xd9] sm:$0xff] %vm281_vm3, %v2216_v43  ;;  %v4003_v32 = vpack.i.bf16 %v6577_v27, %v6575_v41  ;;  %v6612_v30 = vld [vmem:[#allocation3 + $0xca] sm:$0xff]  ;;  %v2334_v43 = vld [vmem:[#allocation3 + $0x3a] sm:$0xff] }
 0x406   : > { %4004 = vrot.lane.b32.xlu0 %v4003_v32, %s4495_s6  ;;  %v4043_v32 = vpack.i.bf16 %v2330_v36, %v2329_v55  ;;  %v2361_v36 = vld [vmem:[#allocation3 + $0x18] sm:$0xff] }
 0x407   : > { %v2155_v63 = vpop.f32.mrf.mxu0 }
 0x408   : > { %v2156_v29 = vadd.f32 %v6403_v49, %v2155_v63  ;;  %v6655_v63 = vld [vmem:[#allocation3 + $0x9a] sm:$0xff] }
 0x40a   : > { %v2217_v5 = vmax.f32 %v2156_v29, 0.0  ;;  %v6660_v29 = vpack.i.bf16 %v2334_v43, %v6653_v47 }
 0x40b   : > { %v6593_v45 = vld [vmem:[#allocation3 + $0xd9] sm:$0xff] }
 0x40c   : > { %2250 = vst.msk [vmem:[#allocation3 + $0xe1] sm:$0xff] %vm281_vm3, %v2217_v5  ;;  %v6668_v5 = vld [vmem:[#allocation3 + $0x92] sm:$0xff] }
 0x40d   : > { %v4073_v21 = vpack.i.bf16 %v6655_v63, %v6668_v5  ;;  %v2377_v19 = vld [vmem:[#allocation3 + $0xd8] sm:$0xff] }
 0x40e   : > { %4019 = vrot.lane.b32.xlu0 %v4018_v51, %s4495_s6  ;;  %v6674_v51 = vld [vmem:[#allocation3 + $0x82] sm:$0xff] }
 0x40f   : > { %v2158_v12 = vpop.f32.mrf.mxu0 }
 0x410   : > { %v2159_v11 = vadd.f32 %v6403_v49, %v2158_v12  ;;  %v6676_v12 = vld [vmem:[#allocation3 + $0x52] sm:$0xff]  ;;  %v6805_v49 = vld [vmem:[#allocation3 + $0xc8] sm:$0xff] }
 0x411   : > { %8077 = vst [vmem:[#allocation5_spill] sm:$0xff] %v6676_v12 }
 0x412   : > { %v2218_v4 = vmax.f32 %v2159_v11, 0.0  ;;  %v6678_v11 = vld [vmem:[#allocation3 + $0x7a] sm:$0xff] }
 0x413   : > { %v6591_v26 = vld [vmem:[#allocation3 + $0xe2] sm:$0xff]  ;;  %v6608_v52 = vld [vmem:[#allocation3 + $0xda] sm:$0xff] }
 0x414   : > { %v6595_v58 = vld [vmem:[#allocation3 + $0xe1] sm:$0xff]  ;;  %2251 = vst.msk [vmem:[#allocation3 + $0xf1] sm:$0xff] %vm281_vm3, %v2218_v4  ;;  %3893 = vmatpush.xpose.msk.msra.mxu3 %vm281_vm3, %v6591_v26 }
 0x415   : > { %v4008_v44 = vpack.i.bf16 %v6595_v58, %v6593_v45 }
 0x416   : > { %4034 = vrot.lane.b32.xlu0 %v4033_v22, %s4495_s6  ;;  %v4068_v22 = vpack.i.bf16 %v6674_v51, %v6678_v11 }
 0x417   : > { %4009 = vrot.lane.b32.xlu1 %v4008_v44, %s4495_s6  ;;  %v4058_v44 = vpack.i.bf16 %v6676_v12, %v6672_v8 }
 0x418   : > { %3894 = vmatpush.xpose.msk.msra.mxu3 %vm281_vm3, %v6608_v52  ;;  %v6826_v15 = vpop.permute.xlu0 %3974 }
 0x41b   : > { %v2317_v6 = vld [vmem:[#allocation3 + $0xf1] sm:$0xff] }
 0x41c   : > { %v6614_v34 = vld [vmem:[#allocation3 + $0xf0] sm:$0xff]  ;;  %3895 = vmatpush.xpose.msk.msra.mxu3 %vm281_vm3, %v6612_v30  ;;  %v4013_v18 = vpack.i.bf16 %v2318_v16, %v2317_v6  ;;  %v6618_v9 = vld [vmem:[#allocation3 + $0xf8] sm:$0xff]  ;;  %v4083_v6 = vpack.i.bf16 %v6612_v30, %v6579_v59 }
 0x41d   : > { %8071 = vst [vmem:[#allocation12_spill] sm:$0xff] %v6614_v34  ;;  %v6680_v4 = vld [vmem:[#allocation3 + $0xf2] sm:$0xff]  ;;  %v6697_v16 = vld [vmem:[#allocation3 + $0x13a] sm:$0xff] }
 0x41e   : > { %8072 = vst [vmem:[#allocation40_spill] sm:$0xff] %v6618_v9  ;;  %4014 = vrot.lane.b32.xlu2 %v4013_v18, %s4495_s6  ;;  %4049 = vrot.lane.b32.xlu0 %v6620_v14, %s4496_s21  ;;  %v4093_v17 = vpack.i.bf16 %v6688_v48, %v6680_v4  ;;  %v4108_v18 = vpack.i.bf16 %v6699_v33, %v6697_v16 }
 0x41f   : > { %4024 = vrot.lane.b32.xlu1 %v4023_v20, %s4495_s6  ;;  %8078 = vst [vmem:[#allocation59_spill] sm:$0xff] %v6680_v4  ;;  %v6714_v20 = vld [vmem:[#allocation3 + $0x10a] sm:$0xff] }
 0x420   : > { %3896 = vmatpush.xpose.msk.msra.mxu3 %vm281_vm3, %v6579_v59  ;;  %8080 = vst [vmem:[#allocation27_spill] sm:$0xff] %v6697_v16  ;;  %v6828_v23 = vpop.permute.xlu2 %3984 }
 0x421   : > { %8082 = vst [vmem:[#allocation76_spill] sm:$0xff] %v6714_v20 }
 0x424   : > { %3897 = vmatpush.xpose.msk.msra.mxu3 %vm281_vm3, %v6573_v24 }
 0x426   : > { %4029 = vrot.lane.b32.xlu2 %v4028_v25, %s4495_s6  ;;  %4064 = vrot.lane.b32.xlu0 %v4063_v3, %s4496_s21  ;;  %v6716_v25 = vld [vmem:[#allocation3 + $0x112] sm:$0xff]  ;;  %v4088_v3 = vpack.i.bf16 %v6591_v26, %v6608_v52  ;;  %v6735_v52 = vld [vmem:[#allocation3 + $0x68] sm:$0xff] }
 0x427   : > { %4039 = vrot.lane.b32.xlu1 %v4038_v38, %s4495_s6  ;;  %8083 = vst [vmem:[#allocation42_spill] sm:$0xff] %v6716_v25  ;;  %v2362_v38 = vld [vmem:[#allocation3 + $0x20] sm:$0xff]  ;;  %v4098_v55 = vpack.i.bf16 %v6716_v25, %v6714_v20  ;;  %v6733_v26 = vld [vmem:[#allocation3 + $0x152] sm:$0xff] }
 0x428   : > { %3898 = vmatpush.xpose.msk.msra.mxu3 %vm281_vm3, %v6649_v54  ;;  %8086 = vst [vmem:[#allocation15_spill] sm:$0xff] %v6733_v26 }
 0x42c   : > { %3899 = vmatpush.xpose.msk.msra.mxu3 %vm281_vm3, %v6655_v63 }
 0x42e   : > { %4044 = vrot.lane.b32.xlu2 %v4043_v32, %s4496_s21  ;;  %4079 = vrot.lane.b32.xlu0 %v4078_v50, %s4496_s21  ;;  %v4123_v32 = vpack.i.bf16 %v2362_v38, %v2361_v36  ;;  %v6729_v50 = vld [vmem:[#allocation3 + $0x122] sm:$0xff]  ;;  %v2552_v36 = vld [vmem:[#allocation3 + $0x19a] sm:$0xff] }
 0x42f   : > { %4054 = vrot.lane.b32.xlu1 %v6660_v29, %s4496_s21  ;;  %8084 = vst [vmem:[#allocation14_spill] sm:$0xff] %v6729_v50  ;;  %v2553_v38 = vld [vmem:[#allocation3 + $0x1a2] sm:$0xff] }
 0x430   : > { %3900 = vmatpush.xpose.msk.msra.mxu3 %vm281_vm3, %v6668_v5 }
 0x434   : > { %3901 = vmatpush.xpose.msk.msra.mxu3 %vm281_vm3, %v6674_v51 }
 0x436   : > { %4059 = vrot.lane.b32.xlu2 %v4058_v44, %s4496_s21  ;;  %4094 = vrot.lane.b32.xlu0 %v4093_v17, %s4496_s21  ;;  %v6731_v44 = vld [vmem:[#allocation3 + $0x12a] sm:$0xff] }
 0x437   : > { %4069 = vrot.lane.b32.xlu1 %v4068_v22, %s4496_s21  ;;  %8085 = vst [vmem:[#allocation78_spill] sm:$0xff] %v6731_v44  ;;  %v6737_v22 = vld [vmem:[#allocation3 + $0x15a] sm:$0xff]  ;;  %v4103_v17 = vpack.i.bf16 %v6731_v44, %v6729_v50 }
 0x438   : > { %3902 = vmatpush.xpose.msk.msra.mxu3 %vm281_vm3, %v6678_v11 }
 0x43c   : > { %3903 = vmatpush.xpose.msk.msra.mxu3 %vm281_vm3, %v6634_v57  ;;  %v6859_v57 = vld [vmem:[#allocation3 + $0x120] sm:$0xff] }
 0x43d   : > { %8094 = vst [vmem:[#allocation29_spill] sm:$0xff] %v6859_v57 }
 0x43e   : > { %4074 = vrot.lane.b32.xlu2 %v4073_v21, %s4496_s21  ;;  %4109 = vrot.lane.b32.xlu0 %v4108_v18, %s4496_s21  ;;  %v4113_v21 = vpack.i.bf16 %v6737_v22, %v6733_v26 }
 0x43f   : > { %4084 = vrot.lane.b32.xlu1 %v4083_v6, %s4496_s21  ;;  %v6744_v6 = vld [vmem:[#allocation3 + $0x60] sm:$0xff] }
 0x440   : > { %3904 = vmatpush.xpose.msk.msra.mxu3 %vm281_vm3, %v6632_v10  ;;  %v4138_v18 = vpack.i.bf16 %v6735_v52, %v6744_v6 }
 0x444   : > { %3905 = vmatpush.xpose.msk.msra.mxu3 %vm281_vm3, %v6676_v12  ;;  %v2378_v12 = vld [vmem:[#allocation3 + $0xe0] sm:$0xff] }
 0x446   : > { %4089 = vrot.lane.b32.xlu2 %v4088_v3, %s4496_s21  ;;  %4124 = vrot.lane.b32.xlu0 %v4123_v32, %s4497_s22  ;;  %v6756_v3 = vld [vmem:[#allocation3 + $0x172] sm:$0xff] }
 0x447   : > { %4099 = vrot.lane.b32.xlu1 %v4098_v55, %s4496_s21  ;;  %v6758_v55 = vld [vmem:[#allocation3 + $0x38] sm:$0xff]  ;;  %v6760_v32 = vld [vmem:[#allocation3 + $0xb0] sm:$0xff] }
 0x448   : > { %3906 = vmatpush.xpose.msk.msra.mxu3 %vm281_vm3, %v6672_v8  ;;  %v6847_v10 = vpop.permute.xlu0 %3989 }
 0x44c   : > { %3907 = vmatpush.xpose.msk.msra.mxu3 %vm281_vm3, %v2334_v43  ;;  %v6754_v43 = vld [vmem:[#allocation3 + $0x16a] sm:$0xff] }
 0x44e   : > { %4104 = vrot.lane.b32.xlu2 %v4103_v17, %s4496_s21  ;;  %4139 = vrot.lane.b32.xlu0 %v4138_v18, %s4497_s22  ;;  %v4118_v17 = vpack.i.bf16 %v6756_v3, %v6754_v43  ;;  %v6766_v18 = vld [vmem:[#allocation3 + $0xa8] sm:$0xff] }
 0x44f   : > { %4114 = vrot.lane.b32.xlu1 %v4113_v21, %s4496_s21  ;;  %v4128_v21 = vpack.i.bf16 %v6758_v55, %v6498_v1  ;;  %v6809_v1 = vld [vmem:[#allocation3 + $0x90] sm:$0xff] }
 0x450   : > { %3908 = vmatpush.xpose.msk.msra.mxu3 %vm281_vm3, %v6653_v47  ;;  %v4153_v47 = vpack.i.bf16 %v6760_v32, %v6766_v18  ;;  %v6849_v31 = vpop.permute.xlu2 %3999 }
 0x451   : > { %8091 = vst [vmem:[#allocation112_spill] sm:$0xff] %v6849_v31 }
 0x454   : > { %3910 = vmatpush.xpose.msk.msrb.mxu3 %vm281_vm3, %v2553_v38  ;;  %v6774_v38 = vld [vmem:[#allocation3 + $0x18a] sm:$0xff] }
 0x456   : > { %4119 = vrot.lane.b32.xlu2 %v4118_v17, %s4496_s21  ;;  %4154 = vrot.lane.b32.xlu0 %v4153_v47, %s4497_s22  ;;  %v4133_v17 = vpack.i.bf16 %v6778_v37, %v6782_v2  ;;  %v4168_v47 = vpack.i.bf16 %v6618_v9, %v6614_v34  ;;  %v6811_v9 = vld [vmem:[#allocation3 + $0xc0] sm:$0xff] }
 0x457   : > { %4129 = vrot.lane.b32.xlu1 %v4128_v21, %s4497_s22 }
 0x458   : > { %3911 = vmatpush.xpose.msk.msrb.mxu3 %vm281_vm3, %v2552_v36  ;;  %v6784_v36 = vld [vmem:[#allocation3 + $0x78] sm:$0xff] }
 0x459   : > { %v4143_v21 = vpack.i.bf16 %v6780_v13, %v6784_v36  ;;  %v6832_v13 = vld [vmem:[#allocation3 + $0x110] sm:$0xff] }
 0x45a   : > { %8090 = vst [vmem:[#allocation80_spill] sm:$0xff] %v6832_v13 }
 0x45c   : > { %3912 = vmatpush.xpose.msk.msrb.mxu3 %vm281_vm3, %v6774_v38 }
 0x45e   : > { %4134 = vrot.lane.b32.xlu2 %v4133_v17, %s4497_s22  ;;  %4169 = vrot.lane.b32.xlu0 %v4168_v47, %s4497_s22  ;;  %v4148_v17 = vpack.i.bf16 %v6803_v62, %v6809_v1  ;;  %v6817_v47 = vld [vmem:[#allocation3 + $0x138] sm:$0xff] }
 0x45f   : > { %4144 = vrot.lane.b32.xlu1 %v4143_v21, %s4497_s22  ;;  %v4158_v21 = vpack.i.bf16 %v6805_v49, %v6811_v9  ;;  %8089 = vst [vmem:[#allocation60_spill] sm:$0xff] %v6817_v47  ;;  %v4183_v34 = vpack.i.bf16 %v6807_v56, %v6817_v47  ;;  %v4163_v47 = vpack.i.bf16 %v2378_v12, %v2377_v19 }
 0x460   : > { %3913 = vmatpush.xpose.msk.msrb.mxu3 %vm281_vm3, %v6786_v42 }
 0x464   : > { %3914 = vmatpush.xpose.msk.msrb.mxu3 %vm281_vm3, %v6756_v3 }
 0x466   : > { %4149 = vrot.lane.b32.xlu2 %v4148_v17, %s4497_s22  ;;  %4184 = vrot.lane.b32.xlu0 %v4183_v34, %s4497_s22  ;;  %v4173_v17 = vpack.i.bf16 %v6832_v13, %v6500_v46  ;;  %v3965_v34 = vpop.permute.xlu1 %3964  ;;  %v6853_v46 = vld [vmem:[#allocation3 + $0x128] sm:$0xff]  ;;  %v6855_v13 = vld [vmem:[#allocation3 + $0x150] sm:$0xff] }
 0x467   : > { %4159 = vrot.lane.b32.xlu1 %v4158_v21, %s4497_s22  ;;  %v6838_v21 = vld [vmem:[#allocation3 + $0x180] sm:$0xff]  ;;  %8092 = vst [vmem:[#allocation77_spill] sm:$0xff] %v6853_v46 }
 0x468   : > { %3915 = vmatpush.xpose.msk.msrb.mxu3 %vm281_vm3, %v6754_v43  ;;  %v4198_v56 = vpack.i.bf16 %v6834_v60, %v6838_v21  ;;  %8093 = vst [vmem:[#allocation113_spill] sm:$0xff] %v6855_v13 }
 0x46c   : > { %3916 = vmatpush.xpose.msk.msrb.mxu3 %vm281_vm3, %v6737_v22 }
 0x46e   : > { %4164 = vrot.lane.b32.xlu2 %v4163_v47, %s4497_s22  ;;  %4199 = vrot.lane.b32.xlu0 %v4198_v56, %s4497_s22  ;;  %v4178_v47 = vpack.i.bf16 %v6853_v46, %v6859_v57  ;;  %v4188_v56 = vpack.i.bf16 %v6857_v0, %v6855_v13  ;;  %v3980_v31 = vpop.permute.xlu1 %3979  ;;  %v6878_v46 = vld [vmem:[#allocation3 + $0x170] sm:$0xff]  ;;  %v6880_v57 = vld [vmem:[#allocation3 + $0x168] sm:$0xff]  ;;  %v3966_v13 = vunpack.i.l.bf16 %v3965_v34 }
 0x46f   : > { %4174 = vrot.lane.b32.xlu1 %v4173_v17, %s4497_s22  ;;  %v4213_v17 = vpack.i.bf16 %v6612_v30, %v6672_v8  ;;  %v4193_v30 = vpack.i.bf16 %v6878_v46, %v6880_v57 }
 0x470   : > { %3917 = vmatpush.xpose.msk.msrb.mxu3 %vm281_vm3, %v6733_v26 }
 0x474   : > { %3918 = vmatpush.xpose.msk.msrb.mxu3 %vm281_vm3, %v6699_v33 }
 0x476   : > { %4179 = vrot.lane.b32.xlu2 %v4178_v47, %s4497_s22  ;;  %4214 = vrot.lane.b32.xlu0 %v4213_v17, %s4495_s6  ;;  %v6889_v8 = vpop.permute.xlu1 %3994  ;;  %v8095_v47 = vpack.i.bf16 %v6573_v24, %v6579_v59  ;;  %v2266_v24 = vld [vmem:[#allocation3 + $0x8] sm:$0xff]  ;;  %v2265_v59 = vld [vmem:[#allocation3] sm:$0xff] }
 0x477   : > { %4189 = vrot.lane.b32.xlu1 %v4188_v56, %s4497_s22 }
 0x478   : > { %3919 = vmatpush.xpose.msk.msrb.mxu3 %vm281_vm3, %v6697_v16  ;;  %v6872_v33 = vpop.permute.xlu2 %4014  ;;  %v6874_v26 = vpop.permute.xlu0 %4004  ;;  %v3981_v16 = vunpack.i.l.bf16 %v3980_v31 }
 0x47c   : > { %3920 = vmatpush.xpose.msk.msrb.mxu3 %vm281_vm3, %v6731_v44  ;;  %v4218_v44 = vpack.i.bf16 %v2377_v19, %v2378_v12 }
 0x47e   : > { %4194 = vrot.lane.b32.xlu2 %v4193_v30, %s4497_s22  ;;  %4229 = vrot.lane.b32.xlu0 %v8095_v47, %s4495_s6  ;;  %v3967_v30 = vunpack.i.h.bf16 %v3965_v34 }
 0x47f   : > { %4204 = vrot.lane.b32.xlu1 %v6620_v14, %s4495_s6 }
 0x480   : > { %3921 = vmatpush.xpose.msk.msrb.mxu3 %vm281_vm3, %v6729_v50  ;;  %v6895_v56 = vpop.permute.xlu2 %4029  ;;  %v6897_v17 = vpop.permute.xlu0 %4019  ;;  %v2521_v50 = vld [vmem:[#allocation3 + $0x1a1] sm:$0xff] }
 0x481   : > { %v4243_v14 = vpack.i.bf16 %v2521_v50, %v6577_v27  ;;  %v2520_v27 = vld [vmem:[#allocation3 + $0x199] sm:$0xff]  ;;  %v3322_v50 = vsel %vm281_vm3, %v2265_v59, %v3966_v13  ;;  %v8096_v13 = vpack.i.bf16 %v6593_v45, %v6595_v58  ;;  %v3328_v58 = vsel %vm281_vm3, %v6782_v2, %v3981_v16 }
 0x484   : > { %3922 = vmatpush.xpose.msk.msrb.mxu3 %vm281_vm3, %v6716_v25 }
 0x486   : > { %4209 = vrot.lane.b32.xlu2 %v6660_v29, %s4495_s6  ;;  %4244 = vrot.lane.b32.xlu0 %v4243_v14, %s4497_s22  ;;  %v3323_v29 = vsel %vm281_vm3, %v2266_v24, %v3967_v30  ;;  %v4233_v14 = vpack.i.bf16 %v6649_v54, %v6774_v38  ;;  %v3972_v30 = vunpack.i.h.bf16 %v6799_v53  ;;  %v3971_v24 = vunpack.i.l.bf16 %v6799_v53  ;;  %v2268_v53 = vld [vmem:[#allocation3 + $0x20] sm:$0xff] }
 0x487   : > { %4219 = vrot.lane.b32.xlu1 %v4218_v44, %s4496_s21 }
 0x488   : > { %3923 = vmatpush.xpose.msk.msrb.mxu3 %vm281_vm3, %v6714_v20  ;;  %v4045_v47 = vpop.permute.xlu2 %4044  ;;  %v6910_v20 = vpop.permute.xlu0 %4034 }
 0x489   : > { %v6908_v25 = vpop.permute.xlu1 %4009  ;;  %v4047_v19 = vunpack.i.h.bf16 %v4045_v47  ;;  %v4046_v12 = vunpack.i.l.bf16 %v4045_v47  ;;  %v4258_v47 = vpack.i.bf16 %v2520_v27, %v6575_v41 }
 0x48b   : > { %v6917_v44 = vsel %vm3354_vm12, %v3323_v29, %v4047_v19  ;;  %v6920_v34 = vsel %vm3354_vm12, %v3322_v50, %v4046_v12  ;;  %v6937_v29 = vld [vmem:[#allocation3 + $0x189] sm:$0xff]  ;;  %v2267_v50 = vld [vmem:[#allocation3 + $0x18] sm:$0xff] }
 0x48c   : > { %3924 = vmatpush.xpose.msk.msrb.mxu3 %vm281_vm3, %v6688_v48  ;;  %v3982_v48 = vunpack.i.h.bf16 %v3980_v31  ;;  %v2489_v31 = vld [vmem:[#allocation3 + $0x1a0] sm:$0xff] }
 0x48e   : > { %4224 = vrot.lane.b32.xlu2 %v8096_v13, %s4497_s22  ;;  %4259 = vrot.lane.b32.xlu0 %v4258_v47, %s4497_s22  ;;  %v3329_v45 = vsel %vm281_vm3, %v6778_v37, %v3982_v48  ;;  %v3325_v13 = vsel %vm281_vm3, %v2268_v53, %v3972_v30  ;;  %v4248_v48 = vpack.i.bf16 %v6655_v63, %v6786_v42  ;;  %v3986_v30 = vunpack.i.l.bf16 %v6828_v23 }
 0x48f   : > { %4234 = vrot.lane.b32.xlu1 %v4233_v14, %s4495_s6 }
 0x490   : > { %3925 = vmatpush.xpose.msk.msrb.mxu3 %vm281_vm3, %v6680_v4  ;;  %v4060_v54 = vpop.permute.xlu2 %4059  ;;  %v4050_v19 = vpop.permute.xlu0 %4049 }
 0x491   : > { %v6935_v38 = vpop.permute.xlu1 %4024  ;;  %v4062_v59 = vunpack.i.h.bf16 %v4060_v54  ;;  %v4061_v41 = vunpack.i.l.bf16 %v4060_v54  ;;  %v4052_v12 = vunpack.i.h.bf16 %v4050_v19  ;;  %v4051_v27 = vunpack.i.l.bf16 %v4050_v19 }
 0x492   : > { %v3324_v54 = vsel %vm281_vm3, %v2267_v50, %v3971_v24  ;;  %v4238_v19 = vpack.i.bf16 %v2489_v31, %v6805_v49  ;;  %v3987_v49 = vunpack.i.h.bf16 %v6828_v23  ;;  %v3330_v50 = vsel %vm281_vm3, %v6744_v6, %v3986_v30 }
 0x493   : > { %v6944_v14 = vsel %vm3354_vm12, %v3329_v45, %v4062_v59  ;;  %v6947_v47 = vsel %vm3354_vm12, %v3328_v58, %v4061_v41  ;;  %v6955_v4 = vsel %vm3354_vm12, %v3325_v13, %v4052_v12  ;;  %v6958_v16 = vsel %vm3354_vm12, %v3324_v54, %v4051_v27  ;;  %v2518_v45 = vld [vmem:[#allocation3 + $0x181] sm:$0xff] }
 0x494   : > { %v4273_v59 = vpack.i.bf16 %v6937_v29, %v6559_v61  ;;  %v3996_v41 = vunpack.i.l.bf16 %v6889_v8  ;;  %v2488_v61 = vld [vmem:[#allocation3 + $0x198] sm:$0xff]  ;;  %v3331_v23 = vsel %vm281_vm3, %v6735_v52, %v3987_v49  ;;  %v4263_v54 = vpack.i.bf16 %v6668_v5, %v6756_v3 }
 0x495   : > { %v4253_v13 = vpack.i.bf16 %v2488_v61, %v6811_v9  ;;  %v3976_v49 = vunpack.i.l.bf16 %v6826_v15  ;;  %v4011_v30 = vunpack.i.l.bf16 %v6908_v25 }
 0x496   : > { %4239 = vrot.lane.b32.xlu2 %v4238_v19, %s4496_s21  ;;  %4274 = vrot.lane.b32.xlu0 %v4273_v59, %s4497_s22  ;;  %v3334_v58 = vsel %vm281_vm3, %v6809_v1, %v3996_v41  ;;  %v4288_v59 = vpack.i.bf16 %v2518_v45, %v6557_v35  ;;  %v3977_v41 = vunpack.i.h.bf16 %v6826_v15  ;;  %v2284_v15 = vld [vmem:[#allocation3 + $0xe0] sm:$0xff]  ;;  %v2283_v45 = vld [vmem:[#allocation3 + $0xd8] sm:$0xff] }
 0x497   : > { %4249 = vrot.lane.b32.xlu1 %v4248_v48, %s4495_s6 }
 0x498   : > { %v6968_v42 = vpop.permute.xlu2 %4074  ;;  %v4065_v31 = vpop.permute.xlu0 %4064 }
 0x499   : > { %v6970_v63 = vpop.permute.xlu1 %4039  ;;  %v4076_v24 = vunpack.i.l.bf16 %v6968_v42  ;;  %v4067_v12 = vunpack.i.h.bf16 %v4065_v31  ;;  %v4066_v27 = vunpack.i.l.bf16 %v4065_v31 }
 0x49b   : > { %v6976_v53 = vsel %vm3354_vm12, %v3334_v58, %v4076_v24  ;;  %v6986_v19 = vsel %vm3354_vm12, %v3331_v23, %v4067_v12  ;;  %v6989_v48 = vsel %vm3354_vm12, %v3330_v50, %v4066_v27  ;;  %v4012_v24 = vunpack.i.h.bf16 %v6908_v25  ;;  %v2269_v27 = vld [vmem:[#allocation3 + $0x30] sm:$0xff] }
 0x49c   : > { %v3327_v25 = vsel %vm281_vm3, %v6758_v55, %v3977_v41  ;;  %v3326_v58 = vsel %vm281_vm3, %v2269_v27, %v3976_v49  ;;  %v3340_v50 = vsel %vm281_vm3, %v2283_v45, %v4011_v30  ;;  %v3991_v41 = vunpack.i.l.bf16 %v6847_v10 }
 0x49d   : > { %v3341_v23 = vsel %vm281_vm3, %v2284_v15, %v4012_v24  ;;  %v4268_v49 = vpack.i.bf16 %v6834_v60, %v6760_v32  ;;  %v4278_v24 = vpack.i.bf16 %v6674_v51, %v6754_v43  ;;  %v4017_v30 = vunpack.i.h.bf16 %v6872_v33  ;;  %v2286_v15 = vld [vmem:[#allocation3 + $0xf8] sm:$0xff] }
 0x49e   : > { %4254 = vrot.lane.b32.xlu2 %v4253_v13, %s4496_s21  ;;  %4289 = vrot.lane.b32.xlu0 %v4288_v59, %s4497_s22  ;;  %v4293_v60 = vpack.i.bf16 %v6678_v11, %v6737_v22  ;;  %v4007_v51 = vunpack.i.h.bf16 %v6874_v26  ;;  %v4006_v43 = vunpack.i.l.bf16 %v6874_v26  ;;  %v4283_v27 = vpack.i.bf16 %v6838_v21, %v6766_v18  ;;  %v2290_v11 = vld [vmem:[#allocation3 + $0x128] sm:$0xff]  ;;  %v2289_v22 = vld [vmem:[#allocation3 + $0x120] sm:$0xff]  ;;  %v2285_v21 = vld [vmem:[#allocation3 + $0xf0] sm:$0xff] }
 0x49f   : > { %4264 = vrot.lane.b32.xlu1 %v4263_v54, %s4495_s6 }
 0x4a0   : > { %v4090_v9 = vpop.permute.xlu2 %4089  ;;  %v6999_v12 = vpop.permute.xlu0 %4079 }
 0x4a1   : > { %v4055_v5 = vpop.permute.xlu1 %4054  ;;  %v4092_v3 = vunpack.i.h.bf16 %v4090_v9  ;;  %v4091_v31 = vunpack.i.l.bf16 %v4090_v9 }
 0x4a2   : > { %v4057_v61 = vunpack.i.h.bf16 %v4055_v5  ;;  %v4056_v35 = vunpack.i.l.bf16 %v4055_v5  ;;  %v4027_v5 = vunpack.i.h.bf16 %v6935_v38 }
 0x4a3   : > { %v7013_v59 = vsel %vm3354_vm12, %v3341_v23, %v4092_v3  ;;  %v7016_v9 = vsel %vm3354_vm12, %v3340_v50, %v4091_v31  ;;  %v4016_v3 = vunpack.i.l.bf16 %v6872_v33  ;;  %v8097_v31 = vpack.i.bf16 %v6546_v40, %v6534_v28 }
 0x4a4   : > { %v7007_v13 = vsel %vm3354_vm12, %v3327_v25, %v4057_v61  ;;  %v7010_v54 = vsel %vm3354_vm12, %v3326_v58, %v4056_v35  ;;  %v4026_v61 = vunpack.i.l.bf16 %v6935_v38  ;;  %v3332_v33 = vsel %vm281_vm3, %v6784_v36, %v3991_v41 }
 0x4a5   : > { %v3343_v58 = vsel %vm281_vm3, %v2286_v15, %v4017_v30  ;;  %v3347_v50 = vsel %vm281_vm3, %v2290_v11, %v4027_v5  ;;  %v4032_v30 = vunpack.i.h.bf16 %v6895_v56  ;;  %v4031_v15 = vunpack.i.l.bf16 %v6895_v56  ;;  %v2292_v56 = vld [vmem:[#allocation3 + $0x140] sm:$0xff] }
 0x4a6   : > { %4269 = vrot.lane.b32.xlu2 %v4268_v49, %s4496_s21  ;;  %4304 = vrot.lane.b32.xlu0 %v8097_v31, %s4497_s22  ;;  %v3346_v49 = vsel %vm281_vm3, %v2289_v22, %v4026_v61 }
 0x4a7   : > { %4279 = vrot.lane.b32.xlu1 %v4278_v24, %s4495_s6 }
 0x4a8   : > { %v4105_v35 = vpop.permute.xlu2 %4104  ;;  %v4095_v25 = vpop.permute.xlu0 %4094 }
 0x4a9   : > { %v7037_v38 = vpop.permute.xlu1 %4069  ;;  %v4107_v45 = vunpack.i.h.bf16 %v4105_v35  ;;  %v4106_v28 = vunpack.i.l.bf16 %v4105_v35  ;;  %v4097_v26 = vunpack.i.h.bf16 %v4095_v25  ;;  %v4096_v23 = vunpack.i.l.bf16 %v4095_v25  ;;  %v2281_v25 = vld [vmem:[#allocation3 + $0xc0] sm:$0xff] }
 0x4aa   : > { %v4071_v40 = vunpack.i.l.bf16 %v7037_v38  ;;  %v3342_v35 = vsel %vm281_vm3, %v2285_v21, %v4016_v3  ;;  %v8098_v3 = vpack.i.bf16 %v6531_v39, %v6529_v7 }
 0x4ab   : > { %v7051_v41 = vsel %vm3354_vm12, %v3347_v50, %v4107_v45  ;;  %v7054_v31 = vsel %vm3354_vm12, %v3346_v49, %v4106_v28  ;;  %v7060_v5 = vsel %vm3354_vm12, %v3343_v58, %v4097_v26  ;;  %v7063_v61 = vsel %vm3354_vm12, %v3342_v35, %v4096_v23  ;;  %v2291_v28 = vld [vmem:[#allocation3 + $0x138] sm:$0xff] }
 0x4ac   : > { %v7048_v24 = vsel %vm3354_vm12, %v3332_v33, %v4071_v40  ;;  %v4042_v33 = vunpack.i.h.bf16 %v6970_v63  ;;  %v4041_v45 = vunpack.i.l.bf16 %v6970_v63  ;;  %v2282_v40 = vld [vmem:[#allocation3 + $0xc8] sm:$0xff]  ;;  %v3349_v58 = vsel %vm281_vm3, %v2292_v56, %v4032_v30  ;;  %v8100_v56 = vld [vmem:[#allocation4_spill] sm:$0xff] }
 0x4ad   : > { %v3348_v26 = vsel %vm281_vm3, %v2291_v28, %v4031_v15  ;;  %v3339_v63 = vsel %vm281_vm3, %v2282_v40, %v4007_v51  ;;  %v8099_v28 = vld [vmem:[#allocation15_spill] sm:$0xff] }
 0x4ae   : > { %4284 = vrot.lane.b32.xlu2 %v4283_v27, %s4496_s21  ;;  %4319 = vrot.lane.b32.xlu0 %v8098_v3, %s4497_s22  ;;  %v3338_v27 = vsel %vm281_vm3, %v2281_v25, %v4006_v43  ;;  %v3353_v7 = vsel %vm281_vm3, %v6878_v46, %v4042_v33  ;;  %v3352_v3 = vsel %vm281_vm3, %v6880_v57, %v4041_v45 }
 0x4af   : > { %4294 = vrot.lane.b32.xlu1 %v4293_v60, %s4495_s6  ;;  %v4298_v33 = vpack.i.bf16 %v6878_v46, %v6803_v62  ;;  %v4308_v40 = vpack.i.bf16 %v8100_v56, %v8099_v28  ;;  %v8102_v46 = vld [vmem:[#allocation55_spill] sm:$0xff] }
 0x4b0   : > { %v4120_v11 = vpop.permute.xlu2 %4119  ;;  %v4110_v21 = vpop.permute.xlu0 %4109 }
 0x4b1   : > { %v4085_v22 = vpop.permute.xlu1 %4084  ;;  %v4122_v60 = vunpack.i.h.bf16 %v4120_v11  ;;  %v4121_v23 = vunpack.i.l.bf16 %v4120_v11  ;;  %v4112_v39 = vunpack.i.h.bf16 %v4110_v21  ;;  %v4111_v35 = vunpack.i.l.bf16 %v4110_v21  ;;  %v2288_v21 = vld [vmem:[#allocation3 + $0x110] sm:$0xff] }
 0x4b2   : > { %v4087_v50 = vunpack.i.h.bf16 %v4085_v22  ;;  %v4086_v49 = vunpack.i.l.bf16 %v4085_v22  ;;  %v4022_v11 = vunpack.i.h.bf16 %v6897_v17  ;;  %v4021_v22 = vunpack.i.l.bf16 %v6897_v17  ;;  %v2287_v17 = vld [vmem:[#allocation3 + $0x108] sm:$0xff] }
 0x4b3   : > { %v7082_v30 = vsel %vm3354_vm12, %v3353_v7, %v4122_v60  ;;  %v7085_v51 = vsel %vm3354_vm12, %v3352_v3, %v4121_v23  ;;  %v7098_v45 = vsel %vm3354_vm12, %v3349_v58, %v4112_v39  ;;  %v7101_v25 = vsel %vm3354_vm12, %v3348_v26, %v4111_v35 }
 0x4b4   : > { %v7088_v43 = vsel %vm3354_vm12, %v3339_v63, %v4087_v50  ;;  %v7091_v15 = vsel %vm3354_vm12, %v3338_v27, %v4086_v49  ;;  %v8101_v63 = vld [vmem:[#allocation23_spill] sm:$0xff]  ;;  %v3345_v35 = vsel %vm281_vm3, %v2288_v21, %v4022_v11  ;;  %v3344_v3 = vsel %vm281_vm3, %v2287_v17, %v4021_v22  ;;  %v2294_v21 = vld [vmem:[#allocation3 + $0x158] sm:$0xff]  ;;  %v2293_v17 = vld [vmem:[#allocation3 + $0x150] sm:$0xff] }
 0x4b5   : > { %v8103_v27 = vpack.i.bf16 %v8101_v63, %v8102_v46  ;;  %v8104_v63 = vld [vmem:[#allocation45_spill] sm:$0xff]  ;;  %v8105_v46 = vld [vmem:[#allocation63_spill] sm:$0xff]  ;;  %v4036_v22 = vunpack.i.l.bf16 %v6910_v20 }
 0x4b6   : > { %4299 = vrot.lane.b32.xlu2 %v4298_v33, %s4496_s21 }
 0x4b7   : > { %4309 = vrot.lane.b32.xlu1 %v4308_v40, %s4495_s6  ;;  %4334 = vrot.lane.b32.xlu0 %v8103_v27, %s4497_s22  ;;  %v4313_v40 = vpack.i.bf16 %v6880_v57, %v6809_v1  ;;  %v4323_v27 = vpack.i.bf16 %v8105_v46, %v8104_v63  ;;  %v8106_v1 = vld [vmem:[#allocation58_spill] sm:$0xff]  ;;  %v8107_v57 = vld [vmem:[#allocation8_spill] sm:$0xff]  ;;  %v8110_v63 = vld [vmem:[#allocation27_spill] sm:$0xff] }
 0x4b8   : > { %v7111_v60 = vpop.permute.xlu2 %4134  ;;  %v4125_v49 = vpop.permute.xlu0 %4124  ;;  %v8111_v46 = vld [vmem:[#allocation5_spill] sm:$0xff] }
 0x4b9   : > { %v4100_v58 = vpop.permute.xlu1 %4099  ;;  %v4136_v26 = vunpack.i.l.bf16 %v7111_v60  ;;  %v4127_v7 = vunpack.i.h.bf16 %v4125_v49  ;;  %v4126_v39 = vunpack.i.l.bf16 %v4125_v49 }
 0x4ba   : > { %v4102_v23 = vunpack.i.h.bf16 %v4100_v58  ;;  %v4101_v50 = vunpack.i.l.bf16 %v4100_v58 }
 0x4bb   : > { %v7118_v33 = vsel %vm3387_vm13, %v7010_v54, %v4136_v26  ;;  %v7128_v58 = vsel %vm3387_vm13, %v6917_v44, %v4127_v7  ;;  %v7132_v11 = vsel %vm3387_vm13, %v6920_v34, %v4126_v39  ;;  %v4037_v54 = vunpack.i.h.bf16 %v6910_v20 }
 0x4bc   : > { %v3378_v28 = vsel %vm3354_vm12, %v3345_v35, %v4102_v23  ;;  %v3377_v56 = vsel %vm3354_vm12, %v3344_v3, %v4101_v50  ;;  %v8108_v26 = vpack.i.bf16 %v8106_v1, %v8107_v57  ;;  %v3350_v7 = vsel %vm281_vm3, %v2293_v17, %v4036_v22  ;;  %v8109_v3 = vld [vmem:[#allocation33_spill] sm:$0xff]  ;;  %v7156_v1 = vld [vmem:[#allocation3 + $0x69] sm:$0xff] }
 0x4bd   : > { %v3351_v20 = vsel %vm281_vm3, %v2294_v21, %v4037_v54  ;;  %v8112_v57 = vld [vmem:[#allocation28_spill] sm:$0xff] }
 0x4be   : > { %4314 = vrot.lane.b32.xlu2 %v4313_v40, %s4496_s21  ;;  %v4328_v40 = vpack.i.bf16 %v6857_v0, %v8109_v3 }
 0x4bf   : > { %4324 = vrot.lane.b32.xlu1 %v4323_v27, %s4495_s6  ;;  %4349 = vrot.lane.b32.xlu0 %v8108_v26, %s4497_s22  ;;  %v4338_v27 = vpack.i.bf16 %v8111_v46, %v8110_v63  ;;  %v4363_v26 = vpack.i.bf16 %v8112_v57, %v7156_v1  ;;  %v8114_v63 = vld [vmem:[#allocation113_spill] sm:$0xff]  ;;  %v8116_v57 = vld [vmem:[#allocation14_spill] sm:$0xff] }
 0x4c0   : > { %v7142_v23 = vpop.permute.xlu2 %4149  ;;  %v7144_v34 = vpop.permute.xlu0 %4139  ;;  %v4343_v46 = vpack.i.bf16 %v8114_v63, %v6784_v36 }
 0x4c1   : > { %v4115_v44 = vpop.permute.xlu1 %4114 }
 0x4c2   : > { %v4117_v50 = vunpack.i.h.bf16 %v4115_v44  ;;  %v4116_v49 = vunpack.i.l.bf16 %v4115_v44 }
 0x4c4   : > { %v7149_v39 = vsel %vm3354_vm12, %v3351_v20, %v4117_v50  ;;  %v3383_v35 = vsel %vm3354_vm12, %v3350_v7, %v4116_v49 }
 0x4c6   : > { %4329 = vrot.lane.b32.xlu2 %v4328_v40, %s4496_s21 }
 0x4c7   : > { %4339 = vrot.lane.b32.xlu1 %v4338_v27, %s4495_s6  ;;  %4364 = vrot.lane.b32.xlu0 %v4363_v26, %s4497_s22  ;;  %v8115_v27 = vld [vmem:[#allocation78_spill] sm:$0xff] }
 0x4c8   : > { %v4165_v54 = vpop.permute.xlu2 %4164  ;;  %v7163_v21 = vpop.permute.xlu0 %4154  ;;  %v4353_v26 = vpack.i.bf16 %v8116_v57, %v8115_v27  ;;  %v8120_v57 = vld [vmem:[#allocation60_spill] sm:$0xff] }
 0x4c9   : > { %v4130_v22 = vpop.permute.xlu1 %4129  ;;  %v4167_v44 = vunpack.i.h.bf16 %v4165_v54  ;;  %v4166_v50 = vunpack.i.l.bf16 %v4165_v54  ;;  %v8118_v54 = vld [vmem:[#allocation76_spill] sm:$0xff] }
 0x4ca   : > { %v4132_v49 = vunpack.i.h.bf16 %v4130_v22  ;;  %v4131_v0 = vunpack.i.l.bf16 %v4130_v22 }
 0x4cb   : > { %v7175_v7 = vsel %vm3387_vm13, %v7088_v43, %v4167_v44  ;;  %v7179_v40 = vsel %vm3387_vm13, %v7091_v15, %v4166_v50 }
 0x4cc   : > { %v7167_v17 = vsel %vm3387_vm13, %v6955_v4, %v4132_v49  ;;  %v7171_v20 = vsel %vm3387_vm13, %v6958_v16, %v4131_v0  ;;  %8113 = vst [vmem:[#allocation81_spill] sm:$0xff] %v7179_v40  ;;  %v8117_v4 = vld [vmem:[#allocation42_spill] sm:$0xff] }
 0x4cd   : > { %v4378_v22 = vpack.i.bf16 %v8118_v54, %v8117_v4 }
 0x4ce   : > { %4344 = vrot.lane.b32.xlu2 %v4343_v46, %s4496_s21  ;;  %v8119_v46 = vld [vmem:[#allocation79_spill] sm:$0xff] }
 0x4cf   : > { %4354 = vrot.lane.b32.xlu1 %v4353_v26, %s4495_s6  ;;  %4379 = vrot.lane.b32.xlu0 %v4378_v22, %s4495_s6  ;;  %v4358_v27 = vpack.i.bf16 %v8119_v46, %v6735_v52  ;;  %v4368_v26 = vpack.i.bf16 %v8120_v57, %v6744_v6  ;;  %v8121_v22 = vld [vmem:[#allocation112_spill] sm:$0xff] }
 0x4d0   : > { %v4180_v16 = vpop.permute.xlu2 %4179  ;;  %v4170_v50 = vpop.permute.xlu0 %4169 }
 0x4d1   : > { %v7190_v43 = vpop.permute.xlu1 %4144  ;;  %v4182_v15 = vunpack.i.h.bf16 %v4180_v16  ;;  %v4181_v44 = vunpack.i.l.bf16 %v4180_v16  ;;  %v4172_v49 = vunpack.i.h.bf16 %v4170_v50  ;;  %v4171_v36 = vunpack.i.l.bf16 %v4170_v50  ;;  %v8122_v16 = vld [vmem:[#allocation29_spill] sm:$0xff] }
 0x4d3   : > { %v7193_v0 = vsel %vm3387_vm13, %v3378_v28, %v4182_v15  ;;  %v7196_v63 = vsel %vm3387_vm13, %v3377_v56, %v4181_v44  ;;  %v7204_v4 = vsel %vm3387_vm13, %v7013_v59, %v4172_v49  ;;  %v7208_v54 = vsel %vm3387_vm13, %v7016_v9, %v4171_v36 }
 0x4d4   : > { %v4002_v28 = vunpack.i.h.bf16 %v8121_v22  ;;  %v4393_v56 = vpack.i.bf16 %v8122_v16, %v6782_v2  ;;  %v4082_v15 = vunpack.i.h.bf16 %v6999_v12  ;;  %v4001_v59 = vunpack.i.l.bf16 %v8121_v22  ;;  %v7226_v16 = vld [vmem:[#allocation3 + $0x61] sm:$0xff] }
 0x4d5   : > { %v4081_v49 = vunpack.i.l.bf16 %v6999_v12 }
 0x4d6   : > { %4359 = vrot.lane.b32.xlu2 %v4358_v27, %s4496_s21  ;;  %v3337_v2 = vsel %vm281_vm3, %v6760_v32, %v4002_v28  ;;  %v8124_v32 = vld [vmem:[#allocation77_spill] sm:$0xff] }
 0x4d7   : > { %4369 = vrot.lane.b32.xlu1 %v4368_v26, %s4496_s21  ;;  %4394 = vrot.lane.b32.xlu0 %v4393_v56, %s4496_s21  ;;  %v3370_v27 = vsel %vm3354_vm12, %v3337_v2, %v4082_v15  ;;  %v8123_v56 = vld [vmem:[#allocation56_spill] sm:$0xff]  ;;  %v4383_v28 = vpack.i.bf16 %v8124_v32, %v6778_v37 }
 0x4d8   : > { %v7217_v52 = vpop.permute.xlu2 %4194  ;;  %v4185_v50 = vpop.permute.xlu0 %4184  ;;  %v4373_v40 = vpack.i.bf16 %v8123_v56, %v7226_v16  ;;  %v7272_v56 = vld [vmem:[#allocation3 + $0x49] sm:$0xff] }
 0x4d9   : > { %v4160_v6 = vpop.permute.xlu1 %4159  ;;  %v4196_v9 = vunpack.i.l.bf16 %v7217_v52  ;;  %v4187_v36 = vunpack.i.h.bf16 %v4185_v50  ;;  %v4186_v46 = vunpack.i.l.bf16 %v4185_v50  ;;  %v4077_v50 = vunpack.i.h.bf16 %v6968_v42 }
 0x4da   : > { %v4162_v44 = vunpack.i.h.bf16 %v4160_v6  ;;  %v4161_v57 = vunpack.i.l.bf16 %v4160_v6  ;;  %v3997_v6 = vunpack.i.h.bf16 %v6889_v8 }
 0x4db   : > { %v7229_v22 = vsel %vm3387_vm13, %v3383_v35, %v4196_v9  ;;  %v7237_v12 = vsel %vm3387_vm13, %v7051_v41, %v4187_v36  ;;  %v7241_v15 = vsel %vm3387_vm13, %v7054_v31, %v4186_v46  ;;  %v8125_v35 = vld [vmem:[#allocation80_spill] sm:$0xff]  ;;  %v4157_v41 = vunpack.i.h.bf16 %v7163_v21 }
 0x4dc   : > { %v3403_v26 = vsel %vm3387_vm13, %v3370_v27, %v4162_v44  ;;  %v4408_v9 = vpack.i.bf16 %v8125_v35, %v6758_v55  ;;  %v3336_v44 = vsel %vm281_vm3, %v6766_v18, %v4001_v59  ;;  %v3335_v42 = vsel %vm281_vm3, %v6803_v62, %v3997_v6  ;;  %v7266_v46 = vld [vmem:[#allocation3 + $0x109] sm:$0xff]  ;;  %v7286_v6 = vld [vmem:[#allocation3 + $0x31] sm:$0xff] }
 0x4dd   : > { %3632 = vmatpush.xpose.msrb.mxu1 %v3403_v26  ;;  %v3369_v37 = vsel %vm3354_vm12, %v3336_v44, %v4081_v49  ;;  %v7263_v49 = vld [vmem:[#allocation3 + $0x121] sm:$0xff]  ;;  %v3368_v36 = vsel %vm3354_vm12, %v3335_v42, %v4077_v50  ;;  %v4156_v27 = vunpack.i.l.bf16 %v7163_v21  ;;  %v7270_v26 = vld [vmem:[#allocation3 + $0x51] sm:$0xff]  ;;  %v3992_v35 = vunpack.i.h.bf16 %v6847_v10 }
 0x4de   : > { %4374 = vrot.lane.b32.xlu2 %v4373_v40, %s4497_s22  ;;  %v3402_v8 = vsel %vm3387_vm13, %v3369_v37, %v4161_v57  ;;  %v7261_v40 = vld [vmem:[#allocation3 + $0x129] sm:$0xff]  ;;  %v3401_v57 = vsel %vm3387_vm13, %v3368_v36, %v4157_v41  ;;  %v4398_v21 = vpack.i.bf16 %v7263_v49, %v7272_v56  ;;  %v8126_v36 = vld [vmem:[#allocation13_spill] sm:$0xff] }
 0x4df   : > { %4384 = vrot.lane.b32.xlu1 %v4383_v28, %s4496_s21  ;;  %4409 = vrot.lane.b32.xlu0 %v4408_v9, %s4496_s21  ;;  %v4388_v28 = vpack.i.bf16 %v7261_v40, %v7270_v26  ;;  %v4423_v9 = vpack.i.bf16 %v7266_v46, %v7286_v6  ;;  %v3400_v44 = vsel %vm3387_vm13, %v6976_v53, %v4156_v27  ;;  %v8127_v27 = vld [vmem:[#allocation59_spill] sm:$0xff] }
 0x4e0   : > { %v7255_v31 = vpop.permute.xlu2 %4209  ;;  %v7257_v59 = vpop.permute.xlu0 %4199 }
 0x4e1   : > { %v4175_v55 = vpop.permute.xlu1 %4174  ;;  %3633 = vmatpush.xpose.msrb.mxu1 %v3402_v8  ;;  %v7307_v8 = vld [vmem:[#allocation3 + $0x111] sm:$0xff] }
 0x4e2   : > { %v4177_v2 = vunpack.i.h.bf16 %v4175_v55  ;;  %v4176_v18 = vunpack.i.l.bf16 %v4175_v55 }
 0x4e4   : > { %v7276_v32 = vsel %vm3387_vm13, %v7060_v5, %v4177_v2  ;;  %v7280_v62 = vsel %vm3387_vm13, %v7063_v61, %v4176_v18  ;;  %v4072_v5 = vunpack.i.h.bf16 %v7037_v38  ;;  %v4152_v61 = vunpack.i.h.bf16 %v7142_v23  ;;  %v7312_v18 = vld [vmem:[#allocation3 + $0x39] sm:$0xff] }
 0x4e5   : > { %3634 = vmatpush.xpose.msrb.mxu1 %v3401_v57  ;;  %v3333_v38 = vsel %vm281_vm3, %v8109_v3, %v3992_v35  ;;  %v4151_v2 = vunpack.i.l.bf16 %v7142_v23  ;;  %v4403_v57 = vpack.i.bf16 %v8127_v27, %v8126_v36  ;;  %v4413_v3 = vpack.i.bf16 %v7307_v8, %v7312_v18  ;;  %v7324_v23 = vld [vmem:[#allocation3 + $0xf9] sm:$0xff] }
 0x4e6   : > { %4389 = vrot.lane.b32.xlu2 %v4388_v28, %s4497_s22  ;;  %v3366_v55 = vsel %vm3354_vm12, %v3333_v38, %v4072_v5  ;;  %8128 = vst [vmem:[#allocation148_spill] sm:$0xff] %v7324_v23  ;;  %v4147_v28 = vunpack.i.h.bf16 %v7190_v43  ;;  %v2441_v5 = vld [vmem:[#allocation3 + $0xda] sm:$0xff]  ;;  %v4142_v36 = vunpack.i.h.bf16 %v7144_v34 }
 0x4e7   : > { %4399 = vrot.lane.b32.xlu1 %v4398_v21, %s4497_s22  ;;  %4424 = vrot.lane.b32.xlu0 %v4423_v9, %s4497_s22  ;;  %v3399_v53 = vsel %vm3387_vm13, %v3366_v55, %v4152_v61  ;;  %v2442_v61 = vld [vmem:[#allocation3 + $0xe2] sm:$0xff] }
 0x4e8   : > { %v7298_v50 = vpop.permute.xlu2 %4224  ;;  %v7303_v41 = vpop.permute.xlu0 %4214  ;;  %v4428_v38 = vpack.i.bf16 %v2441_v5, %v2442_v61  ;;  %v2408_v5 = vld [vmem:[#allocation3 + $0xc9] sm:$0xff] }
 0x4e9   : > { %v7300_v37 = vpop.permute.xlu1 %4189  ;;  %3635 = vmatpush.xpose.msrb.mxu1 %v3400_v44  ;;  %v4146_v44 = vunpack.i.l.bf16 %v7190_v43  ;;  %v4217_v55 = vunpack.i.h.bf16 %v7303_v41  ;;  %v4226_v61 = vunpack.i.l.bf16 %v7298_v50 }
 0x4ea   : > { %v4191_v10 = vunpack.i.l.bf16 %v7300_v37 }
 0x4eb   : > { %v3396_v27 = vsel %vm3387_vm13, %v6989_v48, %v4146_v44  ;;  %v2407_v44 = vld [vmem:[#allocation3 + $0xc1] sm:$0xff] }
 0x4ec   : > { %v7316_v42 = vsel %vm3387_vm13, %v7101_v25, %v4191_v10  ;;  %v3398_v25 = vsel %vm3387_vm13, %v7048_v24, %v4151_v2  ;;  %v3397_v10 = vsel %vm3387_vm13, %v6986_v19, %v4147_v28  ;;  %v8130_v24 = vld [vmem:[#allocation10_spill] sm:$0xff] }
 0x4ed   : > { %3636 = vmatpush.xpose.msrb.mxu1 %v3399_v53  ;;  %v8129_v53 = vld [vmem:[#allocation52_spill] sm:$0xff] }
 0x4ee   : > { %4404 = vrot.lane.b32.xlu2 %v4403_v57, %s4495_s6  ;;  %v8131_v2 = vpack.i.bf16 %v8129_v53, %v8130_v24  ;;  %v3395_v24 = vsel %vm3387_vm13, %v6944_v14, %v4142_v36  ;;  %v8132_v14 = vld [vmem:[#allocation12_spill] sm:$0xff] }
 0x4ef   : > { %4414 = vrot.lane.b32.xlu1 %v4413_v3, %s4497_s22  ;;  %3260 = vrot.lane.b32.xlu0 %v7324_v23, %s4497_s22  ;;  %v8133_v36 = vld [vmem:[#allocation40_spill] sm:$0xff] }
 0x4f0   : > { %v7331_v21 = vpop.permute.xlu2 %4239  ;;  %v4230_v9 = vpop.permute.xlu0 %4229 }
 0x4f1   : > { %v7333_v35 = vpop.permute.xlu1 %4204  ;;  %3637 = vmatpush.xpose.msrb.mxu1 %v3398_v25  ;;  %v4231_v43 = vunpack.i.l.bf16 %v4230_v9  ;;  %v4232_v53 = vunpack.i.h.bf16 %v4230_v9  ;;  %v4241_v9 = vunpack.i.l.bf16 %v7331_v21 }
 0x4f5   : > { %3638 = vmatpush.xpose.msrb.mxu1 %v3397_v10  ;;  %v3435_v10 = vsel %vm281_vm3, %v2408_v5, %v4217_v55  ;;  %v4137_v55 = vunpack.i.h.bf16 %v7111_v60 }
 0x4f6   : > { %4419 = vrot.lane.b32.xlu2 %v8131_v2, %s4496_s21 }
 0x4f7   : > { %4429 = vrot.lane.b32.xlu1 %v4428_v38, %s4495_s6  ;;  %v4141_v38 = vunpack.i.l.bf16 %v7144_v34  ;;  %v4227_v34 = vunpack.i.h.bf16 %v7298_v50 }
 0x4f8   : > { %v7347_v57 = vpop.permute.xlu2 %4254  ;;  %v4245_v25 = vpop.permute.xlu0 %4244 }
 0x4f9   : > { %v4220_v19 = vpop.permute.xlu1 %4219  ;;  %3639 = vmatpush.xpose.msrb.mxu1 %v3396_v27  ;;  %v3434_v27 = vsel %vm281_vm3, %v2407_v44, %v4231_v43  ;;  %v2406_v43 = vld [vmem:[#allocation3 + $0xb1] sm:$0xff]  ;;  %v3394_v5 = vsel %vm3387_vm13, %v6947_v47, %v4141_v38  ;;  %v2405_v38 = vld [vmem:[#allocation3 + $0xa9] sm:$0xff] }
 0x4fa   : > { %v4222_v3 = vunpack.i.h.bf16 %v4220_v19  ;;  %v4221_v28 = vunpack.i.l.bf16 %v4220_v19  ;;  %v7357_v19 = vld [vmem:[#allocation3 + $0xf1] sm:$0xff] }
 0x4fc   : > { %v3467_v48 = vsel %vm3354_vm12, %v3435_v10, %v4221_v28  ;;  %v3466_v23 = vsel %vm3354_vm12, %v3434_v27, %v4222_v3  ;;  %v8134_v28 = vpack.i.bf16 %v8132_v14, %v8133_v36  ;;  %v3433_v3 = vsel %vm281_vm3, %v2406_v43, %v4232_v53 }
 0x4fd   : > { %3640 = vmatpush.xpose.msrb.mxu1 %v3395_v24  ;;  %v3499_v2 = vsel %vm3387_vm13, %v3467_v48, %v4226_v61  ;;  %v4246_v61 = vunpack.i.l.bf16 %v4245_v25  ;;  %v3498_v10 = vsel %vm3387_vm13, %v3466_v23, %v4227_v34  ;;  %v3393_v27 = vsel %vm3387_vm13, %v7007_v13, %v4137_v55 }
 0x4fe   : > { %3652 = vmatpush.xpose.msrb.mxu2 %v3499_v2  ;;  %4434 = vrot.lane.b32.xlu2 %v8134_v28, %s4496_s21  ;;  %v4242_v2 = vunpack.i.h.bf16 %v7331_v21  ;;  %v3465_v47 = vsel %vm3354_vm12, %v3433_v3, %v4241_v9  ;;  %v4256_v53 = vunpack.i.l.bf16 %v7347_v57  ;;  %v4247_v14 = vunpack.i.h.bf16 %v4245_v25 }
 0x4ff   : > { %3258 = vrot.lane.b32.xlu1 %v7357_v19, %s4497_s22  ;;  %v3497_v34 = vsel %vm3387_vm13, %v3465_v47, %v4246_v61  ;;  %v4257_v61 = vunpack.i.h.bf16 %v7347_v57 }
 0x500   : > { %v7372_v60 = vpop.permute.xlu2 %4269  ;;  %v4260_v44 = vpop.permute.xlu0 %4259 }
 0x501   : > { %v4235_v50 = vpop.permute.xlu1 %4234  ;;  %3641 = vmatpush.xpose.msrb.mxu1 %v3394_v5  ;;  %v4261_v55 = vunpack.i.l.bf16 %v4260_v44 }
 0x502   : > { %v4237_v24 = vunpack.i.h.bf16 %v4235_v50  ;;  %v4236_v48 = vunpack.i.l.bf16 %v4235_v50  ;;  %3653 = vmatpush.xpose.msrb.mxu2 %v3498_v10  ;;  %v4271_v50 = vunpack.i.l.bf16 %v7372_v60  ;;  %v2404_v10 = vld [vmem:[#allocation3 + $0x99] sm:$0xff] }
 0x504   : > { %v3451_v36 = vsel %vm281_vm3, %v6937_v29, %v4236_v48  ;;  %v3432_v23 = vsel %vm281_vm3, %v2405_v38, %v4237_v24  ;;  %v2423_v24 = vld [vmem:[#allocation3 + $0x181] sm:$0xff]  ;;  %v4262_v48 = vunpack.i.h.bf16 %v4260_v44 }
 0x505   : > { %3642 = vmatpush.xpose.msrb.mxu1 %v3393_v27  ;;  %v3483_v28 = vsel %vm3354_vm12, %v3451_v36, %v4242_v2  ;;  %v3464_v21 = vsel %vm3354_vm12, %v3432_v23, %v4256_v53 }
 0x506   : > { %3654 = vmatpush.xpose.msrb.mxu2 %v3497_v34  ;;  %v7387_v13 = vsel %vm3387_vm13, %v3483_v28, %v4247_v14  ;;  %v3496_v29 = vsel %vm3387_vm13, %v3464_v21, %v4261_v55  ;;  %v2403_v21 = vld [vmem:[#allocation3 + $0x91] sm:$0xff] }
 0x507   : > { %v2422_v55 = vld [vmem:[#allocation3 + $0x171] sm:$0xff] }
 0x508   : > { %v7389_v9 = vpop.permute.xlu2 %4284  ;;  %v4275_v3 = vpop.permute.xlu0 %4274 }
 0x509   : > { %v4250_v25 = vpop.permute.xlu1 %4249  ;;  %3643 = vmatpush.xpose.msrb.mxu1 %v7118_v33  ;;  %v4276_v2 = vunpack.i.l.bf16 %v4275_v3  ;;  %v4286_v28 = vunpack.i.l.bf16 %v7389_v9 }
 0x50a   : > { %v4252_v43 = vunpack.i.h.bf16 %v4250_v25  ;;  %v4251_v5 = vunpack.i.l.bf16 %v4250_v25  ;;  %3655 = vmatpush.xpose.msrb.mxu2 %v3496_v29  ;;  %v4277_v25 = vunpack.i.h.bf16 %v4275_v3  ;;  %v4201_v3 = vunpack.i.l.bf16 %v7257_v59 }
 0x50c   : > { %v3431_v27 = vsel %vm281_vm3, %v2404_v10, %v4252_v43  ;;  %v3450_v47 = vsel %vm281_vm3, %v2423_v24, %v4251_v5 }
 0x50d   : > { %3644 = vmatpush.xpose.msrb.mxu1 %v7167_v17  ;;  %v3463_v33 = vsel %vm3354_vm12, %v3431_v27, %v4271_v50  ;;  %v3482_v38 = vsel %vm3354_vm12, %v3450_v47, %v4257_v61  ;;  %v4272_v17 = vunpack.i.h.bf16 %v7372_v60  ;;  %v4202_v61 = vunpack.i.h.bf16 %v7257_v59 }
 0x50e   : > { %v3495_v53 = vsel %vm3387_vm13, %v3463_v33, %v4276_v2  ;;  %v7402_v57 = vsel %vm3387_vm13, %v3482_v38, %v4262_v48  ;;  %v4287_v33 = vunpack.i.h.bf16 %v7389_v9 }
 0x50f   : > { %3656 = vmatpush.xpose.msrb.mxu2 %v3495_v53  ;;  %v3419_v48 = vsel %vm3387_vm13, %v7082_v30, %v4202_v61  ;;  %v2402_v53 = vld [vmem:[#allocation3 + $0x81] sm:$0xff]  ;;  %v3418_v30 = vsel %vm3387_vm13, %v7085_v51, %v4201_v3  ;;  %v2401_v61 = vld [vmem:[#allocation3 + $0x79] sm:$0xff] }
 0x510   : > { %v7404_v14 = vpop.permute.xlu2 %4299  ;;  %v4290_v34 = vpop.permute.xlu0 %4289 }
 0x511   : > { %v4265_v44 = vpop.permute.xlu1 %4264  ;;  %3645 = vmatpush.xpose.msrb.mxu1 %v7171_v20  ;;  %v4291_v29 = vunpack.i.l.bf16 %v4290_v34  ;;  %v4301_v38 = vunpack.i.l.bf16 %v7404_v14  ;;  %v4302_v51 = vunpack.i.h.bf16 %v7404_v14 }
 0x512   : > { %v4267_v36 = vunpack.i.h.bf16 %v4265_v44  ;;  %v4266_v23 = vunpack.i.l.bf16 %v4265_v44  ;;  %v2421_v44 = vld [vmem:[#allocation3 + $0x169] sm:$0xff] }
 0x514   : > { %v3430_v43 = vsel %vm281_vm3, %v2403_v21, %v4267_v36  ;;  %v3449_v5 = vsel %vm281_vm3, %v2422_v55, %v4266_v23  ;;  %v4292_v36 = vunpack.i.h.bf16 %v4290_v34 }
 0x515   : > { %3646 = vmatpush.xpose.msrb.mxu1 %v7128_v58  ;;  %v3462_v20 = vsel %vm3354_vm12, %v3430_v43, %v4286_v28  ;;  %v3481_v50 = vsel %vm3354_vm12, %v3449_v5, %v4272_v17  ;;  %v4197_v17 = vunpack.i.h.bf16 %v7217_v52 }
 0x516   : > { %v3494_v60 = vsel %vm3387_vm13, %v3462_v20, %v4291_v29  ;;  %v7417_v10 = vsel %vm3387_vm13, %v3481_v50, %v4277_v25  ;;  %v2420_v20 = vld [vmem:[#allocation3 + $0x159] sm:$0xff] }
 0x517   : > { %3657 = vmatpush.xpose.msrb.mxu2 %v3494_v60  ;;  %v3417_v25 = vsel %vm3387_vm13, %v7149_v39, %v4197_v17 }
 0x518   : > { %v4315_v2 = vpop.permute.xlu2 %4314  ;;  %v4305_v47 = vpop.permute.xlu0 %4304 }
 0x519   : > { %v4280_v24 = vpop.permute.xlu1 %4279  ;;  %3647 = vmatpush.xpose.msrb.mxu1 %v7132_v11  ;;  %v4306_v23 = vunpack.i.l.bf16 %v4305_v47  ;;  %v4316_v5 = vunpack.i.l.bf16 %v4315_v2  ;;  %v4307_v50 = vunpack.i.h.bf16 %v4305_v47 }
 0x51a   : > { %v4282_v58 = vunpack.i.h.bf16 %v4280_v24  ;;  %v4281_v27 = vunpack.i.l.bf16 %v4280_v24 }
 0x51c   : > { %v3429_v59 = vsel %vm281_vm3, %v2402_v53, %v4282_v58  ;;  %v3448_v11 = vsel %vm281_vm3, %v2421_v44, %v4281_v27  ;;  %v4192_v58 = vunpack.i.h.bf16 %v7300_v37  ;;  %v4317_v37 = vunpack.i.h.bf16 %v4315_v2 }
 0x51d   : > { %3692 = vmatpush.xpose.msra.mxu1 %v3419_v48  ;;  %v3461_v28 = vsel %vm3354_vm12, %v3429_v59, %v4301_v38  ;;  %v3480_v21 = vsel %vm3354_vm12, %v3448_v11, %v4287_v33  ;;  %v2419_v59 = vld [vmem:[#allocation3 + $0x151] sm:$0xff] }
 0x51e   : > { %v3493_v9 = vsel %vm3387_vm13, %v3461_v28, %v4306_v23  ;;  %v7434_v55 = vsel %vm3387_vm13, %v3480_v21, %v4292_v36  ;;  %v3415_v38 = vsel %vm3387_vm13, %v7098_v45, %v4192_v58 }
 0x51f   : > { %3658 = vmatpush.xpose.msrb.mxu2 %v3493_v9 }
 0x520   : > { %v4320_v43 = vpop.permute.xlu0 %4319  ;;  %v4330_v60 = vpop.permute.xlu2 %4329 }
 0x521   : > { %3693 = vmatpush.xpose.msra.mxu1 %v3418_v30  ;;  %v4295_v34 = vpop.permute.xlu1 %4294  ;;  %v4321_v3 = vunpack.i.l.bf16 %v4320_v43  ;;  %v4331_v23 = vunpack.i.l.bf16 %v4330_v60  ;;  %v4322_v11 = vunpack.i.h.bf16 %v4320_v43 }
 0x522   : > { %v4297_v29 = vunpack.i.h.bf16 %v4295_v34  ;;  %v4296_v52 = vunpack.i.l.bf16 %v4295_v34 }
 0x524   : > { %v3428_v24 = vsel %vm281_vm3, %v2401_v61, %v4297_v29  ;;  %v3447_v48 = vsel %vm281_vm3, %v2420_v20, %v4296_v52 }
 0x525   : > { %3694 = vmatpush.xpose.msra.mxu1 %v3417_v25  ;;  %v3460_v39 = vsel %vm3354_vm12, %v3428_v24, %v4316_v5  ;;  %v3479_v27 = vsel %vm3354_vm12, %v3447_v48, %v4302_v51  ;;  %v2418_v51 = vld [vmem:[#allocation3 + $0x141] sm:$0xff] }
 0x526   : > { %v3492_v14 = vsel %vm3387_vm13, %v3460_v39, %v4321_v3  ;;  %v7447_v33 = vsel %vm3387_vm13, %v3479_v27, %v4307_v50 }
 0x527   : > { %3659 = vmatpush.xpose.msrb.mxu2 %v3492_v14 }
 0x528   : > { %v4345_v9 = vpop.permute.xlu2 %4344 }
 0x529   : > { %3695 = vmatpush.xpose.msra.mxu1 %v7229_v22  ;;  %v4310_v47 = vpop.permute.xlu1 %4309  ;;  %v4335_v36 = vpop.permute.xlu0 %4334  ;;  %v4346_v43 = vunpack.i.l.bf16 %v4345_v9 }
 0x52a   : > { %v4312_v53 = vunpack.i.h.bf16 %v4310_v47  ;;  %v4311_v44 = vunpack.i.l.bf16 %v4310_v47  ;;  %v4336_v17 = vunpack.i.l.bf16 %v4335_v36  ;;  %v4337_v5 = vunpack.i.h.bf16 %v4335_v36  ;;  %v2417_v47 = vld [vmem:[#allocation3 + $0x139] sm:$0xff] }
 0x52c   : > { %v3427_v22 = vsel %vm281_vm3, %v7156_v1, %v4312_v53  ;;  %v3446_v30 = vsel %vm281_vm3, %v2419_v59, %v4311_v44  ;;  %v4332_v1 = vunpack.i.h.bf16 %v4330_v60 }
 0x52d   : > { %3696 = vmatpush.xpose.msra.mxu1 %v3415_v38  ;;  %v3459_v28 = vsel %vm3354_vm12, %v3427_v22, %v4331_v23  ;;  %v3478_v21 = vsel %vm3354_vm12, %v3446_v30, %v4317_v37 }
 0x52e   : > { %v3491_v45 = vsel %vm3387_vm13, %v3459_v28, %v4336_v17  ;;  %v7459_v2 = vsel %vm3387_vm13, %v3478_v21, %v4322_v11 }
 0x52f   : > { %3660 = vmatpush.xpose.msrb.mxu2 %v3491_v45 }
 0x530   : > { %v4360_v60 = vpop.permute.xlu2 %4359 }
 0x531   : > { %3697 = vmatpush.xpose.msra.mxu1 %v7316_v42  ;;  %v4325_v34 = vpop.permute.xlu1 %4324  ;;  %v4350_v52 = vpop.permute.xlu0 %4349  ;;  %v4361_v14 = vunpack.i.l.bf16 %v4360_v60 }
 0x532   : > { %v4327_v25 = vunpack.i.h.bf16 %v4325_v34  ;;  %v4326_v29 = vunpack.i.l.bf16 %v4325_v34  ;;  %v4351_v61 = vunpack.i.l.bf16 %v4350_v52  ;;  %v4352_v38 = vunpack.i.h.bf16 %v4350_v52 }
 0x534   : > { %v3426_v42 = vsel %vm281_vm3, %v7226_v16, %v4327_v25  ;;  %v3445_v20 = vsel %vm281_vm3, %v2418_v51, %v4326_v29  ;;  %v4347_v16 = vunpack.i.h.bf16 %v4345_v9  ;;  %v4216_v9 = vunpack.i.l.bf16 %v7303_v41 }
 0x535   : > { %3698 = vmatpush.xpose.msra.mxu1 %v7237_v12  ;;  %v3458_v50 = vsel %vm3354_vm12, %v3426_v42, %v4346_v43  ;;  %v3477_v3 = vsel %vm3354_vm12, %v3445_v20, %v4332_v1 }
 0x536   : > { %v3490_v24 = vsel %vm3387_vm13, %v3458_v50, %v4351_v61  ;;  %v7470_v12 = vsel %vm3387_vm13, %v3477_v3, %v4337_v5 }
 0x537   : > { %3661 = vmatpush.xpose.msrb.mxu2 %v3490_v24  ;;  %v4211_v24 = vunpack.i.l.bf16 %v7255_v31 }
 0x538   : > { %v4375_v11 = vpop.permute.xlu2 %4374 }
 0x539   : > { %3699 = vmatpush.xpose.msra.mxu1 %v7241_v15  ;;  %v4340_v48 = vpop.permute.xlu1 %4339  ;;  %v4365_v27 = vpop.permute.xlu0 %4364  ;;  %v4377_v29 = vunpack.i.h.bf16 %v4375_v11  ;;  %v4376_v52 = vunpack.i.l.bf16 %v4375_v11 }
 0x53a   : > { %v4342_v58 = vunpack.i.h.bf16 %v4340_v48  ;;  %v4341_v39 = vunpack.i.l.bf16 %v4340_v48  ;;  %v4366_v53 = vunpack.i.l.bf16 %v4365_v27  ;;  %v4367_v30 = vunpack.i.h.bf16 %v4365_v27 }
 0x53c   : > { %v3425_v15 = vsel %vm281_vm3, %v7270_v26, %v4342_v58  ;;  %v3444_v44 = vsel %vm281_vm3, %v2417_v47, %v4341_v39  ;;  %v4362_v26 = vunpack.i.h.bf16 %v4360_v60  ;;  %v8135_v60 = vld [vmem:[#allocation81_spill] sm:$0xff] }
 0x53d   : > { %3700 = vmatpush.xpose.msra.mxu1 %v7193_v0  ;;  %v3457_v36 = vsel %vm3354_vm12, %v3425_v15, %v4361_v14  ;;  %v3476_v37 = vsel %vm3354_vm12, %v3444_v44, %v4347_v16  ;;  %v4207_v16 = vunpack.i.h.bf16 %v7333_v35  ;;  %v2394_v15 = vld [vmem:[#allocation3 + $0x21] sm:$0xff]  ;;  %v4206_v44 = vunpack.i.l.bf16 %v7333_v35 }
 0x53e   : > { %v3489_v23 = vsel %vm3387_vm13, %v3457_v36, %v4366_v53  ;;  %v7481_v0 = vsel %vm3387_vm13, %v3476_v37, %v4352_v38 }
 0x53f   : > { %3662 = vmatpush.xpose.msrb.mxu2 %v3489_v23  ;;  %v3421_v36 = vsel %vm281_vm3, %v2394_v15, %v4207_v16 }
 0x541   : > { %3701 = vmatpush.xpose.msra.mxu1 %v7196_v63  ;;  %v4355_v59 = vpop.permute.xlu1 %4354  ;;  %v7484_v22 = vpop.permute.xlu0 %4379 }
 0x542   : > { %v4356_v17 = vunpack.i.l.bf16 %v4355_v59  ;;  %v4357_v45 = vunpack.i.h.bf16 %v4355_v59 }
 0x544   : > { %v3443_v28 = vsel %vm281_vm3, %v7261_v40, %v4356_v17  ;;  %v3424_v40 = vsel %vm281_vm3, %v7272_v56, %v4216_v9  ;;  %v3442_v1 = vsel %vm281_vm3, %v7263_v49, %v4357_v45  ;;  %v4212_v56 = vunpack.i.h.bf16 %v7255_v31  ;;  %v2393_v17 = vld [vmem:[#allocation3 + $0x19] sm:$0xff] }
 0x545   : > { %3702 = vmatpush.xpose.msra.mxu1 %v7276_v32  ;;  %v3475_v63 = vsel %vm3354_vm12, %v3443_v28, %v4362_v26  ;;  %v3420_v26 = vsel %vm281_vm3, %v2393_v17, %v4206_v44  ;;  %v3516_v28 = vld [vmem:[%s7622_s3] sm:$0xff] }
 0x546   : > { %v7491_v21 = vsel %vm3387_vm13, %v3475_v63, %v4367_v30  ;;  %v3423_v20 = vsel %vm281_vm3, %v7312_v18, %v4212_v56  ;;  %v3422_v18 = vsel %vm281_vm3, %v7286_v6, %v4211_v24  ;;  %3526 = vst [vmem:[#allocation1] ss:$2 sm:$0xff] %v3516_v28  ;;  %v3517_v63 = vld [vmem:[%s7622_s3 + $0x8] sm:$0xf] }
 0x547   : > { %3528 = vst [vmem:[#allocation1 + $0x10] ss:$2 sm:$0xff] %v3517_v63 }
 0x549   : > { %3703 = vmatpush.xpose.msra.mxu1 %v7280_v62  ;;  %v4370_v34 = vpop.permute.xlu1 %4369  ;;  %v7499_v62 = vpop.permute.xlu2 %4389 }
 0x54a   : > { %v4372_v25 = vunpack.i.h.bf16 %v4370_v34  ;;  %v4371_v32 = vunpack.i.l.bf16 %v4370_v34  ;;  %v7503_v51 = vpop.permute.xlu0 %4394  ;;  %v4391_v42 = vunpack.i.l.bf16 %v7499_v62  ;;  %v4382_v34 = vunpack.i.h.bf16 %v7484_v22 }
 0x54b   : > { %v4396_v48 = vunpack.i.l.bf16 %v7503_v51 }
 0x54c   : > { %v3456_v43 = vsel %vm3354_vm12, %v3424_v40, %v4371_v32  ;;  %v3474_v41 = vsel %vm3354_vm12, %v3442_v1, %v4372_v25  ;;  %v4397_v25 = vunpack.i.h.bf16 %v7503_v51  ;;  %v8136_v51 = vld [vmem:[#allocation148_spill] sm:$0xff] }
 0x54d   : > { %3704 = vmatpush.xpose.msra.mxu1 %v7204_v4  ;;  %v3488_v5 = vsel %vm3387_vm13, %v3456_v43, %v4376_v52  ;;  %v7507_v4 = vsel %vm3387_vm13, %v3474_v41, %v4377_v29  ;;  %v3454_v27 = vsel %vm3354_vm12, %v3422_v18, %v4396_v48  ;;  %v7562_v9 = vld.sshfl [vmem:[#allocation1 + $0x8] sm:$0xff pattern:$0x75316420]  ;;  %v3529_v45 = vld.sshfl [vmem:[#allocation1] sm:$0xff pattern:$0x75316420] }
 0x54e   : > { %3663 = vmatpush.xpose.msrb.mxu2 %v3488_v5  ;;  %3648 = vmatmul.f32.vlgmr.msrb.gmra.mxu1 %v3529_v45 }
 0x551   : > { %3705 = vmatpush.xpose.msra.mxu1 %v7208_v54  ;;  %v7511_v61 = vpop.permute.xlu1 %4384  ;;  %v7521_v54 = vpop.permute.xlu2 %4404 }
 0x552   : > { %v4386_v49 = vunpack.i.l.bf16 %v7511_v61  ;;  %v7525_v58 = vpop.permute.xlu0 %4409  ;;  %v4406_v29 = vunpack.i.l.bf16 %v7521_v54  ;;  %v4407_v43 = vunpack.i.h.bf16 %v7521_v54 }
 0x553   : > { %v4411_v14 = vunpack.i.l.bf16 %v7525_v58  ;;  %v4412_v52 = vunpack.i.h.bf16 %v7525_v58 }
 0x554   : > { %v3455_v50 = vsel %vm3354_vm12, %v3423_v20, %v4386_v49  ;;  %v3439_v5 = vsel %vm281_vm3, %v8136_v51, %v4406_v29  ;;  %v3438_v20 = vsel %vm281_vm3, %v7357_v19, %v4407_v43 }
 0x555   : > { %3706 = vmatpush.xpose.msra.mxu1 %v7175_v7  ;;  %v3487_v3 = vsel %vm3387_vm13, %v3455_v50, %v4391_v42  ;;  %v3453_v23 = vsel %vm3354_vm12, %v3421_v36, %v4411_v14  ;;  %v2410_v42 = vld [vmem:[#allocation3 + $0xe1] sm:$0xff] }
 0x556   : > { %3664 = vmatpush.xpose.msrb.mxu2 %v3487_v3 }
 0x559   : > { %3707 = vmatpush.xpose.msra.mxu1 %v8135_v60  ;;  %v7527_v7 = vpop.permute.xlu1 %4399  ;;  %v7536_v47 = vpop.permute.xlu2 %4419 }
 0x55a   : > { %v4401_v39 = vunpack.i.l.bf16 %v7527_v7  ;;  %v7538_v38 = vpop.permute.xlu0 %4424  ;;  %v4421_v37 = vunpack.i.l.bf16 %v7536_v47  ;;  %v4402_v32 = vunpack.i.h.bf16 %v7527_v7  ;;  %v2409_v7 = vld [vmem:[#allocation3 + $0xd9] sm:$0xff] }
 0x55b   : > { %v4426_v59 = vunpack.i.l.bf16 %v7538_v38 }
 0x55c   : > { %v3486_v31 = vsel %vm3387_vm13, %v3454_v27, %v4401_v39  ;;  %v3452_v30 = vsel %vm3354_vm12, %v3420_v26, %v4421_v37  ;;  %3708 = vmatmul.f32.vlgmr.msra.gmra.mxu1 %v3529_v45 }
 0x55d   : > { %3665 = vmatpush.xpose.msrb.mxu2 %v3486_v31  ;;  %v3484_v35 = vsel %vm3387_vm13, %v3452_v30, %v4426_v59 }
 0x561   : > { %v7540_v53 = vpop.permute.xlu1 %4414  ;;  %v4435_v56 = vpop.permute.xlu2 %4434 }
 0x562   : > { %v4416_v6 = vunpack.i.l.bf16 %v7540_v53  ;;  %v4436_v3 = vunpack.i.l.bf16 %v4435_v56  ;;  %v3261_v58 = vpop.permute.xlu0 %3260  ;;  %v4437_v27 = vunpack.i.h.bf16 %v4435_v56 }
 0x564   : > { %v3485_v11 = vsel %vm3387_vm13, %v3453_v23, %v4416_v6 }
 0x565   : > { %3666 = vmatpush.xpose.msrb.mxu2 %v3485_v11 }
 0x569   : > { %3667 = vmatpush.xpose.msrb.mxu2 %v3484_v35  ;;  %v4430_v40 = vpop.permute.xlu1 %4429 }
 0x56a   : > { %v4431_v41 = vunpack.i.l.bf16 %v4430_v40  ;;  %v4432_v54 = vunpack.i.h.bf16 %v4430_v40 }
 0x56c   : > { %3668 = vmatmul.f32.vlgmr.msrb.gmra.mxu2 %v7562_v9  ;;  %v3437_v50 = vsel %vm281_vm3, %v2410_v42, %v4431_v41  ;;  %v3436_v18 = vsel %vm281_vm3, %v2409_v7, %v4432_v54 }
 0x56d   : > { %3712 = vmatpush.xpose.msra.mxu2 %v7387_v13  ;;  %v3531_v13 = vld.sshfl [vmem:[#allocation1 + $0x10] sm:$0xff pattern:$0x75316420]  ;;  %v3469_v48 = vsel %vm3354_vm12, %v3437_v50, %v4436_v3  ;;  %v3468_v19 = vsel %vm3354_vm12, %v3436_v18, %v4437_v27 }
 0x56e   : > { %3909 = vmatmul.msk.f32.vlgmr.msra.gmra.mxu3 %vm281_vm3, %v3531_v13  ;;  %v3501_v39 = vsel %vm3387_vm13, %v3469_v48, %v3261_v58 }
 0x571   : > { %3713 = vmatpush.xpose.msra.mxu2 %v7402_v57  ;;  %v4381_v57 = vunpack.i.l.bf16 %v7484_v22  ;;  %v3259_v31 = vpop.permute.xlu1 %3258 }
 0x572   : > { %v3500_v16 = vsel %vm3387_vm13, %v3468_v19, %v3259_v31 }
 0x575   : > { %3714 = vmatpush.xpose.msra.mxu2 %v7417_v10  ;;  %v3518_v10 = vld [vmem:[%s7623_s4] sm:$0xf] }
 0x576   : > { %3926 = vmatmul.msk.f32.vlgmr.msrb.gmra.mxu3 %vm281_vm3, %v3531_v13 }
 0x579   : > { %3715 = vmatpush.xpose.msra.mxu2 %v7434_v55  ;;  %v4387_v55 = vunpack.i.h.bf16 %v7511_v61  ;;  %v4427_v61 = vunpack.i.h.bf16 %v7538_v38 }
 0x57d   : > { %3716 = vmatpush.xpose.msra.mxu2 %v7447_v33  ;;  %v4498_v33 = vmov 0  }
 0x57e   : > { %4438 = vset.pattern.permute.xlu2 %v4498_v33  ;;  %4439 = vset.pattern.permute.xlu0 %v4498_v33 }
 0x57f   : > { %3521 = vperm.xlu2 %4438, %v3518_v10  }
 0x581   : > { %3717 = vmatpush.xpose.msra.mxu2 %v7459_v2  ;;  %v3441_v2 = vsel %vm281_vm3, %v7307_v8, %v4381_v57  ;;  %v3440_v8 = vsel %vm281_vm3, %v7266_v46, %v4382_v34  ;;  %v3471_v46 = vsel %vm3354_vm12, %v3439_v5, %v4412_v52 }
 0x582   : > { %v3472_v1 = vsel %vm3354_vm12, %v3440_v8, %v4397_v25 }
 0x583   : > { %v3504_v22 = vsel %vm3387_vm13, %v3472_v1, %v4402_v32 }
 0x585   : > { %3718 = vmatpush.xpose.msra.mxu2 %v7470_v12  ;;  %v3473_v12 = vsel %vm3354_vm12, %v3441_v2, %v4387_v55 }
 0x589   : > { %3719 = vmatpush.xpose.msra.mxu2 %v7481_v0  ;;  %v4392_v0 = vunpack.i.h.bf16 %v7499_v62  ;;  %v4417_v62 = vunpack.i.h.bf16 %v7540_v53 }
 0x58b   : > { %v3503_v49 = vsel %vm3387_vm13, %v3471_v46, %v4417_v62 }
 0x58d   : > { %3720 = vmatpush.xpose.msra.mxu2 %v7491_v21  ;;  %v3505_v21 = vsel %vm3387_vm13, %v3473_v12, %v4392_v0 }
 0x591   : > { %3721 = vmatpush.xpose.msra.mxu2 %v7507_v4  ;;  %v4422_v4 = vunpack.i.h.bf16 %v7536_v47 }
 0x593   : > { %v3470_v24 = vsel %vm3354_vm12, %v3438_v20, %v4422_v4 }
 0x594   : > { %v3502_v60 = vsel %vm3387_vm13, %v3470_v24, %v4427_v61 }
 0x595   : > { %3722 = vmatpush.xpose.msra.mxu2 %v3505_v21 }
 0x599   : > { %3723 = vmatpush.xpose.msra.mxu2 %v3504_v22 }
 0x59d   : > { %3724 = vmatpush.xpose.msra.mxu2 %v3503_v49 }
 0x5a1   : > { %3725 = vmatpush.xpose.msra.mxu2 %v3502_v60 }
 0x5a5   : > { %3726 = vmatpush.xpose.msra.mxu2 %v3501_v39 }
 0x5a9   : > { %3727 = vmatpush.xpose.msra.mxu2 %v3500_v16 }
 0x5ac   : > { %3728 = vmatmul.f32.vlgmr.msra.gmra.mxu2 %v7562_v9 }
 0x5cb   : > { %v3649_v47 = vpop.f32.mrf.mxu1 }
 0x5d9   : > { %v3522_v14 = vpop.permute.xlu2 %3521  ;;  %v3709_v37 = vpop.f32.mrf.mxu1 }
 0x5da   : > { %v3650_v38 = vadd.f32 %v3649_v47, %v3522_v14  ;;  %v3710_v23 = vadd.f32 %v3709_v37, %v3522_v14 }
 0x5ef   : > { %v3669_v53 = vpop.f32.mrf.mxu2 }
 0x5f0   : > { %v3670_v15 = vadd.f32 %v3669_v53, %v3650_v38 }
 0x5f1   : > { %v3689_v44 = vpop.f32.mrf.mxu3 }
 0x5f2   : > { %v3690_v6 = vadd.f32 %v3689_v44, %v3670_v15 }
 0x5f4   : > { %v3927_v36 = vmul.f32 -1.442695, %v3690_v6 }
 0x5f6   : > { %4441 = vpow2.f32 %v3927_v36 }
 0x5f9   : > { %v3749_v17 = vpop.f32.mrf.mxu3 }
 0x5fc   : > { %v4442_v59 = vpop.eup %4441 }
 0x5fd   : > { %v3758_v30 = vadd.f32 1.0, %v4442_v59 }
 0x5ff   : > { %4443 = vrcp.f32 %v3758_v30  ;;  %vm3765_vm14 = vweird.f32 %v3758_v30  ;;  %v3769_v12 = vand.u32 2147483647, %v3758_v30  ;;  %v3771_v0 = vand.u32 2147483648, %v3758_v30 }
 0x601   : > { %v3772_v8 = vor.u32 1.1754944e-38, %v3771_v0  ;;  %vm3770_vm5 = vcmp.eq.f32.partialorder %v3769_v12, 8.507059e+37 }
 0x605   : > { %v4444_v63 = vpop.eup %4443 }
 0x606   : > { %v3761_v13 = vmul.f32 %v4444_v63, %v3758_v30  ;;  %vm3766_vm15 = vweird.f32 %v4444_v63 }
 0x607   : > { %vm3767_vm1 = vmor %vm3765_vm14, %vm3766_vm15 }
 0x608   : > { %v3762_v57 = vsub.f32 1.0, %v3761_v13 }
 0x60a   : > { %v3763_v55 = vmul.f32 %v4444_v63, %v3762_v57 }
 0x60c   : > { %v3764_v25 = vadd.f32 %v4444_v63, %v3763_v55 }
 0x60e   : > { %v3768_v40 = vsel %vm3767_vm1, %v4444_v63, %v3764_v25 }
 0x60f   : > { %v3773_v43 = vsel %vm3770_vm5, %v3772_v8, %v3768_v40 }
 0x62f   : > { %v3729_v11 = vpop.f32.mrf.mxu2 }
 0x630   : > { %v3730_v26 = vadd.f32 %v3729_v11, %v3710_v23 }
 0x632   : > { %v3750_v35 = vadd.f32 %v3749_v17, %v3730_v26 }
 0x634   : > { %v3928_v28 = vmul.f32 -1.442695, %v3750_v35 }
 0x636   : > { %4445 = vpow2.f32 %v3928_v28 }
 0x63c   : > { %v4446_v9 = vpop.eup %4445 }
 0x63d   : > { %v3759_v45 = vadd.f32 1.0, %v4446_v9 }
 0x63f   : > { %4447 = vrcp.f32 %v3759_v45  ;;  %v3786_v34 = vand.u32 2147483648, %v3759_v45  ;;  %v3784_v21 = vand.u32 2147483647, %v3759_v45  ;;  %vm3780_vm3 = vweird.f32 %v3759_v45 }
 0x641   : > { %v3787_v52 = vor.u32 1.1754944e-38, %v3786_v34  ;;  %vm3785_vm6 = vcmp.eq.f32.partialorder %v3784_v21, 8.507059e+37 }
 0x645   : > { %v4448_v10 = vpop.eup %4447 }
 0x646   : > { %v3776_v33 = vmul.f32 %v4448_v10, %v3759_v45  ;;  %vm3781_vm0 = vweird.f32 %v4448_v10 }
 0x647   : > { %vm3782_vm4 = vmor %vm3780_vm3, %vm3781_vm0 }
 0x648   : > { %v3777_v2 = vsub.f32 1.0, %v3776_v33 }
 0x64a   : > { %v3778_v32 = vmul.f32 %v4448_v10, %v3777_v2 }
 0x64c   : > { %v3779_v29 = vadd.f32 %v4448_v10, %v3778_v32 }
 0x64e   : > { %v3783_v1 = vsel %vm3782_vm4, %v4448_v10, %v3779_v29 }
 0x64f   : > { %v3788_v62 = vsel %vm3785_vm6, %v3787_v52, %v3783_v1 }
 0x650   : > { %v3792_v22 = vrot.slane %v3788_v62, 4 }
 0x652   : > { %v3793_v41 = vsel %vm2083_vm2, %v3773_v43, %v3792_v22 }
 0x653   : > { %3795 = vst [vmem:[%s224_s7] sm:$0xff] %v3793_v41 }
 0x654 PF: > { %s15_s18 = sadd.s32 1, %s4485_s18  }
 0x655   : > { %p12_p4 = scmp.ge.s32.totalorder %s15_s18, 4  }
 0x657   :  { %14 = sbr.rel (!%p12_p4) target bundleno = 1 (0x1), region = 75 }

</bundles_post_ra>
